<compile_context>
chip_gen: v7x
topology: tpu7x:2x2x1
jax: 0.10.0
libtpu: 0.0.40
codegen_flags: <defaults>
</compile_context>

<pallas_src>
import functools
import math

import numpy as np
import jax
import jax.numpy as jnp
from jax import lax
from jax.experimental import pallas as pl
from jax.experimental.pallas import tpu as pltpu

_EPS = 1e-6
_NEG_BIG = -1e30
_VMEM_LIMIT = 64 * 1024 * 1024


# ----------------------------- in-kernel helpers -----------------------------

def _norm_f32(x, alpha, beta):
    """NormLayer: alpha * (x - mean) / (std_unbiased + eps) + beta  (torch.std, ddof=1)."""
    d = x.shape[-1]
    mean = jnp.mean(x, axis=-1, keepdims=True)
    xc = x - mean
    var = jnp.sum(xc * xc, axis=-1, keepdims=True) * (1.0 / float(d - 1))
    inv = pl.reciprocal(jnp.sqrt(var) + _EPS, approx=False)     # (rows,1) reciprocal, not a divide
    return xc * (inv * alpha) + beta


def _softmax_rows(s):
    s = s - jnp.max(s, axis=-1, keepdims=True)
    e = jnp.exp(s)
    return e * pl.reciprocal(jnp.sum(e, axis=-1, keepdims=True), approx=True)


def _pick_row_tile(m):
    """Largest row tile (multiple of 8) that divides m and still leaves >=2 grid steps."""
    for t in (512, 256, 128, 64, 32, 16, 8):
        if m % t == 0 and m // t >= 2:
            return t
    return m


def _pick_seq_tile(s):
    """Query-tile size: multiple of 8 dividing s, capped at 256; full s if nothing fits."""
    for t in (256, 128, 64, 32, 16, 8):
        if s % t == 0 and s // t >= 2:
            return t
    return s


def _full_spec(shape):
    nd = len(shape)
    return pl.BlockSpec(shape, lambda *_: (0,) * nd)


# ----------------------------- Pallas kernels -----------------------------

def _self_attn_layer_kernel(xq_ref, xfull_ref, kpad_ref, wqkv_ref, bqkv_ref,
                            wo_ref, bo_ref, alpha_ref, beta_ref, o_ref, kv_ref,
                            *, heads):
    # grid = (batch, query-tile).  kv_ref: (S, 2D) bf16 scratch, persists across query tiles.
    qi = pl.program_id(1)
    xq = xq_ref[0]                                        # (tq, D) f32 (also the residual)
    tq, d = xq.shape
    dk = d // heads
    s_full = kv_ref.shape[0]
    alpha = alpha_ref[...]
    beta = beta_ref[...]

    # K/V projection of the FULL normed sequence: once per batch element, cached in VMEM scratch.
    @pl.when(qi == 0)
    def _():
        xn_full = _norm_f32(xfull_ref[0], alpha, beta)    # (S, D)
        kv = jnp.dot(xn_full.astype(jnp.bfloat16), wqkv_ref[:, d:],
                     preferred_element_type=jnp.float32) + bqkv_ref[:, d:]
        kv_ref[...] = kv.astype(jnp.bfloat16)

    # Q projection for this query tile (1/sqrt(dk) pre-folded into wq/bq); single bf16 cast.
    xn_q = _norm_f32(xq, alpha, beta)
    q = (jnp.dot(xn_q.astype(jnp.bfloat16), wqkv_ref[:, :d],
                 preferred_element_type=jnp.float32) + bqkv_ref[:, :d]).astype(jnp.bfloat16)

    # causal mask generated in-kernel + compact key-padding mask (no (B,S,S) HBM traffic)
    q_pos = qi * tq + lax.broadcasted_iota(jnp.int32, (tq, s_full), 0)
    k_pos = lax.broadcasted_iota(jnp.int32, (tq, s_full), 1)
    allowed = (q_pos >= k_pos) & (kpad_ref[0] != 0)       # (tq, S) via (1,S) broadcast

    ctxs = []
    for h in range(heads):                                # static unrolled head loop
        qh = q[:, h * dk:(h + 1) * dk]
        kh = kv_ref[:, h * dk:(h + 1) * dk]               # (S, dk) bf16, read from scratch ref
        vh = kv_ref[:, d + h * dk:d + (h + 1) * dk]
        s = lax.dot_general(qh, kh, (((1,), (1,)), ((), ())),
                            preferred_element_type=jnp.float32)     # (tq, S), no k.T materialized
        p = _softmax_rows(jnp.where(allowed, s, _NEG_BIG))
        ctxs.append(jnp.dot(p.astype(jnp.bfloat16), vh,
                            preferred_element_type=jnp.float32))
    concat = jnp.concatenate(ctxs, axis=-1).astype(jnp.bfloat16)    # (tq, D)
    attn = jnp.dot(concat, wo_ref[...], preferred_element_type=jnp.float32)  # single K=D out-proj

    o_ref[0] = xq + attn + bo_ref[...]                    # residual fused


def _cross_attn_layer_kernel(xq_ref, e_ref, srcmask_ref, wq_ref, bq_ref,
                             wkv_ref, bkv_ref, wo_ref, bo_ref, alpha_ref, beta_ref,
                             o_ref, kv_ref, *, heads):
    qi = pl.program_id(1)
    xq = xq_ref[0]                                        # (tq, D)
    tq, d = xq.shape
    dk = d // heads

    # K/V from the (un-normed) encoder outputs: once per batch element, cached in scratch.
    @pl.when(qi == 0)
    def _():
        kv = jnp.dot(e_ref[0].astype(jnp.bfloat16), wkv_ref[...],
                     preferred_element_type=jnp.float32) + bkv_ref[...]
        kv_ref[...] = kv.astype(jnp.bfloat16)

    xn_q = _norm_f32(xq, alpha_ref[...], beta_ref[...])
    q = (jnp.dot(xn_q.astype(jnp.bfloat16), wq_ref[...],
                 preferred_element_type=jnp.float32) + bq_ref[...]).astype(jnp.bfloat16)

    allowed = srcmask_ref[0] != 0                         # (1, S_src) int compare, broadcast below

    ctxs = []
    for h in range(heads):
        qh = q[:, h * dk:(h + 1) * dk]
        kh = kv_ref[:, h * dk:(h + 1) * dk]
        vh = kv_ref[:, d + h * dk:d + (h + 1) * dk]
        s = lax.dot_general(qh, kh, (((1,), (1,)), ((), ())),
                            preferred_element_type=jnp.float32)
        p = _softmax_rows(jnp.where(allowed, s, _NEG_BIG))
        ctxs.append(jnp.dot(p.astype(jnp.bfloat16), vh,
                            preferred_element_type=jnp.float32))
    concat = jnp.concatenate(ctxs, axis=-1).astype(jnp.bfloat16)
    attn = jnp.dot(concat, wo_ref[...], preferred_element_type=jnp.float32)

    o_ref[0] = xq + attn + bo_ref[...]


def _ffn_layer_kernel(x_ref, alpha_ref, beta_ref, w1_ref, b1_ref, w2_ref, b2_ref, o_ref):
    # norm -> linear1 -> relu -> linear2 -> +residual  (dropout = identity in eval mode)
    x = x_ref[...]                                        # (tm, D)
    xn = _norm_f32(x, alpha_ref[...], beta_ref[...])
    h = jnp.dot(xn.astype(jnp.bfloat16), w1_ref[...],
                preferred_element_type=jnp.float32) + b1_ref[...]
    h = jnp.maximum(h, 0.0)
    y = jnp.dot(h.astype(jnp.bfloat16), w2_ref[...],
                preferred_element_type=jnp.float32) + b2_ref[...]
    o_ref[...] = x + y


def _norm_only_kernel(x_ref, alpha_ref, beta_ref, o_ref):
    o_ref[...] = _norm_f32(x_ref[...], alpha_ref[...], beta_ref[...])


# ----------------------------- kernel wrappers -----------------------------

def self_attn_sublayer(norm_p, attn_p, x, trg_kpad, heads):
    B, S, D = x.shape
    tq = _pick_seq_tile(S)
    kern = functools.partial(_self_attn_layer_kernel, heads=heads)
    return pl.pallas_call(
        kern,
        out_shape=jax.ShapeDtypeStruct((B, S, D), jnp.float32),
        grid=(B, S // tq),
        in_specs=[
            pl.BlockSpec((1, tq, D), lambda b, q: (b, q, 0)),   # query tile / residual
            pl.BlockSpec((1, S, D), lambda b, q: (b, 0, 0)),    # full sequence for K/V
            pl.BlockSpec((1, 1, S), lambda b, q: (b, 0, 0)),    # key-padding mask (B,1,S)
            _full_spec(attn_p["wqkv"].shape),
            _full_spec(attn_p["bqkv"].shape),
            _full_spec(attn_p["wo"].shape),
            _full_spec(attn_p["bo"].shape),
            _full_spec(norm_p["alpha"].shape),
            _full_spec(norm_p["beta"].shape),
        ],
        out_specs=pl.BlockSpec((1, tq, D), lambda b, q: (b, q, 0)),
        scratch_shapes=[pltpu.VMEM((S, 2 * D), jnp.bfloat16)],  # cached K/V per batch element
        compiler_params=pltpu.CompilerParams(
            dimension_semantics=("parallel", "arbitrary"),
            vmem_limit_bytes=_VMEM_LIMIT),
    )(x, x, trg_kpad, attn_p["wqkv"], attn_p["bqkv"], attn_p["wo"], attn_p["bo"],
      norm_p["alpha"], norm_p["beta"])


def cross_attn_sublayer(norm_p, attn_p, x, e_out, src_kpad, heads):
    B, Sq, D = x.shape
    Sk = e_out.shape[1]
    tq = _pick_seq_tile(Sq)
    kern = functools.partial(_cross_attn_layer_kernel, heads=heads)
    return pl.pallas_call(
        kern,
        out_shape=jax.ShapeDtypeStruct((B, Sq, D), jnp.float32),
        grid=(B, Sq // tq),
        in_specs=[
            pl.BlockSpec((1, tq, D), lambda b, q: (b, q, 0)),
            pl.BlockSpec((1, Sk, D), lambda b, q: (b, 0, 0)),   # encoder outputs (full)
            pl.BlockSpec((1, 1, Sk), lambda b, q: (b, 0, 0)),   # src padding mask (B,1,Sk)
            _full_spec(attn_p["wq"].shape),
            _full_spec(attn_p["bq"].shape),
            _full_spec(attn_p["wkv"].shape),
            _full_spec(attn_p["bkv"].shape),
            _full_spec(attn_p["wo"].shape),
            _full_spec(attn_p["bo"].shape),
            _full_spec(norm_p["alpha"].shape),
            _full_spec(norm_p["beta"].shape),
        ],
        out_specs=pl.BlockSpec((1, tq, D), lambda b, q: (b, q, 0)),
        scratch_shapes=[pltpu.VMEM((Sk, 2 * D), jnp.bfloat16)],
        compiler_params=pltpu.CompilerParams(
            dimension_semantics=("parallel", "arbitrary"),
            vmem_limit_bytes=_VMEM_LIMIT),
    )(x, e_out, src_kpad, attn_p["wq"], attn_p["bq"], attn_p["wkv"], attn_p["bkv"],
      attn_p["wo"], attn_p["bo"], norm_p["alpha"], norm_p["beta"])


def ffn_sublayer(norm_p, ff_p, x):
    B, S, D = x.shape
    M = B * S
    tm = _pick_row_tile(M)
    x2 = x.reshape(M, D)
    out = pl.pallas_call(
        _ffn_layer_kernel,
        out_shape=jax.ShapeDtypeStruct((M, D), jnp.float32),
        grid=(M // tm,),
        in_specs=[
            pl.BlockSpec((tm, D), lambda i: (i, 0)),
            _full_spec(norm_p["alpha"].shape),
            _full_spec(norm_p["beta"].shape),
            _full_spec(ff_p["w1"].shape),
            _full_spec(ff_p["b1"].shape),
            _full_spec(ff_p["w2"].shape),
            _full_spec(ff_p["b2"].shape),
        ],
        out_specs=pl.BlockSpec((tm, D), lambda i: (i, 0)),
        compiler_params=pltpu.CompilerParams(
            dimension_semantics=("parallel",),
            vmem_limit_bytes=_VMEM_LIMIT),
    )(x2, norm_p["alpha"], norm_p["beta"],
      ff_p["w1"], ff_p["b1"], ff_p["w2"], ff_p["b2"])
    return out.reshape(B, S, D)


def final_norm(norm_p, x):
    B, S, D = x.shape
    M = B * S
    tm = _pick_row_tile(M)
    x2 = x.reshape(M, D)
    out = pl.pallas_call(
        _norm_only_kernel,
        out_shape=jax.ShapeDtypeStruct((M, D), jnp.float32),
        grid=(M // tm,),
        in_specs=[
            pl.BlockSpec((tm, D), lambda i: (i, 0)),
            _full_spec(norm_p["alpha"].shape),
            _full_spec(norm_p["beta"].shape),
        ],
        out_specs=pl.BlockSpec((tm, D), lambda i: (i, 0)),
        compiler_params=pltpu.CompilerParams(
            dimension_semantics=("parallel",),
            vmem_limit_bytes=_VMEM_LIMIT),
    )(x2, norm_p["alpha"], norm_p["beta"])
    return out.reshape(B, S, D)


# ----------------------------- model forward (glue is plain JAX) -----------------------------

def transformer_decoder_forward(params, trg, e_outputs, src_mask, trg_pad_mask=None):
    heads = params["heads"]
    d_model = params["d_model"]
    B, S_trg = trg.shape
    S_src = e_outputs.shape[1]

    # embedding lookup + positional encoding (plain-JAX glue)
    x = jnp.take(params["embed"], trg, axis=0) * math.sqrt(d_model)
    x = x + params["pe"][None, :S_trg]

    # Compact key-padding masks only; the causal target mask is generated in-kernel.
    if trg_pad_mask is None:
        trg_pad_mask = jnp.ones((B, 1, S_trg), jnp.int32)
    trg_kpad = trg_pad_mask.astype(jnp.int32).reshape(B, 1, S_trg)
    src_kpad = src_mask.astype(jnp.int32).reshape(B, 1, S_src)

    e_outputs = e_outputs.astype(jnp.float32)
    for lp in params["layers"]:
        x = self_attn_sublayer(lp["n1"], lp["attn1"], x, trg_kpad, heads)
        x = cross_attn_sublayer(lp["n2"], lp["attn2"], x, e_outputs, src_kpad, heads)
        x = ffn_sublayer(lp["n3"], lp["ff"], x)
    return final_norm(params["norm"], x)


# ----------------------------- deterministic param init + preparation -----------------------------

def _init_linear(key, d_in, d_out, scale=0.05):
    kw, kb = jax.random.split(key)
    return {"w": jax.random.normal(kw, (d_in, d_out), jnp.float32) * scale,
            "b": jax.random.normal(kb, (d_out,), jnp.float32) * scale}


def _init_norm(d_model):
    return {"alpha": jnp.ones((d_model,), jnp.float32),
            "bias": jnp.zeros((d_model,), jnp.float32)}


def _init_mha(key, d_model):
    ks = jax.random.split(key, 4)
    return {"q": _init_linear(ks[0], d_model, d_model),
            "k": _init_linear(ks[1], d_model, d_model),
            "v": _init_linear(ks[2], d_model, d_model),
            "o": _init_linear(ks[3], d_model, d_model)}


def _init_decoder_layer(key, d_model, d_ff):
    k1, k2, k3, k4 = jax.random.split(key, 4)
    return {"n1": _init_norm(d_model), "n2": _init_norm(d_model), "n3": _init_norm(d_model),
            "attn1": _init_mha(k1, d_model), "attn2": _init_mha(k2, d_model),
            "ff": {"l1": _init_linear(k3, d_model, d_ff),
                   "l2": _init_linear(k4, d_ff, d_model)}}


def make_positional_encoding(max_seq_len, d_model):
    pe = np.zeros((max_seq_len, d_model), dtype=np.float32)
    for pos in range(max_seq_len):
        for i in range(0, d_model, 2):
            pe[pos, i] = math.sin(pos / 10000 ** (2 * i / d_model))
            pe[pos, i + 1] = math.cos(pos / 10000 ** (2 * (i + 1) / d_model))
    return jnp.asarray(pe)


def _prep_norm(p):
    d = p["alpha"].shape[0]
    return {"alpha": p["alpha"].reshape(1, d), "beta": p["bias"].reshape(1, d)}


def _prep_self_attn(p, heads):
    d = p["q"]["w"].shape[0]
    scale = 1.0 / math.sqrt(d // heads)            # fold softmax scale into Q weight/bias
    wqkv = jnp.concatenate([p["q"]["w"] * scale, p["k"]["w"], p["v"]["w"]], axis=1)
    bqkv = jnp.concatenate([p["q"]["b"] * scale, p["k"]["b"], p["v"]["b"]])
    return {"wqkv": wqkv.astype(jnp.bfloat16), "bqkv": bqkv.reshape(1, -1),
            "wo": p["o"]["w"].astype(jnp.bfloat16), "bo": p["o"]["b"].reshape(1, -1)}


def _prep_cross_attn(p, heads):
    d = p["q"]["w"].shape[0]
    scale = 1.0 / math.sqrt(d // heads)
    wkv = jnp.concatenate([p["k"]["w"], p["v"]["w"]], axis=1)
    bkv = jnp.concatenate([p["k"]["b"], p["v"]["b"]])
    return {"wq": (p["q"]["w"] * scale).astype(jnp.bfloat16),
            "bq": (p["q"]["b"] * scale).reshape(1, -1),
            "wkv": wkv.astype(jnp.bfloat16), "bkv": bkv.reshape(1, -1),
            "wo": p["o"]["w"].astype(jnp.bfloat16), "bo": p["o"]["b"].reshape(1, -1)}


def _prep_ff(p):
    return {"w1": p["l1"]["w"].astype(jnp.bfloat16), "b1": p["l1"]["b"].reshape(1, -1),
            "w2": p["l2"]["w"].astype(jnp.bfloat16), "b2": p["l2"]["b"].reshape(1, -1)}


def init_decoder_params(key, vocab_size, d_model, N, heads, d_ff=2048, max_seq_len=80):
    keys = jax.random.split(key, N + 1)
    raw = [_init_decoder_layer(keys[i], d_model, d_ff) for i in range(N)]
    embed = jax.random.normal(keys[N], (vocab_size, d_model), jnp.float32) * 0.05
    layers = [{
        "n1": _prep_norm(l["n1"]), "n2": _prep_norm(l["n2"]), "n3": _prep_norm(l["n3"]),
        "attn1": _prep_self_attn(l["attn1"], heads),
        "attn2": _prep_cross_attn(l["attn2"], heads),
        "ff": _prep_ff(l["ff"]),
    } for l in raw]
    return {
        "d_model": d_model, "heads": heads,
        "pe": make_positional_encoding(max_seq_len, d_model),
        "embed": embed,
        "layers": layers,
        "norm": _prep_norm(_init_norm(d_model)),
    }


# ----------------------------- demo -----------------------------

if __name__ == "__main__":
    B = 2
    S_TRG = 8
    S_SRC = 8
    D_MODEL = 32
    HEADS = 4
    N_LAYERS = 2
    VOCAB = 16
    D_FF = 2048      # FeedForward default d_ff in the PyTorch module

    key = jax.random.PRNGKey(0)
    kp, ke, kt = jax.random.split(key, 3)

    params = init_decoder_params(kp, VOCAB, D_MODEL, N_LAYERS, HEADS, d_ff=D_FF)

    # e_outputs: encoder output features (B, S_src, d_model)
    e_outputs = jax.random.normal(ke, (B, S_SRC, D_MODEL), jnp.float32)
    trg = jax.random.randint(kt, (B, S_TRG), 0, VOCAB)

    # src_mask: (B, 1, S_src) all-visible.  The causal trg mask is generated inside the kernel.
    src_mask = jnp.ones((B, 1, S_SRC), jnp.int32)

    fwd = jax.jit(lambda t, e, sm: transformer_decoder_forward(params, t, e, sm))
    out = fwd(trg, e_outputs, src_mask)
    out = jax.block_until_ready(out)

    assert out.shape == (B, S_TRG, D_MODEL), out.shape
    assert bool(jnp.all(jnp.isfinite(out)))
    print("KERNEL_OK")
</pallas_src>

<mosaic_0001>
module attributes {stable_mosaic.version = 11 : i64} {
  func.func @_self_attn_layer_kernel(%arg0: i32, %arg1: i32, %arg2: memref<1x8x32xf32, #tpu.memory_space<vmem>>, %arg3: memref<1x8x32xf32, #tpu.memory_space<vmem>>, %arg4: memref<1x1x8xi32, #tpu.memory_space<vmem>>, %arg5: memref<32x96xbf16, #tpu.memory_space<vmem>>, %arg6: memref<1x96xf32, #tpu.memory_space<vmem>>, %arg7: memref<32x32xbf16, #tpu.memory_space<vmem>>, %arg8: memref<1x32xf32, #tpu.memory_space<vmem>>, %arg9: memref<1x32xf32, #tpu.memory_space<vmem>>, %arg10: memref<1x32xf32, #tpu.memory_space<vmem>>, %arg11: memref<1x8x32xf32, #tpu.memory_space<vmem>>, %arg12: memref<8x64xbf16, #tpu.memory_space<vmem>>) attributes {dimension_semantics = [#tpu.dimension_semantics<parallel>, #tpu.dimension_semantics<arbitrary>], iteration_bounds = array<i64: 2, 1>, scalar_prefetch = 0 : i64, scratch_operands = 1 : i64, tpu.core_type = #tpu.core_type<tc>, window_params = [{transform_indices = @transform_0, window_bounds = array<i64: 1, 8, 32>}, {transform_indices = @transform_1, window_bounds = array<i64: 1, 8, 32>}, {transform_indices = @transform_2, window_bounds = array<i64: 1, 1, 8>}, {pipeline_mode = #tpu.pipeline_mode<synchronous>, transform_indices = @transform_3, window_bounds = array<i64: 32, 96>}, {pipeline_mode = #tpu.pipeline_mode<synchronous>, transform_indices = @transform_4, window_bounds = array<i64: 1, 96>}, {pipeline_mode = #tpu.pipeline_mode<synchronous>, transform_indices = @transform_5, window_bounds = array<i64: 32, 32>}, {pipeline_mode = #tpu.pipeline_mode<synchronous>, transform_indices = @transform_6, window_bounds = array<i64: 1, 32>}, {pipeline_mode = #tpu.pipeline_mode<synchronous>, transform_indices = @transform_7, window_bounds = array<i64: 1, 32>}, {pipeline_mode = #tpu.pipeline_mode<synchronous>, transform_indices = @transform_8, window_bounds = array<i64: 1, 32>}, {transform_indices = @transform_9, window_bounds = array<i64: 1, 8, 32>}]} {
    %c0 = arith.constant 0 : index
    %c0_0 = arith.constant 0 : index
    %c0_1 = arith.constant 0 : index
    %0 = vector.load %arg2[%c0, %c0_0, %c0_1] : memref<1x8x32xf32, #tpu.memory_space<vmem>>, vector<1x8x32xf32>
    %1 = vector.shape_cast %0 : vector<1x8x32xf32> to vector<8x32xf32>
    %c0_2 = arith.constant 0 : index
    %c0_3 = arith.constant 0 : index
    %2 = vector.load %arg9[%c0_2, %c0_3] : memref<1x32xf32, #tpu.memory_space<vmem>>, vector<1x32xf32>
    %c0_4 = arith.constant 0 : index
    %c0_5 = arith.constant 0 : index
    %3 = vector.load %arg10[%c0_4, %c0_5] : memref<1x32xf32, #tpu.memory_space<vmem>>, vector<1x32xf32>
    %c0_i32 = arith.constant 0 : i32
    %4 = arith.cmpi eq, %arg1, %c0_i32 : i32
    %5 = arith.extui %4 : i1 to i32
    %c0_i32_6 = arith.constant 0 : i32
    %6 = arith.cmpi ne, %5, %c0_i32_6 : i32
    scf.if %6 {
      %c0_57 = arith.constant 0 : index
      %c0_58 = arith.constant 0 : index
      %c0_59 = arith.constant 0 : index
      %130 = vector.load %arg3[%c0_57, %c0_58, %c0_59] : memref<1x8x32xf32, #tpu.memory_space<vmem>>, vector<1x8x32xf32>
      %131 = vector.shape_cast %130 : vector<1x8x32xf32> to vector<8x32xf32>
      %cst_60 = arith.constant dense<0.000000e+00> : vector<8xf32>
      %132 = vector.multi_reduction <add>, %131, %cst_60 [1] : vector<8x32xf32> to vector<8xf32>
      %133 = vector.shape_cast %132 : vector<8xf32> to vector<8x1xf32>
      %cst_61 = arith.constant 3.200000e+01 : f32
      %134 = vector.broadcast %cst_61 : f32 to vector<8x1xf32>
      %135 = arith.divf %133, %134 : vector<8x1xf32>
      %136 = vector.broadcast %135 : vector<8x1xf32> to vector<8x32xf32>
      %137 = arith.subf %131, %136 : vector<8x32xf32>
      %138 = arith.mulf %137, %137 : vector<8x32xf32>
      %cst_62 = arith.constant dense<0.000000e+00> : vector<8xf32>
      %139 = vector.multi_reduction <add>, %138, %cst_62 [1] : vector<8x32xf32> to vector<8xf32>
      %140 = vector.shape_cast %139 : vector<8xf32> to vector<8x1xf32>
      %cst_63 = arith.constant 0.0322580636 : f32
      %141 = vector.broadcast %cst_63 : f32 to vector<8x1xf32>
      %142 = arith.mulf %140, %141 : vector<8x1xf32>
      %143 = math.sqrt %142 : vector<8x1xf32>
      %cst_64 = arith.constant 9.99999997E-7 : f32
      %144 = vector.broadcast %cst_64 : f32 to vector<8x1xf32>
      %145 = arith.addf %143, %144 : vector<8x1xf32>
      %146 = tpu.reciprocal %145 : vector<8x1xf32> -> vector<8x1xf32>
      %147 = vector.broadcast %146 : vector<8x1xf32> to vector<8x32xf32>
      %148 = vector.broadcast %2 : vector<1x32xf32> to vector<8x32xf32>
      %149 = arith.mulf %147, %148 : vector<8x32xf32>
      %150 = arith.mulf %137, %149 : vector<8x32xf32>
      %151 = vector.broadcast %3 : vector<1x32xf32> to vector<8x32xf32>
      %152 = arith.addf %150, %151 : vector<8x32xf32>
      %153 = arith.truncf %152 : vector<8x32xf32> to vector<8x32xbf16>
      %c0_65 = arith.constant 0 : index
      %c32_66 = arith.constant 32 : index
      %154 = vector.load %arg5[%c0_65, %c32_66] : memref<32x96xbf16, #tpu.memory_space<vmem>>, vector<32x64xbf16>
      %cst_67 = arith.constant dense<0.000000e+00> : vector<8x64xf32>
      %155 = tpu.matmul %153, %154, %cst_67 {dimension_numbers = #tpu.dot_dimension_numbers<[1], [0], [0], [1], [0, 0, 1, 1], [], []>} : vector<8x32xbf16>, vector<32x64xbf16>, vector<8x64xf32> -> vector<8x64xf32>
      %c0_68 = arith.constant 0 : index
      %c32_69 = arith.constant 32 : index
      %156 = vector.load %arg6[%c0_68, %c32_69] : memref<1x96xf32, #tpu.memory_space<vmem>>, vector<1x64xf32>
      %157 = vector.broadcast %156 : vector<1x64xf32> to vector<8x64xf32>
      %158 = arith.addf %155, %157 : vector<8x64xf32>
      %159 = arith.truncf %158 : vector<8x64xf32> to vector<8x64xbf16>
      %c0_70 = arith.constant 0 : index
      %c0_71 = arith.constant 0 : index
      %160 = vector.load %arg12[%c0_70, %c0_71] : memref<8x64xbf16, #tpu.memory_space<vmem>>, vector<8x64xbf16>
      tpu.vector_store %arg12[%c0_70, %c0_71], %159 {strides = array<i32>} : memref<8x64xbf16, #tpu.memory_space<vmem>>, vector<8x64xbf16>,
    } else {
    }
    %cst = arith.constant dense<0.000000e+00> : vector<8xf32>
    %7 = vector.multi_reduction <add>, %1, %cst [1] : vector<8x32xf32> to vector<8xf32>
    %8 = vector.shape_cast %7 : vector<8xf32> to vector<8x1xf32>
    %cst_7 = arith.constant 3.200000e+01 : f32
    %9 = vector.broadcast %cst_7 : f32 to vector<8x1xf32>
    %10 = arith.divf %8, %9 : vector<8x1xf32>
    %11 = vector.broadcast %10 : vector<8x1xf32> to vector<8x32xf32>
    %12 = arith.subf %1, %11 : vector<8x32xf32>
    %13 = arith.mulf %12, %12 : vector<8x32xf32>
    %cst_8 = arith.constant dense<0.000000e+00> : vector<8xf32>
    %14 = vector.multi_reduction <add>, %13, %cst_8 [1] : vector<8x32xf32> to vector<8xf32>
    %15 = vector.shape_cast %14 : vector<8xf32> to vector<8x1xf32>
    %cst_9 = arith.constant 0.0322580636 : f32
    %16 = vector.broadcast %cst_9 : f32 to vector<8x1xf32>
    %17 = arith.mulf %15, %16 : vector<8x1xf32>
    %18 = math.sqrt %17 : vector<8x1xf32>
    %cst_10 = arith.constant 9.99999997E-7 : f32
    %19 = vector.broadcast %cst_10 : f32 to vector<8x1xf32>
    %20 = arith.addf %18, %19 : vector<8x1xf32>
    %21 = tpu.reciprocal %20 : vector<8x1xf32> -> vector<8x1xf32>
    %22 = vector.broadcast %21 : vector<8x1xf32> to vector<8x32xf32>
    %23 = vector.broadcast %2 : vector<1x32xf32> to vector<8x32xf32>
    %24 = arith.mulf %22, %23 : vector<8x32xf32>
    %25 = arith.mulf %12, %24 : vector<8x32xf32>
    %26 = vector.broadcast %3 : vector<1x32xf32> to vector<8x32xf32>
    %27 = arith.addf %25, %26 : vector<8x32xf32>
    %28 = arith.truncf %27 : vector<8x32xf32> to vector<8x32xbf16>
    %c0_11 = arith.constant 0 : index
    %c0_12 = arith.constant 0 : index
    %29 = vector.load %arg5[%c0_11, %c0_12] : memref<32x96xbf16, #tpu.memory_space<vmem>>, vector<32x32xbf16>
    %cst_13 = arith.constant dense<0.000000e+00> : vector<8x32xf32>
    %30 = tpu.matmul %28, %29, %cst_13 {dimension_numbers = #tpu.dot_dimension_numbers<[1], [0], [0], [1], [0, 0, 1, 1], [], []>} : vector<8x32xbf16>, vector<32x32xbf16>, vector<8x32xf32> -> vector<8x32xf32>
    %c0_14 = arith.constant 0 : index
    %c0_15 = arith.constant 0 : index
    %31 = vector.load %arg6[%c0_14, %c0_15] : memref<1x96xf32, #tpu.memory_space<vmem>>, vector<1x32xf32>
    %32 = vector.broadcast %31 : vector<1x32xf32> to vector<8x32xf32>
    %33 = arith.addf %30, %32 : vector<8x32xf32>
    %34 = arith.truncf %33 : vector<8x32xf32> to vector<8x32xbf16>
    %c8_i32 = arith.constant 8 : i32
    %35 = arith.muli %arg1, %c8_i32 : i32
    %36 = tpu.iota {dimensions = array<i32: 0>} : vector<8x8xi32>
    %37 = vector.broadcast %35 : i32 to vector<8x8xi32>
    %38 = arith.addi %37, %36 : vector<8x8xi32>
    %39 = tpu.iota {dimensions = array<i32: 1>} : vector<8x8xi32>
    %40 = arith.cmpi sge, %38, %39 : vector<8x8xi32>
    %c0_16 = arith.constant 0 : index
    %c0_17 = arith.constant 0 : index
    %c0_18 = arith.constant 0 : index
    %41 = vector.load %arg4[%c0_16, %c0_17, %c0_18] : memref<1x1x8xi32, #tpu.memory_space<vmem>>, vector<1x1x8xi32>
    %42 = vector.shape_cast %41 : vector<1x1x8xi32> to vector<1x8xi32>
    %c0_i32_19 = arith.constant 0 : i32
    %43 = vector.broadcast %c0_i32_19 : i32 to vector<1x8xi32>
    %44 = arith.cmpi ne, %42, %43 : vector<1x8xi32>
    %45 = vector.broadcast %44 : vector<1x8xi1> to vector<8x8xi1>
    %46 = arith.andi %40, %45 : vector<8x8xi1>
    %47 = vector.extract_strided_slice %34 {offsets = [0, 0], sizes = [8, 8], strides = [1, 1]} : vector<8x32xbf16> to vector<8x8xbf16>
    %c0_20 = arith.constant 0 : index
    %c0_21 = arith.constant 0 : index
    %48 = vector.load %arg12[%c0_20, %c0_21] : memref<8x64xbf16, #tpu.memory_space<vmem>>, vector<8x8xbf16>
    %c0_22 = arith.constant 0 : index
    %c32 = arith.constant 32 : index
    %49 = vector.load %arg12[%c0_22, %c32] : memref<8x64xbf16, #tpu.memory_space<vmem>>, vector<8x8xbf16>
    %cst_23 = arith.constant dense<0.000000e+00> : vector<8x8xf32>
    %50 = tpu.matmul %47, %48, %cst_23 {dimension_numbers = #tpu.dot_dimension_numbers<[1], [1], [0], [0], [0, 0, 1, 0], [], []>} : vector<8x8xbf16>, vector<8x8xbf16>, vector<8x8xf32> -> vector<8x8xf32>
    %cst_24 = arith.constant -1.000000e+30 : f32
    %51 = vector.broadcast %cst_24 : f32 to vector<8x8xf32>
    %52 = arith.select %46, %50, %51 : vector<8x8xi1>, vector<8x8xf32>
    %cst_25 = arith.constant dense<0xFF800000> : vector<8xf32>
    %53 = vector.multi_reduction <maximumf>, %52, %cst_25 [1] : vector<8x8xf32> to vector<8xf32>
    %54 = vector.shape_cast %53 : vector<8xf32> to vector<8x1xf32>
    %55 = vector.broadcast %54 : vector<8x1xf32> to vector<8x8xf32>
    %56 = arith.subf %52, %55 : vector<8x8xf32>
    %57 = math.exp %56 : vector<8x8xf32>
    %cst_26 = arith.constant dense<0.000000e+00> : vector<8xf32>
    %58 = vector.multi_reduction <add>, %57, %cst_26 [1] : vector<8x8xf32> to vector<8xf32>
    %59 = vector.shape_cast %58 : vector<8xf32> to vector<8x1xf32>
    %60 = tpu.reciprocal %59 {approx = true} : vector<8x1xf32> -> vector<8x1xf32>
    %61 = vector.broadcast %60 : vector<8x1xf32> to vector<8x8xf32>
    %62 = arith.mulf %57, %61 : vector<8x8xf32>
    %63 = arith.truncf %62 : vector<8x8xf32> to vector<8x8xbf16>
    %cst_27 = arith.constant dense<0.000000e+00> : vector<8x8xf32>
    %64 = tpu.matmul %63, %49, %cst_27 {dimension_numbers = #tpu.dot_dimension_numbers<[1], [0], [0], [1], [0, 0, 1, 1], [], []>} : vector<8x8xbf16>, vector<8x8xbf16>, vector<8x8xf32> -> vector<8x8xf32>
    %65 = vector.extract_strided_slice %34 {offsets = [0, 8], sizes = [8, 8], strides = [1, 1]} : vector<8x32xbf16> to vector<8x8xbf16>
    %c0_28 = arith.constant 0 : index
    %c8 = arith.constant 8 : index
    %66 = vector.load %arg12[%c0_28, %c8] : memref<8x64xbf16, #tpu.memory_space<vmem>>, vector<8x8xbf16>
    %c0_29 = arith.constant 0 : index
    %c40 = arith.constant 40 : index
    %67 = vector.load %arg12[%c0_29, %c40] : memref<8x64xbf16, #tpu.memory_space<vmem>>, vector<8x8xbf16>
    %cst_30 = arith.constant dense<0.000000e+00> : vector<8x8xf32>
    %68 = tpu.matmul %65, %66, %cst_30 {dimension_numbers = #tpu.dot_dimension_numbers<[1], [1], [0], [0], [0, 0, 1, 0], [], []>} : vector<8x8xbf16>, vector<8x8xbf16>, vector<8x8xf32> -> vector<8x8xf32>
    %cst_31 = arith.constant -1.000000e+30 : f32
    %69 = vector.broadcast %cst_31 : f32 to vector<8x8xf32>
    %70 = arith.select %46, %68, %69 : vector<8x8xi1>, vector<8x8xf32>
    %cst_32 = arith.constant dense<0xFF800000> : vector<8xf32>
    %71 = vector.multi_reduction <maximumf>, %70, %cst_32 [1] : vector<8x8xf32> to vector<8xf32>
    %72 = vector.shape_cast %71 : vector<8xf32> to vector<8x1xf32>
    %73 = vector.broadcast %72 : vector<8x1xf32> to vector<8x8xf32>
    %74 = arith.subf %70, %73 : vector<8x8xf32>
    %75 = math.exp %74 : vector<8x8xf32>
    %cst_33 = arith.constant dense<0.000000e+00> : vector<8xf32>
    %76 = vector.multi_reduction <add>, %75, %cst_33 [1] : vector<8x8xf32> to vector<8xf32>
    %77 = vector.shape_cast %76 : vector<8xf32> to vector<8x1xf32>
    %78 = tpu.reciprocal %77 {approx = true} : vector<8x1xf32> -> vector<8x1xf32>
    %79 = vector.broadcast %78 : vector<8x1xf32> to vector<8x8xf32>
    %80 = arith.mulf %75, %79 : vector<8x8xf32>
    %81 = arith.truncf %80 : vector<8x8xf32> to vector<8x8xbf16>
    %cst_34 = arith.constant dense<0.000000e+00> : vector<8x8xf32>
    %82 = tpu.matmul %81, %67, %cst_34 {dimension_numbers = #tpu.dot_dimension_numbers<[1], [0], [0], [1], [0, 0, 1, 1], [], []>} : vector<8x8xbf16>, vector<8x8xbf16>, vector<8x8xf32> -> vector<8x8xf32>
    %83 = vector.extract_strided_slice %34 {offsets = [0, 16], sizes = [8, 8], strides = [1, 1]} : vector<8x32xbf16> to vector<8x8xbf16>
    %c0_35 = arith.constant 0 : index
    %c16 = arith.constant 16 : index
    %84 = vector.load %arg12[%c0_35, %c16] : memref<8x64xbf16, #tpu.memory_space<vmem>>, vector<8x8xbf16>
    %c0_36 = arith.constant 0 : index
    %c48 = arith.constant 48 : index
    %85 = vector.load %arg12[%c0_36, %c48] : memref<8x64xbf16, #tpu.memory_space<vmem>>, vector<8x8xbf16>
    %cst_37 = arith.constant dense<0.000000e+00> : vector<8x8xf32>
    %86 = tpu.matmul %83, %84, %cst_37 {dimension_numbers = #tpu.dot_dimension_numbers<[1], [1], [0], [0], [0, 0, 1, 0], [], []>} : vector<8x8xbf16>, vector<8x8xbf16>, vector<8x8xf32> -> vector<8x8xf32>
    %cst_38 = arith.constant -1.000000e+30 : f32
    %87 = vector.broadcast %cst_38 : f32 to vector<8x8xf32>
    %88 = arith.select %46, %86, %87 : vector<8x8xi1>, vector<8x8xf32>
    %cst_39 = arith.constant dense<0xFF800000> : vector<8xf32>
    %89 = vector.multi_reduction <maximumf>, %88, %cst_39 [1] : vector<8x8xf32> to vector<8xf32>
    %90 = vector.shape_cast %89 : vector<8xf32> to vector<8x1xf32>
    %91 = vector.broadcast %90 : vector<8x1xf32> to vector<8x8xf32>
    %92 = arith.subf %88, %91 : vector<8x8xf32>
    %93 = math.exp %92 : vector<8x8xf32>
    %cst_40 = arith.constant dense<0.000000e+00> : vector<8xf32>
    %94 = vector.multi_reduction <add>, %93, %cst_40 [1] : vector<8x8xf32> to vector<8xf32>
    %95 = vector.shape_cast %94 : vector<8xf32> to vector<8x1xf32>
    %96 = tpu.reciprocal %95 {approx = true} : vector<8x1xf32> -> vector<8x1xf32>
    %97 = vector.broadcast %96 : vector<8x1xf32> to vector<8x8xf32>
    %98 = arith.mulf %93, %97 : vector<8x8xf32>
    %99 = arith.truncf %98 : vector<8x8xf32> to vector<8x8xbf16>
    %cst_41 = arith.constant dense<0.000000e+00> : vector<8x8xf32>
    %100 = tpu.matmul %99, %85, %cst_41 {dimension_numbers = #tpu.dot_dimension_numbers<[1], [0], [0], [1], [0, 0, 1, 1], [], []>} : vector<8x8xbf16>, vector<8x8xbf16>, vector<8x8xf32> -> vector<8x8xf32>
    %101 = vector.extract_strided_slice %34 {offsets = [0, 24], sizes = [8, 8], strides = [1, 1]} : vector<8x32xbf16> to vector<8x8xbf16>
    %c0_42 = arith.constant 0 : index
    %c24 = arith.constant 24 : index
    %102 = vector.load %arg12[%c0_42, %c24] : memref<8x64xbf16, #tpu.memory_space<vmem>>, vector<8x8xbf16>
    %c0_43 = arith.constant 0 : index
    %c56 = arith.constant 56 : index
    %103 = vector.load %arg12[%c0_43, %c56] : memref<8x64xbf16, #tpu.memory_space<vmem>>, vector<8x8xbf16>
    %cst_44 = arith.constant dense<0.000000e+00> : vector<8x8xf32>
    %104 = tpu.matmul %101, %102, %cst_44 {dimension_numbers = #tpu.dot_dimension_numbers<[1], [1], [0], [0], [0, 0, 1, 0], [], []>} : vector<8x8xbf16>, vector<8x8xbf16>, vector<8x8xf32> -> vector<8x8xf32>
    %cst_45 = arith.constant -1.000000e+30 : f32
    %105 = vector.broadcast %cst_45 : f32 to vector<8x8xf32>
    %106 = arith.select %46, %104, %105 : vector<8x8xi1>, vector<8x8xf32>
    %cst_46 = arith.constant dense<0xFF800000> : vector<8xf32>
    %107 = vector.multi_reduction <maximumf>, %106, %cst_46 [1] : vector<8x8xf32> to vector<8xf32>
    %108 = vector.shape_cast %107 : vector<8xf32> to vector<8x1xf32>
    %109 = vector.broadcast %108 : vector<8x1xf32> to vector<8x8xf32>
    %110 = arith.subf %106, %109 : vector<8x8xf32>
    %111 = math.exp %110 : vector<8x8xf32>
    %cst_47 = arith.constant dense<0.000000e+00> : vector<8xf32>
    %112 = vector.multi_reduction <add>, %111, %cst_47 [1] : vector<8x8xf32> to vector<8xf32>
    %113 = vector.shape_cast %112 : vector<8xf32> to vector<8x1xf32>
    %114 = tpu.reciprocal %113 {approx = true} : vector<8x1xf32> -> vector<8x1xf32>
    %115 = vector.broadcast %114 : vector<8x1xf32> to vector<8x8xf32>
    %116 = arith.mulf %111, %115 : vector<8x8xf32>
    %117 = arith.truncf %116 : vector<8x8xf32> to vector<8x8xbf16>
    %cst_48 = arith.constant dense<0.000000e+00> : vector<8x8xf32>
    %118 = tpu.matmul %117, %103, %cst_48 {dimension_numbers = #tpu.dot_dimension_numbers<[1], [0], [0], [1], [0, 0, 1, 1], [], []>} : vector<8x8xbf16>, vector<8x8xbf16>, vector<8x8xf32> -> vector<8x8xf32>
    %119 = tpu.concatenate %64, %82, %100, %118 in 1 : vector<8x8xf32>, vector<8x8xf32>, vector<8x8xf32>, vector<8x8xf32> -> vector<8x32xf32>
    %120 = arith.truncf %119 : vector<8x32xf32> to vector<8x32xbf16>
    %c0_49 = arith.constant 0 : index
    %c0_50 = arith.constant 0 : index
    %121 = vector.load %arg7[%c0_49, %c0_50] : memref<32x32xbf16, #tpu.memory_space<vmem>>, vector<32x32xbf16>
    %cst_51 = arith.constant dense<0.000000e+00> : vector<8x32xf32>
    %122 = tpu.matmul %120, %121, %cst_51 {dimension_numbers = #tpu.dot_dimension_numbers<[1], [0], [0], [1], [0, 0, 1, 1], [], []>} : vector<8x32xbf16>, vector<32x32xbf16>, vector<8x32xf32> -> vector<8x32xf32>
    %123 = arith.addf %1, %122 : vector<8x32xf32>
    %c0_52 = arith.constant 0 : index
    %c0_53 = arith.constant 0 : index
    %124 = vector.load %arg8[%c0_52, %c0_53] : memref<1x32xf32, #tpu.memory_space<vmem>>, vector<1x32xf32>
    %125 = vector.broadcast %124 : vector<1x32xf32> to vector<8x32xf32>
    %126 = arith.addf %123, %125 : vector<8x32xf32>
    %c0_54 = arith.constant 0 : index
    %c0_55 = arith.constant 0 : index
    %c0_56 = arith.constant 0 : index
    %127 = vector.load %arg11[%c0_54, %c0_55, %c0_56] : memref<1x8x32xf32, #tpu.memory_space<vmem>>, vector<1x8x32xf32>
    %128 = vector.shape_cast %127 : vector<1x8x32xf32> to vector<8x32xf32>
    %129 = vector.shape_cast %126 : vector<8x32xf32> to vector<1x8x32xf32>
    tpu.vector_store %arg11[%c0_54, %c0_55, %c0_56], %129 {strides = array<i32>} : memref<1x8x32xf32, #tpu.memory_space<vmem>>, vector<1x8x32xf32>,
    return
  }
  func.func @transform_0(%arg0: i32, %arg1: i32) -> (i32, i32, i32) {
    %c0_i32 = arith.constant 0 : i32
    %c0_i32_0 = arith.constant 0 : i32
    return %arg0, %arg1, %c0_i32 : i32, i32, i32
  }
  func.func @transform_1(%arg0: i32, %arg1: i32) -> (i32, i32, i32) {
    %c0_i32 = arith.constant 0 : i32
    %c0_i32_0 = arith.constant 0 : i32
    %c0_i32_1 = arith.constant 0 : i32
    return %arg0, %c0_i32, %c0_i32_0 : i32, i32, i32
  }
  func.func @transform_2(%arg0: i32, %arg1: i32) -> (i32, i32, i32) {
    %c0_i32 = arith.constant 0 : i32
    %c0_i32_0 = arith.constant 0 : i32
    %c0_i32_1 = arith.constant 0 : i32
    return %arg0, %c0_i32, %c0_i32_0 : i32, i32, i32
  }
  func.func @transform_3(%arg0: i32, %arg1: i32) -> (i32, i32) {
    %c0_i32 = arith.constant 0 : i32
    %c0_i32_0 = arith.constant 0 : i32
    %c0_i32_1 = arith.constant 0 : i32
    return %c0_i32, %c0_i32_0 : i32, i32
  }
  func.func @transform_4(%arg0: i32, %arg1: i32) -> (i32, i32) {
    %c0_i32 = arith.constant 0 : i32
    %c0_i32_0 = arith.constant 0 : i32
    %c0_i32_1 = arith.constant 0 : i32
    return %c0_i32, %c0_i32_0 : i32, i32
  }
  func.func @transform_5(%arg0: i32, %arg1: i32) -> (i32, i32) {
    %c0_i32 = arith.constant 0 : i32
    %c0_i32_0 = arith.constant 0 : i32
    %c0_i32_1 = arith.constant 0 : i32
    return %c0_i32, %c0_i32_0 : i32, i32
  }
  func.func @transform_6(%arg0: i32, %arg1: i32) -> (i32, i32) {
    %c0_i32 = arith.constant 0 : i32
    %c0_i32_0 = arith.constant 0 : i32
    %c0_i32_1 = arith.constant 0 : i32
    return %c0_i32, %c0_i32_0 : i32, i32
  }
  func.func @transform_7(%arg0: i32, %arg1: i32) -> (i32, i32) {
    %c0_i32 = arith.constant 0 : i32
    %c0_i32_0 = arith.constant 0 : i32
    %c0_i32_1 = arith.constant 0 : i32
    return %c0_i32, %c0_i32_0 : i32, i32
  }
  func.func @transform_8(%arg0: i32, %arg1: i32) -> (i32, i32) {
    %c0_i32 = arith.constant 0 : i32
    %c0_i32_0 = arith.constant 0 : i32
    %c0_i32_1 = arith.constant 0 : i32
    return %c0_i32, %c0_i32_0 : i32, i32
  }
  func.func @transform_9(%arg0: i32, %arg1: i32) -> (i32, i32, i32) {
    %c0_i32 = arith.constant 0 : i32
    %c0_i32_0 = arith.constant 0 : i32
    return %arg0, %arg1, %c0_i32 : i32, i32, i32
  }
}

module attributes {stable_mosaic.version = 11 : i64} {
  func.func @_norm_only_kernel(%arg0: i32, %arg1: memref<8x32xf32, #tpu.memory_space<vmem>>, %arg2: memref<1x32xf32, #tpu.memory_space<vmem>>, %arg3: memref<1x32xf32, #tpu.memory_space<vmem>>, %arg4: memref<8x32xf32, #tpu.memory_space<vmem>>) attributes {dimension_semantics = [#tpu.dimension_semantics<parallel>], iteration_bounds = array<i64: 2>, scalar_prefetch = 0 : i64, scratch_operands = 0 : i64, tpu.core_type = #tpu.core_type<tc>, window_params = [{transform_indices = @transform_0, window_bounds = array<i64: 8, 32>}, {pipeline_mode = #tpu.pipeline_mode<synchronous>, transform_indices = @transform_1, window_bounds = array<i64: 1, 32>}, {pipeline_mode = #tpu.pipeline_mode<synchronous>, transform_indices = @transform_2, window_bounds = array<i64: 1, 32>}, {transform_indices = @transform_3, window_bounds = array<i64: 8, 32>}]} {
    %c0 = arith.constant 0 : index
    %c0_0 = arith.constant 0 : index
    %0 = vector.load %arg1[%c0, %c0_0] : memref<8x32xf32, #tpu.memory_space<vmem>>, vector<8x32xf32>
    %c0_1 = arith.constant 0 : index
    %c0_2 = arith.constant 0 : index
    %1 = vector.load %arg2[%c0_1, %c0_2] : memref<1x32xf32, #tpu.memory_space<vmem>>, vector<1x32xf32>
    %c0_3 = arith.constant 0 : index
    %c0_4 = arith.constant 0 : index
    %2 = vector.load %arg3[%c0_3, %c0_4] : memref<1x32xf32, #tpu.memory_space<vmem>>, vector<1x32xf32>
    %cst = arith.constant dense<0.000000e+00> : vector<8xf32>
    %3 = vector.multi_reduction <add>, %0, %cst [1] : vector<8x32xf32> to vector<8xf32>
    %4 = vector.shape_cast %3 : vector<8xf32> to vector<8x1xf32>
    %cst_5 = arith.constant 3.200000e+01 : f32
    %5 = vector.broadcast %cst_5 : f32 to vector<8x1xf32>
    %6 = arith.divf %4, %5 : vector<8x1xf32>
    %7 = vector.broadcast %6 : vector<8x1xf32> to vector<8x32xf32>
    %8 = arith.subf %0, %7 : vector<8x32xf32>
    %9 = arith.mulf %8, %8 : vector<8x32xf32>
    %cst_6 = arith.constant dense<0.000000e+00> : vector<8xf32>
    %10 = vector.multi_reduction <add>, %9, %cst_6 [1] : vector<8x32xf32> to vector<8xf32>
    %11 = vector.shape_cast %10 : vector<8xf32> to vector<8x1xf32>
    %cst_7 = arith.constant 0.0322580636 : f32
    %12 = vector.broadcast %cst_7 : f32 to vector<8x1xf32>
    %13 = arith.mulf %11, %12 : vector<8x1xf32>
    %14 = math.sqrt %13 : vector<8x1xf32>
    %cst_8 = arith.constant 9.99999997E-7 : f32
    %15 = vector.broadcast %cst_8 : f32 to vector<8x1xf32>
    %16 = arith.addf %14, %15 : vector<8x1xf32>
    %17 = tpu.reciprocal %16 : vector<8x1xf32> -> vector<8x1xf32>
    %18 = vector.broadcast %17 : vector<8x1xf32> to vector<8x32xf32>
    %19 = vector.broadcast %1 : vector<1x32xf32> to vector<8x32xf32>
    %20 = arith.mulf %18, %19 : vector<8x32xf32>
    %21 = arith.mulf %8, %20 : vector<8x32xf32>
    %22 = vector.broadcast %2 : vector<1x32xf32> to vector<8x32xf32>
    %23 = arith.addf %21, %22 : vector<8x32xf32>
    %c0_9 = arith.constant 0 : index
    %c0_10 = arith.constant 0 : index
    %24 = vector.load %arg4[%c0_9, %c0_10] : memref<8x32xf32, #tpu.memory_space<vmem>>, vector<8x32xf32>
    tpu.vector_store %arg4[%c0_9, %c0_10], %23 {strides = array<i32>} : memref<8x32xf32, #tpu.memory_space<vmem>>, vector<8x32xf32>,
    return
  }
  func.func @transform_0(%arg0: i32) -> (i32, i32) {
    %c0_i32 = arith.constant 0 : i32
    %c0_i32_0 = arith.constant 0 : i32
    return %arg0, %c0_i32 : i32, i32
  }
  func.func @transform_1(%arg0: i32) -> (i32, i32) {
    %c0_i32 = arith.constant 0 : i32
    %c0_i32_0 = arith.constant 0 : i32
    %c0_i32_1 = arith.constant 0 : i32
    return %c0_i32, %c0_i32_0 : i32, i32
  }
  func.func @transform_2(%arg0: i32) -> (i32, i32) {
    %c0_i32 = arith.constant 0 : i32
    %c0_i32_0 = arith.constant 0 : i32
    %c0_i32_1 = arith.constant 0 : i32
    return %c0_i32, %c0_i32_0 : i32, i32
  }
  func.func @transform_3(%arg0: i32) -> (i32, i32) {
    %c0_i32 = arith.constant 0 : i32
    %c0_i32_0 = arith.constant 0 : i32
    return %arg0, %c0_i32 : i32, i32
  }
}

module attributes {stable_mosaic.version = 11 : i64} {
  func.func @_ffn_layer_kernel(%arg0: i32, %arg1: memref<8x32xf32, #tpu.memory_space<vmem>>, %arg2: memref<1x32xf32, #tpu.memory_space<vmem>>, %arg3: memref<1x32xf32, #tpu.memory_space<vmem>>, %arg4: memref<32x2048xbf16, #tpu.memory_space<vmem>>, %arg5: memref<1x2048xf32, #tpu.memory_space<vmem>>, %arg6: memref<2048x32xbf16, #tpu.memory_space<vmem>>, %arg7: memref<1x32xf32, #tpu.memory_space<vmem>>, %arg8: memref<8x32xf32, #tpu.memory_space<vmem>>) attributes {dimension_semantics = [#tpu.dimension_semantics<parallel>], iteration_bounds = array<i64: 2>, scalar_prefetch = 0 : i64, scratch_operands = 0 : i64, tpu.core_type = #tpu.core_type<tc>, window_params = [{transform_indices = @transform_0, window_bounds = array<i64: 8, 32>}, {pipeline_mode = #tpu.pipeline_mode<synchronous>, transform_indices = @transform_1, window_bounds = array<i64: 1, 32>}, {pipeline_mode = #tpu.pipeline_mode<synchronous>, transform_indices = @transform_2, window_bounds = array<i64: 1, 32>}, {pipeline_mode = #tpu.pipeline_mode<synchronous>, transform_indices = @transform_3, window_bounds = array<i64: 32, 2048>}, {pipeline_mode = #tpu.pipeline_mode<synchronous>, transform_indices = @transform_4, window_bounds = array<i64: 1, 2048>}, {pipeline_mode = #tpu.pipeline_mode<synchronous>, transform_indices = @transform_5, window_bounds = array<i64: 2048, 32>}, {pipeline_mode = #tpu.pipeline_mode<synchronous>, transform_indices = @transform_6, window_bounds = array<i64: 1, 32>}, {transform_indices = @transform_7, window_bounds = array<i64: 8, 32>}]} {
    %c0 = arith.constant 0 : index
    %c0_0 = arith.constant 0 : index
    %0 = vector.load %arg1[%c0, %c0_0] : memref<8x32xf32, #tpu.memory_space<vmem>>, vector<8x32xf32>
    %c0_1 = arith.constant 0 : index
    %c0_2 = arith.constant 0 : index
    %1 = vector.load %arg2[%c0_1, %c0_2] : memref<1x32xf32, #tpu.memory_space<vmem>>, vector<1x32xf32>
    %c0_3 = arith.constant 0 : index
    %c0_4 = arith.constant 0 : index
    %2 = vector.load %arg3[%c0_3, %c0_4] : memref<1x32xf32, #tpu.memory_space<vmem>>, vector<1x32xf32>
    %cst = arith.constant dense<0.000000e+00> : vector<8xf32>
    %3 = vector.multi_reduction <add>, %0, %cst [1] : vector<8x32xf32> to vector<8xf32>
    %4 = vector.shape_cast %3 : vector<8xf32> to vector<8x1xf32>
    %cst_5 = arith.constant 3.200000e+01 : f32
    %5 = vector.broadcast %cst_5 : f32 to vector<8x1xf32>
    %6 = arith.divf %4, %5 : vector<8x1xf32>
    %7 = vector.broadcast %6 : vector<8x1xf32> to vector<8x32xf32>
    %8 = arith.subf %0, %7 : vector<8x32xf32>
    %9 = arith.mulf %8, %8 : vector<8x32xf32>
    %cst_6 = arith.constant dense<0.000000e+00> : vector<8xf32>
    %10 = vector.multi_reduction <add>, %9, %cst_6 [1] : vector<8x32xf32> to vector<8xf32>
    %11 = vector.shape_cast %10 : vector<8xf32> to vector<8x1xf32>
    %cst_7 = arith.constant 0.0322580636 : f32
    %12 = vector.broadcast %cst_7 : f32 to vector<8x1xf32>
    %13 = arith.mulf %11, %12 : vector<8x1xf32>
    %14 = math.sqrt %13 : vector<8x1xf32>
    %cst_8 = arith.constant 9.99999997E-7 : f32
    %15 = vector.broadcast %cst_8 : f32 to vector<8x1xf32>
    %16 = arith.addf %14, %15 : vector<8x1xf32>
    %17 = tpu.reciprocal %16 : vector<8x1xf32> -> vector<8x1xf32>
    %18 = vector.broadcast %17 : vector<8x1xf32> to vector<8x32xf32>
    %19 = vector.broadcast %1 : vector<1x32xf32> to vector<8x32xf32>
    %20 = arith.mulf %18, %19 : vector<8x32xf32>
    %21 = arith.mulf %8, %20 : vector<8x32xf32>
    %22 = vector.broadcast %2 : vector<1x32xf32> to vector<8x32xf32>
    %23 = arith.addf %21, %22 : vector<8x32xf32>
    %24 = arith.truncf %23 : vector<8x32xf32> to vector<8x32xbf16>
    %c0_9 = arith.constant 0 : index
    %c0_10 = arith.constant 0 : index
    %25 = vector.load %arg4[%c0_9, %c0_10] : memref<32x2048xbf16, #tpu.memory_space<vmem>>, vector<32x2048xbf16>
    %cst_11 = arith.constant dense<0.000000e+00> : vector<8x2048xf32>
    %26 = tpu.matmul %24, %25, %cst_11 {dimension_numbers = #tpu.dot_dimension_numbers<[1], [0], [0], [1], [0, 0, 1, 1], [], []>} : vector<8x32xbf16>, vector<32x2048xbf16>, vector<8x2048xf32> -> vector<8x2048xf32>
    %c0_12 = arith.constant 0 : index
    %c0_13 = arith.constant 0 : index
    %27 = vector.load %arg5[%c0_12, %c0_13] : memref<1x2048xf32, #tpu.memory_space<vmem>>, vector<1x2048xf32>
    %28 = vector.broadcast %27 : vector<1x2048xf32> to vector<8x2048xf32>
    %29 = arith.addf %26, %28 : vector<8x2048xf32>
    %cst_14 = arith.constant 0.000000e+00 : f32
    %30 = vector.broadcast %cst_14 : f32 to vector<8x2048xf32>
    %31 = arith.maximumf %29, %30 : vector<8x2048xf32>
    %32 = arith.truncf %31 : vector<8x2048xf32> to vector<8x2048xbf16>
    %c0_15 = arith.constant 0 : index
    %c0_16 = arith.constant 0 : index
    %33 = vector.load %arg6[%c0_15, %c0_16] : memref<2048x32xbf16, #tpu.memory_space<vmem>>, vector<2048x32xbf16>
    %cst_17 = arith.constant dense<0.000000e+00> : vector<8x32xf32>
    %34 = tpu.matmul %32, %33, %cst_17 {dimension_numbers = #tpu.dot_dimension_numbers<[1], [0], [0], [1], [0, 0, 1, 1], [], []>} : vector<8x2048xbf16>, vector<2048x32xbf16>, vector<8x32xf32> -> vector<8x32xf32>
    %c0_18 = arith.constant 0 : index
    %c0_19 = arith.constant 0 : index
    %35 = vector.load %arg7[%c0_18, %c0_19] : memref<1x32xf32, #tpu.memory_space<vmem>>, vector<1x32xf32>
    %36 = vector.broadcast %35 : vector<1x32xf32> to vector<8x32xf32>
    %37 = arith.addf %34, %36 : vector<8x32xf32>
    %38 = arith.addf %0, %37 : vector<8x32xf32>
    %c0_20 = arith.constant 0 : index
    %c0_21 = arith.constant 0 : index
    %39 = vector.load %arg8[%c0_20, %c0_21] : memref<8x32xf32, #tpu.memory_space<vmem>>, vector<8x32xf32>
    tpu.vector_store %arg8[%c0_20, %c0_21], %38 {strides = array<i32>} : memref<8x32xf32, #tpu.memory_space<vmem>>, vector<8x32xf32>,
    return
  }
  func.func @transform_0(%arg0: i32) -> (i32, i32) {
    %c0_i32 = arith.constant 0 : i32
    %c0_i32_0 = arith.constant 0 : i32
    return %arg0, %c0_i32 : i32, i32
  }
  func.func @transform_1(%arg0: i32) -> (i32, i32) {
    %c0_i32 = arith.constant 0 : i32
    %c0_i32_0 = arith.constant 0 : i32
    %c0_i32_1 = arith.constant 0 : i32
    return %c0_i32, %c0_i32_0 : i32, i32
  }
  func.func @transform_2(%arg0: i32) -> (i32, i32) {
    %c0_i32 = arith.constant 0 : i32
    %c0_i32_0 = arith.constant 0 : i32
    %c0_i32_1 = arith.constant 0 : i32
    return %c0_i32, %c0_i32_0 : i32, i32
  }
  func.func @transform_3(%arg0: i32) -> (i32, i32) {
    %c0_i32 = arith.constant 0 : i32
    %c0_i32_0 = arith.constant 0 : i32
    %c0_i32_1 = arith.constant 0 : i32
    return %c0_i32, %c0_i32_0 : i32, i32
  }
  func.func @transform_4(%arg0: i32) -> (i32, i32) {
    %c0_i32 = arith.constant 0 : i32
    %c0_i32_0 = arith.constant 0 : i32
    %c0_i32_1 = arith.constant 0 : i32
    return %c0_i32, %c0_i32_0 : i32, i32
  }
  func.func @transform_5(%arg0: i32) -> (i32, i32) {
    %c0_i32 = arith.constant 0 : i32
    %c0_i32_0 = arith.constant 0 : i32
    %c0_i32_1 = arith.constant 0 : i32
    return %c0_i32, %c0_i32_0 : i32, i32
  }
  func.func @transform_6(%arg0: i32) -> (i32, i32) {
    %c0_i32 = arith.constant 0 : i32
    %c0_i32_0 = arith.constant 0 : i32
    %c0_i32_1 = arith.constant 0 : i32
    return %c0_i32, %c0_i32_0 : i32, i32
  }
  func.func @transform_7(%arg0: i32) -> (i32, i32) {
    %c0_i32 = arith.constant 0 : i32
    %c0_i32_0 = arith.constant 0 : i32
    return %arg0, %c0_i32 : i32, i32
  }
}

module attributes {stable_mosaic.version = 11 : i64} {
  func.func @_cross_attn_layer_kernel(%arg0: i32, %arg1: i32, %arg2: memref<1x8x32xf32, #tpu.memory_space<vmem>>, %arg3: memref<1x8x32xf32, #tpu.memory_space<vmem>>, %arg4: memref<1x1x8xi32, #tpu.memory_space<vmem>>, %arg5: memref<32x32xbf16, #tpu.memory_space<vmem>>, %arg6: memref<1x32xf32, #tpu.memory_space<vmem>>, %arg7: memref<32x64xbf16, #tpu.memory_space<vmem>>, %arg8: memref<1x64xf32, #tpu.memory_space<vmem>>, %arg9: memref<32x32xbf16, #tpu.memory_space<vmem>>, %arg10: memref<1x32xf32, #tpu.memory_space<vmem>>, %arg11: memref<1x32xf32, #tpu.memory_space<vmem>>, %arg12: memref<1x32xf32, #tpu.memory_space<vmem>>, %arg13: memref<1x8x32xf32, #tpu.memory_space<vmem>>, %arg14: memref<8x64xbf16, #tpu.memory_space<vmem>>) attributes {dimension_semantics = [#tpu.dimension_semantics<parallel>, #tpu.dimension_semantics<arbitrary>], iteration_bounds = array<i64: 2, 1>, scalar_prefetch = 0 : i64, scratch_operands = 1 : i64, tpu.core_type = #tpu.core_type<tc>, window_params = [{transform_indices = @transform_0, window_bounds = array<i64: 1, 8, 32>}, {transform_indices = @transform_1, window_bounds = array<i64: 1, 8, 32>}, {transform_indices = @transform_2, window_bounds = array<i64: 1, 1, 8>}, {pipeline_mode = #tpu.pipeline_mode<synchronous>, transform_indices = @transform_3, window_bounds = array<i64: 32, 32>}, {pipeline_mode = #tpu.pipeline_mode<synchronous>, transform_indices = @transform_4, window_bounds = array<i64: 1, 32>}, {pipeline_mode = #tpu.pipeline_mode<synchronous>, transform_indices = @transform_5, window_bounds = array<i64: 32, 64>}, {pipeline_mode = #tpu.pipeline_mode<synchronous>, transform_indices = @transform_6, window_bounds = array<i64: 1, 64>}, {pipeline_mode = #tpu.pipeline_mode<synchronous>, transform_indices = @transform_7, window_bounds = array<i64: 32, 32>}, {pipeline_mode = #tpu.pipeline_mode<synchronous>, transform_indices = @transform_8, window_bounds = array<i64: 1, 32>}, {pipeline_mode = #tpu.pipeline_mode<synchronous>, transform_indices = @transform_9, window_bounds = array<i64: 1, 32>}, {pipeline_mode = #tpu.pipeline_mode<synchronous>, transform_indices = @transform_10, window_bounds = array<i64: 1, 32>}, {transform_indices = @transform_11, window_bounds = array<i64: 1, 8, 32>}]} {
    %c0 = arith.constant 0 : index
    %c0_0 = arith.constant 0 : index
    %c0_1 = arith.constant 0 : index
    %0 = vector.load %arg2[%c0, %c0_0, %c0_1] : memref<1x8x32xf32, #tpu.memory_space<vmem>>, vector<1x8x32xf32>
    %1 = vector.shape_cast %0 : vector<1x8x32xf32> to vector<8x32xf32>
    %c0_i32 = arith.constant 0 : i32
    %2 = arith.cmpi eq, %arg1, %c0_i32 : i32
    %3 = arith.extui %2 : i1 to i32
    %c0_i32_2 = arith.constant 0 : i32
    %4 = arith.cmpi ne, %3, %c0_i32_2 : i32
    scf.if %4 {
      %c0_57 = arith.constant 0 : index
      %c0_58 = arith.constant 0 : index
      %c0_59 = arith.constant 0 : index
      %130 = vector.load %arg3[%c0_57, %c0_58, %c0_59] : memref<1x8x32xf32, #tpu.memory_space<vmem>>, vector<1x8x32xf32>
      %131 = vector.shape_cast %130 : vector<1x8x32xf32> to vector<8x32xf32>
      %132 = arith.truncf %131 : vector<8x32xf32> to vector<8x32xbf16>
      %c0_60 = arith.constant 0 : index
      %c0_61 = arith.constant 0 : index
      %133 = vector.load %arg7[%c0_60, %c0_61] : memref<32x64xbf16, #tpu.memory_space<vmem>>, vector<32x64xbf16>
      %cst_62 = arith.constant dense<0.000000e+00> : vector<8x64xf32>
      %134 = tpu.matmul %132, %133, %cst_62 {dimension_numbers = #tpu.dot_dimension_numbers<[1], [0], [0], [1], [0, 0, 1, 1], [], []>} : vector<8x32xbf16>, vector<32x64xbf16>, vector<8x64xf32> -> vector<8x64xf32>
      %c0_63 = arith.constant 0 : index
      %c0_64 = arith.constant 0 : index
      %135 = vector.load %arg8[%c0_63, %c0_64] : memref<1x64xf32, #tpu.memory_space<vmem>>, vector<1x64xf32>
      %136 = vector.broadcast %135 : vector<1x64xf32> to vector<8x64xf32>
      %137 = arith.addf %134, %136 : vector<8x64xf32>
      %138 = arith.truncf %137 : vector<8x64xf32> to vector<8x64xbf16>
      %c0_65 = arith.constant 0 : index
      %c0_66 = arith.constant 0 : index
      %139 = vector.load %arg14[%c0_65, %c0_66] : memref<8x64xbf16, #tpu.memory_space<vmem>>, vector<8x64xbf16>
      tpu.vector_store %arg14[%c0_65, %c0_66], %138 {strides = array<i32>} : memref<8x64xbf16, #tpu.memory_space<vmem>>, vector<8x64xbf16>,
    } else {
    }
    %c0_3 = arith.constant 0 : index
    %c0_4 = arith.constant 0 : index
    %5 = vector.load %arg11[%c0_3, %c0_4] : memref<1x32xf32, #tpu.memory_space<vmem>>, vector<1x32xf32>
    %c0_5 = arith.constant 0 : index
    %c0_6 = arith.constant 0 : index
    %6 = vector.load %arg12[%c0_5, %c0_6] : memref<1x32xf32, #tpu.memory_space<vmem>>, vector<1x32xf32>
    %cst = arith.constant dense<0.000000e+00> : vector<8xf32>
    %7 = vector.multi_reduction <add>, %1, %cst [1] : vector<8x32xf32> to vector<8xf32>
    %8 = vector.shape_cast %7 : vector<8xf32> to vector<8x1xf32>
    %cst_7 = arith.constant 3.200000e+01 : f32
    %9 = vector.broadcast %cst_7 : f32 to vector<8x1xf32>
    %10 = arith.divf %8, %9 : vector<8x1xf32>
    %11 = vector.broadcast %10 : vector<8x1xf32> to vector<8x32xf32>
    %12 = arith.subf %1, %11 : vector<8x32xf32>
    %13 = arith.mulf %12, %12 : vector<8x32xf32>
    %cst_8 = arith.constant dense<0.000000e+00> : vector<8xf32>
    %14 = vector.multi_reduction <add>, %13, %cst_8 [1] : vector<8x32xf32> to vector<8xf32>
    %15 = vector.shape_cast %14 : vector<8xf32> to vector<8x1xf32>
    %cst_9 = arith.constant 0.0322580636 : f32
    %16 = vector.broadcast %cst_9 : f32 to vector<8x1xf32>
    %17 = arith.mulf %15, %16 : vector<8x1xf32>
    %18 = math.sqrt %17 : vector<8x1xf32>
    %cst_10 = arith.constant 9.99999997E-7 : f32
    %19 = vector.broadcast %cst_10 : f32 to vector<8x1xf32>
    %20 = arith.addf %18, %19 : vector<8x1xf32>
    %21 = tpu.reciprocal %20 : vector<8x1xf32> -> vector<8x1xf32>
    %22 = vector.broadcast %21 : vector<8x1xf32> to vector<8x32xf32>
    %23 = vector.broadcast %5 : vector<1x32xf32> to vector<8x32xf32>
    %24 = arith.mulf %22, %23 : vector<8x32xf32>
    %25 = arith.mulf %12, %24 : vector<8x32xf32>
    %26 = vector.broadcast %6 : vector<1x32xf32> to vector<8x32xf32>
    %27 = arith.addf %25, %26 : vector<8x32xf32>
    %28 = arith.truncf %27 : vector<8x32xf32> to vector<8x32xbf16>
    %c0_11 = arith.constant 0 : index
    %c0_12 = arith.constant 0 : index
    %29 = vector.load %arg5[%c0_11, %c0_12] : memref<32x32xbf16, #tpu.memory_space<vmem>>, vector<32x32xbf16>
    %cst_13 = arith.constant dense<0.000000e+00> : vector<8x32xf32>
    %30 = tpu.matmul %28, %29, %cst_13 {dimension_numbers = #tpu.dot_dimension_numbers<[1], [0], [0], [1], [0, 0, 1, 1], [], []>} : vector<8x32xbf16>, vector<32x32xbf16>, vector<8x32xf32> -> vector<8x32xf32>
    %c0_14 = arith.constant 0 : index
    %c0_15 = arith.constant 0 : index
    %31 = vector.load %arg6[%c0_14, %c0_15] : memref<1x32xf32, #tpu.memory_space<vmem>>, vector<1x32xf32>
    %32 = vector.broadcast %31 : vector<1x32xf32> to vector<8x32xf32>
    %33 = arith.addf %30, %32 : vector<8x32xf32>
    %34 = arith.truncf %33 : vector<8x32xf32> to vector<8x32xbf16>
    %c0_16 = arith.constant 0 : index
    %c0_17 = arith.constant 0 : index
    %c0_18 = arith.constant 0 : index
    %35 = vector.load %arg4[%c0_16, %c0_17, %c0_18] : memref<1x1x8xi32, #tpu.memory_space<vmem>>, vector<1x1x8xi32>
    %36 = vector.shape_cast %35 : vector<1x1x8xi32> to vector<1x8xi32>
    %c0_i32_19 = arith.constant 0 : i32
    %37 = vector.broadcast %c0_i32_19 : i32 to vector<1x8xi32>
    %38 = arith.cmpi ne, %36, %37 : vector<1x8xi32>
    %39 = vector.extract_strided_slice %34 {offsets = [0, 0], sizes = [8, 8], strides = [1, 1]} : vector<8x32xbf16> to vector<8x8xbf16>
    %c0_20 = arith.constant 0 : index
    %c0_21 = arith.constant 0 : index
    %40 = vector.load %arg14[%c0_20, %c0_21] : memref<8x64xbf16, #tpu.memory_space<vmem>>, vector<8x8xbf16>
    %c0_22 = arith.constant 0 : index
    %c32 = arith.constant 32 : index
    %41 = vector.load %arg14[%c0_22, %c32] : memref<8x64xbf16, #tpu.memory_space<vmem>>, vector<8x8xbf16>
    %cst_23 = arith.constant dense<0.000000e+00> : vector<8x8xf32>
    %42 = tpu.matmul %39, %40, %cst_23 {dimension_numbers = #tpu.dot_dimension_numbers<[1], [1], [0], [0], [0, 0, 1, 0], [], []>} : vector<8x8xbf16>, vector<8x8xbf16>, vector<8x8xf32> -> vector<8x8xf32>
    %cst_24 = arith.constant -1.000000e+30 : f32
    %43 = vector.shape_cast %38 : vector<1x8xi1> to vector<1x8xi1>
    %44 = vector.broadcast %43 : vector<1x8xi1> to vector<8x8xi1>
    %45 = vector.broadcast %cst_24 : f32 to vector<8x8xf32>
    %46 = arith.select %44, %42, %45 : vector<8x8xi1>, vector<8x8xf32>
    %cst_25 = arith.constant dense<0xFF800000> : vector<8xf32>
    %47 = vector.multi_reduction <maximumf>, %46, %cst_25 [1] : vector<8x8xf32> to vector<8xf32>
    %48 = vector.shape_cast %47 : vector<8xf32> to vector<8x1xf32>
    %49 = vector.broadcast %48 : vector<8x1xf32> to vector<8x8xf32>
    %50 = arith.subf %46, %49 : vector<8x8xf32>
    %51 = math.exp %50 : vector<8x8xf32>
    %cst_26 = arith.constant dense<0.000000e+00> : vector<8xf32>
    %52 = vector.multi_reduction <add>, %51, %cst_26 [1] : vector<8x8xf32> to vector<8xf32>
    %53 = vector.shape_cast %52 : vector<8xf32> to vector<8x1xf32>
    %54 = tpu.reciprocal %53 {approx = true} : vector<8x1xf32> -> vector<8x1xf32>
    %55 = vector.broadcast %54 : vector<8x1xf32> to vector<8x8xf32>
    %56 = arith.mulf %51, %55 : vector<8x8xf32>
    %57 = arith.truncf %56 : vector<8x8xf32> to vector<8x8xbf16>
    %cst_27 = arith.constant dense<0.000000e+00> : vector<8x8xf32>
    %58 = tpu.matmul %57, %41, %cst_27 {dimension_numbers = #tpu.dot_dimension_numbers<[1], [0], [0], [1], [0, 0, 1, 1], [], []>} : vector<8x8xbf16>, vector<8x8xbf16>, vector<8x8xf32> -> vector<8x8xf32>
    %59 = vector.extract_strided_slice %34 {offsets = [0, 8], sizes = [8, 8], strides = [1, 1]} : vector<8x32xbf16> to vector<8x8xbf16>
    %c0_28 = arith.constant 0 : index
    %c8 = arith.constant 8 : index
    %60 = vector.load %arg14[%c0_28, %c8] : memref<8x64xbf16, #tpu.memory_space<vmem>>, vector<8x8xbf16>
    %c0_29 = arith.constant 0 : index
    %c40 = arith.constant 40 : index
    %61 = vector.load %arg14[%c0_29, %c40] : memref<8x64xbf16, #tpu.memory_space<vmem>>, vector<8x8xbf16>
    %cst_30 = arith.constant dense<0.000000e+00> : vector<8x8xf32>
    %62 = tpu.matmul %59, %60, %cst_30 {dimension_numbers = #tpu.dot_dimension_numbers<[1], [1], [0], [0], [0, 0, 1, 0], [], []>} : vector<8x8xbf16>, vector<8x8xbf16>, vector<8x8xf32> -> vector<8x8xf32>
    %cst_31 = arith.constant -1.000000e+30 : f32
    %63 = vector.shape_cast %38 : vector<1x8xi1> to vector<1x8xi1>
    %64 = vector.broadcast %63 : vector<1x8xi1> to vector<8x8xi1>
    %65 = vector.broadcast %cst_31 : f32 to vector<8x8xf32>
    %66 = arith.select %64, %62, %65 : vector<8x8xi1>, vector<8x8xf32>
    %cst_32 = arith.constant dense<0xFF800000> : vector<8xf32>
    %67 = vector.multi_reduction <maximumf>, %66, %cst_32 [1] : vector<8x8xf32> to vector<8xf32>
    %68 = vector.shape_cast %67 : vector<8xf32> to vector<8x1xf32>
    %69 = vector.broadcast %68 : vector<8x1xf32> to vector<8x8xf32>
    %70 = arith.subf %66, %69 : vector<8x8xf32>
    %71 = math.exp %70 : vector<8x8xf32>
    %cst_33 = arith.constant dense<0.000000e+00> : vector<8xf32>
    %72 = vector.multi_reduction <add>, %71, %cst_33 [1] : vector<8x8xf32> to vector<8xf32>
    %73 = vector.shape_cast %72 : vector<8xf32> to vector<8x1xf32>
    %74 = tpu.reciprocal %73 {approx = true} : vector<8x1xf32> -> vector<8x1xf32>
    %75 = vector.broadcast %74 : vector<8x1xf32> to vector<8x8xf32>
    %76 = arith.mulf %71, %75 : vector<8x8xf32>
    %77 = arith.truncf %76 : vector<8x8xf32> to vector<8x8xbf16>
    %cst_34 = arith.constant dense<0.000000e+00> : vector<8x8xf32>
    %78 = tpu.matmul %77, %61, %cst_34 {dimension_numbers = #tpu.dot_dimension_numbers<[1], [0], [0], [1], [0, 0, 1, 1], [], []>} : vector<8x8xbf16>, vector<8x8xbf16>, vector<8x8xf32> -> vector<8x8xf32>
    %79 = vector.extract_strided_slice %34 {offsets = [0, 16], sizes = [8, 8], strides = [1, 1]} : vector<8x32xbf16> to vector<8x8xbf16>
    %c0_35 = arith.constant 0 : index
    %c16 = arith.constant 16 : index
    %80 = vector.load %arg14[%c0_35, %c16] : memref<8x64xbf16, #tpu.memory_space<vmem>>, vector<8x8xbf16>
    %c0_36 = arith.constant 0 : index
    %c48 = arith.constant 48 : index
    %81 = vector.load %arg14[%c0_36, %c48] : memref<8x64xbf16, #tpu.memory_space<vmem>>, vector<8x8xbf16>
    %cst_37 = arith.constant dense<0.000000e+00> : vector<8x8xf32>
    %82 = tpu.matmul %79, %80, %cst_37 {dimension_numbers = #tpu.dot_dimension_numbers<[1], [1], [0], [0], [0, 0, 1, 0], [], []>} : vector<8x8xbf16>, vector<8x8xbf16>, vector<8x8xf32> -> vector<8x8xf32>
    %cst_38 = arith.constant -1.000000e+30 : f32
    %83 = vector.shape_cast %38 : vector<1x8xi1> to vector<1x8xi1>
    %84 = vector.broadcast %83 : vector<1x8xi1> to vector<8x8xi1>
    %85 = vector.broadcast %cst_38 : f32 to vector<8x8xf32>
    %86 = arith.select %84, %82, %85 : vector<8x8xi1>, vector<8x8xf32>
    %cst_39 = arith.constant dense<0xFF800000> : vector<8xf32>
    %87 = vector.multi_reduction <maximumf>, %86, %cst_39 [1] : vector<8x8xf32> to vector<8xf32>
    %88 = vector.shape_cast %87 : vector<8xf32> to vector<8x1xf32>
    %89 = vector.broadcast %88 : vector<8x1xf32> to vector<8x8xf32>
    %90 = arith.subf %86, %89 : vector<8x8xf32>
    %91 = math.exp %90 : vector<8x8xf32>
    %cst_40 = arith.constant dense<0.000000e+00> : vector<8xf32>
    %92 = vector.multi_reduction <add>, %91, %cst_40 [1] : vector<8x8xf32> to vector<8xf32>
    %93 = vector.shape_cast %92 : vector<8xf32> to vector<8x1xf32>
    %94 = tpu.reciprocal %93 {approx = true} : vector<8x1xf32> -> vector<8x1xf32>
    %95 = vector.broadcast %94 : vector<8x1xf32> to vector<8x8xf32>
    %96 = arith.mulf %91, %95 : vector<8x8xf32>
    %97 = arith.truncf %96 : vector<8x8xf32> to vector<8x8xbf16>
    %cst_41 = arith.constant dense<0.000000e+00> : vector<8x8xf32>
    %98 = tpu.matmul %97, %81, %cst_41 {dimension_numbers = #tpu.dot_dimension_numbers<[1], [0], [0], [1], [0, 0, 1, 1], [], []>} : vector<8x8xbf16>, vector<8x8xbf16>, vector<8x8xf32> -> vector<8x8xf32>
    %99 = vector.extract_strided_slice %34 {offsets = [0, 24], sizes = [8, 8], strides = [1, 1]} : vector<8x32xbf16> to vector<8x8xbf16>
    %c0_42 = arith.constant 0 : index
    %c24 = arith.constant 24 : index
    %100 = vector.load %arg14[%c0_42, %c24] : memref<8x64xbf16, #tpu.memory_space<vmem>>, vector<8x8xbf16>
    %c0_43 = arith.constant 0 : index
    %c56 = arith.constant 56 : index
    %101 = vector.load %arg14[%c0_43, %c56] : memref<8x64xbf16, #tpu.memory_space<vmem>>, vector<8x8xbf16>
    %cst_44 = arith.constant dense<0.000000e+00> : vector<8x8xf32>
    %102 = tpu.matmul %99, %100, %cst_44 {dimension_numbers = #tpu.dot_dimension_numbers<[1], [1], [0], [0], [0, 0, 1, 0], [], []>} : vector<8x8xbf16>, vector<8x8xbf16>, vector<8x8xf32> -> vector<8x8xf32>
    %cst_45 = arith.constant -1.000000e+30 : f32
    %103 = vector.shape_cast %38 : vector<1x8xi1> to vector<1x8xi1>
    %104 = vector.broadcast %103 : vector<1x8xi1> to vector<8x8xi1>
    %105 = vector.broadcast %cst_45 : f32 to vector<8x8xf32>
    %106 = arith.select %104, %102, %105 : vector<8x8xi1>, vector<8x8xf32>
    %cst_46 = arith.constant dense<0xFF800000> : vector<8xf32>
    %107 = vector.multi_reduction <maximumf>, %106, %cst_46 [1] : vector<8x8xf32> to vector<8xf32>
    %108 = vector.shape_cast %107 : vector<8xf32> to vector<8x1xf32>
    %109 = vector.broadcast %108 : vector<8x1xf32> to vector<8x8xf32>
    %110 = arith.subf %106, %109 : vector<8x8xf32>
    %111 = math.exp %110 : vector<8x8xf32>
    %cst_47 = arith.constant dense<0.000000e+00> : vector<8xf32>
    %112 = vector.multi_reduction <add>, %111, %cst_47 [1] : vector<8x8xf32> to vector<8xf32>
    %113 = vector.shape_cast %112 : vector<8xf32> to vector<8x1xf32>
    %114 = tpu.reciprocal %113 {approx = true} : vector<8x1xf32> -> vector<8x1xf32>
    %115 = vector.broadcast %114 : vector<8x1xf32> to vector<8x8xf32>
    %116 = arith.mulf %111, %115 : vector<8x8xf32>
    %117 = arith.truncf %116 : vector<8x8xf32> to vector<8x8xbf16>
    %cst_48 = arith.constant dense<0.000000e+00> : vector<8x8xf32>
    %118 = tpu.matmul %117, %101, %cst_48 {dimension_numbers = #tpu.dot_dimension_numbers<[1], [0], [0], [1], [0, 0, 1, 1], [], []>} : vector<8x8xbf16>, vector<8x8xbf16>, vector<8x8xf32> -> vector<8x8xf32>
    %119 = tpu.concatenate %58, %78, %98, %118 in 1 : vector<8x8xf32>, vector<8x8xf32>, vector<8x8xf32>, vector<8x8xf32> -> vector<8x32xf32>
    %120 = arith.truncf %119 : vector<8x32xf32> to vector<8x32xbf16>
    %c0_49 = arith.constant 0 : index
    %c0_50 = arith.constant 0 : index
    %121 = vector.load %arg9[%c0_49, %c0_50] : memref<32x32xbf16, #tpu.memory_space<vmem>>, vector<32x32xbf16>
    %cst_51 = arith.constant dense<0.000000e+00> : vector<8x32xf32>
    %122 = tpu.matmul %120, %121, %cst_51 {dimension_numbers = #tpu.dot_dimension_numbers<[1], [0], [0], [1], [0, 0, 1, 1], [], []>} : vector<8x32xbf16>, vector<32x32xbf16>, vector<8x32xf32> -> vector<8x32xf32>
    %123 = arith.addf %1, %122 : vector<8x32xf32>
    %c0_52 = arith.constant 0 : index
    %c0_53 = arith.constant 0 : index
    %124 = vector.load %arg10[%c0_52, %c0_53] : memref<1x32xf32, #tpu.memory_space<vmem>>, vector<1x32xf32>
    %125 = vector.broadcast %124 : vector<1x32xf32> to vector<8x32xf32>
    %126 = arith.addf %123, %125 : vector<8x32xf32>
    %c0_54 = arith.constant 0 : index
    %c0_55 = arith.constant 0 : index
    %c0_56 = arith.constant 0 : index
    %127 = vector.load %arg13[%c0_54, %c0_55, %c0_56] : memref<1x8x32xf32, #tpu.memory_space<vmem>>, vector<1x8x32xf32>
    %128 = vector.shape_cast %127 : vector<1x8x32xf32> to vector<8x32xf32>
    %129 = vector.shape_cast %126 : vector<8x32xf32> to vector<1x8x32xf32>
    tpu.vector_store %arg13[%c0_54, %c0_55, %c0_56], %129 {strides = array<i32>} : memref<1x8x32xf32, #tpu.memory_space<vmem>>, vector<1x8x32xf32>,
    return
  }
  func.func @transform_0(%arg0: i32, %arg1: i32) -> (i32, i32, i32) {
    %c0_i32 = arith.constant 0 : i32
    %c0_i32_0 = arith.constant 0 : i32
    return %arg0, %arg1, %c0_i32 : i32, i32, i32
  }
  func.func @transform_1(%arg0: i32, %arg1: i32) -> (i32, i32, i32) {
    %c0_i32 = arith.constant 0 : i32
    %c0_i32_0 = arith.constant 0 : i32
    %c0_i32_1 = arith.constant 0 : i32
    return %arg0, %c0_i32, %c0_i32_0 : i32, i32, i32
  }
  func.func @transform_2(%arg0: i32, %arg1: i32) -> (i32, i32, i32) {
    %c0_i32 = arith.constant 0 : i32
    %c0_i32_0 = arith.constant 0 : i32
    %c0_i32_1 = arith.constant 0 : i32
    return %arg0, %c0_i32, %c0_i32_0 : i32, i32, i32
  }
  func.func @transform_3(%arg0: i32, %arg1: i32) -> (i32, i32) {
    %c0_i32 = arith.constant 0 : i32
    %c0_i32_0 = arith.constant 0 : i32
    %c0_i32_1 = arith.constant 0 : i32
    return %c0_i32, %c0_i32_0 : i32, i32
  }
  func.func @transform_4(%arg0: i32, %arg1: i32) -> (i32, i32) {
    %c0_i32 = arith.constant 0 : i32
    %c0_i32_0 = arith.constant 0 : i32
    %c0_i32_1 = arith.constant 0 : i32
    return %c0_i32, %c0_i32_0 : i32, i32
  }
  func.func @transform_5(%arg0: i32, %arg1: i32) -> (i32, i32) {
    %c0_i32 = arith.constant 0 : i32
    %c0_i32_0 = arith.constant 0 : i32
    %c0_i32_1 = arith.constant 0 : i32
    return %c0_i32, %c0_i32_0 : i32, i32
  }
  func.func @transform_6(%arg0: i32, %arg1: i32) -> (i32, i32) {
    %c0_i32 = arith.constant 0 : i32
    %c0_i32_0 = arith.constant 0 : i32
    %c0_i32_1 = arith.constant 0 : i32
    return %c0_i32, %c0_i32_0 : i32, i32
  }
  func.func @transform_7(%arg0: i32, %arg1: i32) -> (i32, i32) {
    %c0_i32 = arith.constant 0 : i32
    %c0_i32_0 = arith.constant 0 : i32
    %c0_i32_1 = arith.constant 0 : i32
    return %c0_i32, %c0_i32_0 : i32, i32
  }
  func.func @transform_8(%arg0: i32, %arg1: i32) -> (i32, i32) {
    %c0_i32 = arith.constant 0 : i32
    %c0_i32_0 = arith.constant 0 : i32
    %c0_i32_1 = arith.constant 0 : i32
    return %c0_i32, %c0_i32_0 : i32, i32
  }
  func.func @transform_9(%arg0: i32, %arg1: i32) -> (i32, i32) {
    %c0_i32 = arith.constant 0 : i32
    %c0_i32_0 = arith.constant 0 : i32
    %c0_i32_1 = arith.constant 0 : i32
    return %c0_i32, %c0_i32_0 : i32, i32
  }
  func.func @transform_10(%arg0: i32, %arg1: i32) -> (i32, i32) {
    %c0_i32 = arith.constant 0 : i32
    %c0_i32_0 = arith.constant 0 : i32
    %c0_i32_1 = arith.constant 0 : i32
    return %c0_i32, %c0_i32_0 : i32, i32
  }
  func.func @transform_11(%arg0: i32, %arg1: i32) -> (i32, i32, i32) {
    %c0_i32 = arith.constant 0 : i32
    %c0_i32_0 = arith.constant 0 : i32
    return %arg0, %arg1, %c0_i32 : i32, i32, i32
  }
}

</mosaic_0001>

<bundles_post_ra>
// kernel: _lambda_.13
= control target key start
LH: loop header
LB: loop body
LE: loop exit
PB: predicated region body
PF: predicated region fallthrough
CT: control target
= control target key end

     0   :  { %8 = vsyncpa [#allocation3], 0  ;;  %s858_s0 = inlined_call_operand.hbm [shape: f32[16,32], index: 0, kind: input, shape index: {}]   ;;  %s859_s1 = inlined_call_operand.hbm [shape: f32[1,32], index: 1, kind: input, shape index: {}]   ;;  %s860_s2 = inlined_call_operand.hbm [shape: f32[1,32], index: 2, kind: input, shape index: {}]   ;;  %s861_s3 = inlined_call_operand.hbm [shape: f32[16,32], index: 3, kind: output, shape index: {}]  }
   0x1   :  { %10 = vsyncpa [#allocation3 + $0x1], 0 }
   0x2   :  { %11 = vsyncpa [#allocation6], 0 }
   0x3   :  { %12 = vsyncpa [#allocation4], 0 }
   0x4   :  { %14 = vsyncpa [#allocation4 + $0x1], 0  ;;  %s625_s12 = smov 0   ;;  %s627_s13 = smov 0  }
   0x5   :  { %s629_s14 = smov 0   ;;  %s631_s15 = smov 0  }
   0x6 LB: > { %s646_s16 = sadd.s32 4294967295, %s599_s15   ;;  %s354_s17 = sadd.s32 4294967294, %s599_s15   ;;  %s599_s15 = sphi %s631_s15, %s881_s15   ;;  %s595_s14 = sphi %s629_s14, %s880_s14   ;;  %s591_s13 = sphi %s627_s13, %s879_s13   ;;  %s587_s12 = sphi %s625_s12, %s878_s12  }
   0x7   : > { %p40_p0 = scmp.ne.s32.totalorder %s591_s13, %s587_s12  ;;  %p862_p1 = scmp.eq.s32.totalorder %s646_s16, 0 }
   0x8   : > { %p112_p3 = scmp.eq.s32.totalorder %s354_s17, 1  ;;  %p355_p5 = scmp.ge.s32.totalorder %s599_s15, 1 }
   0x9   : > { %p655_p4 = por %p862_p1, %p40_p0  ;;  %p119_p7 = scmp.lt.s32.totalorder %s599_s15, 3 }
   0xa   : > { %p660_p6 = por %p112_p3, %p40_p0  ;;  %s601_s21 = smov [#allocation5]  }
   0xb   : > { %s865_s18 = scalar_select %p655_p4, 1, 0 }
   0xc   : > { %s866_s19 = scalar_select %p660_p6, 1, 0 }
   0xd   : > { %p665_p8 = pnand %p355_p5, %p119_p7  ;;  %s132_s22 = sshll.u32 %s601_s21, 4  ;;  %s133_s22 = int_to_ptr.vmem [resolvable:$true] %s132_s22 }
   0xe   : > { %s602_s23 = smov [#allocation7]   ;;  %s681_s26 = sadd.s32 1, %s599_s15  }
   0xf   : > { %s867_s20 = scalar_select %p665_p8, 1, 0 }
  0x10   : > { %p384_p10 = pneg %p665_p8  ;;  %s143_s24 = sshll.u32 %s602_s23, 4  ;;  %s678_s24 = int_to_ptr.vmem [resolvable:$true] %s143_s24 }
  0x11   : > { %s24_s27 = ssub.s32 %s599_s15, %s681_s26  ;;  %s443_s30 = scalar_lea.hbm %s859_s1, 16 }
  0x12   : > { %p674_p11 = pnand %p384_p10, %p862_p1  ;;  %p444_p12 = scmp.ne.s32.totalorder %s859_s1, %s443_s30 }
  0x13   : > { %p450_p5 = scmp.lt.u32.totalorder %s443_s30, %s859_s1 }
  0x14   : > { %p445_p13 = pneg %p674_p11 }
  0x16   : > { %p446_p0 = pnand %p445_p13, %p444_p12 }
  0x18   : > { %p447_p3 = pneg %p446_p0 }
  0x1a   : > { %p452_p7 = pnand %p450_p5, %p447_p3 }
  0x1c   : > { %455 = shalt.err (!%p452_p7)
}
  0x1d   : > { %s456_s8 = scalar_lea.vmem %s133_s22, 16  ;;  %s463_s9 = scalar_lea.vmem %s133_s22, 32 }
  0x1e   : > { %p457_p10 = scmp.ne.s32.totalorder %s133_s22, %s456_s8  ;;  %p464_p2 = scmp.lt.s32.totalorder %s133_s22, %s133_s22 }
  0x1f   : > { %p465_p6 = scmp.lt.s32.totalorder %s463_s9, %s456_s8 }
  0x20   : > { %p459_p9 = pnand %p457_p10, %p445_p13 }
  0x21   : > { %p466_p4 = por %p465_p6, %p464_p2 }
  0x22   : > { %p460_p1 = pneg %p459_p9 }
  0x24   : > { %p467_p8 = pnand %p466_p4, %p460_p1 }
  0x26   : > { %470 = shalt.err (!%p467_p8)
}
  0x27   : > { %387 = dma.hbm_to_vmem [thread:$0]  (!%p674_p11), %s859_s1, 16, %s133_s22, [#allocation6]  }
  0x28   : > { %s471_s23 = scalar_lea.hbm %s860_s2, 16 }
  0x29   : > { %p472_p9 = scmp.ne.s32.totalorder %s860_s2, %s471_s23  ;;  %p478_p4 = scmp.lt.u32.totalorder %s471_s23, %s860_s2 }
  0x2b   : > { %p474_p2 = pnand %p472_p9, %p445_p13 }
  0x2d   : > { %p475_p1 = pneg %p474_p2 }
  0x2f   : > { %p480_p6 = pnand %p478_p4, %p475_p1 }
  0x31   : > { %483 = shalt.err (!%p480_p6)
}
  0x32   : > { %s484_s22 = scalar_lea.vmem %s678_s24, 16  ;;  %s491_s5 = scalar_lea.vmem %s678_s24, 32 }
  0x33   : > { %p485_p8 = scmp.ne.s32.totalorder %s678_s24, %s484_s22  ;;  %p492_p3 = scmp.lt.s32.totalorder %s678_s24, %s678_s24 }
  0x34   : > { %p493_p5 = scmp.lt.s32.totalorder %s491_s5, %s484_s22 }
  0x35   : > { %p487_p12 = pnand %p485_p8, %p445_p13 }
  0x36   : > { %p494_p7 = por %p493_p5, %p492_p3 }
  0x37   : > { %p488_p0 = pneg %p487_p12 }
  0x39   : > { %p495_p10 = pnand %p494_p7, %p488_p0 }
  0x3b   : > { %498 = shalt.err (!%p495_p10)
}
  0x3c   : > { %390 = dma.hbm_to_vmem [thread:$0]  (!%p674_p11), %s860_s2, 16, %s678_s24, [#allocation6]  }
  0x3d   : > { %p25_p13 = scmp.eq.s32.totalorder %s24_s27, 0  ;;  %s27_s8 = sadd.s32 1, %s595_s14 }
  0x3e   : > { %p34_p9 = scmp.ne.s32.totalorder %s595_s14, %s591_s13  ;;  %p35_p2 = scmp.eq.s32.totalorder %s599_s15, 0 }
  0x3f   : > { %s741_s25 = scalar_select %p25_p13, %s595_s14, %s27_s8  }
  0x40   : > { %p36_p1 = por %p35_p2, %p34_p9  ;;  %p869_p4 = scmp.eq.s32.totalorder %s646_s16, 1 }
  0x41   : > { %p401_p8 = scmp.lt.s32.totalorder %s599_s15, 2  ;;  %s154_s10 = sand.u32 1, %s595_s14  }
  0x42   : > { %p745_p6 = por %p869_p4, %p34_p9  ;;  %s359_s11 = sshll.u32 %s154_s10, 3 }
  0x43   : > { %s360_s17 = sshll.u32 %s599_s15, 7  ;;  %s158_s27 = scalar_lea.vmem [#allocation2], %s359_s11 }
  0x44   : > { %s755_s24 = scalar_lea.hbm %s858_s0, %s360_s17  ;;  %s165_s28 = sshll.u32 %s158_s27, 4  ;;  %s757_s28 = int_to_ptr.vmem [resolvable:$true] %s165_s28 }
  0x45   : > { %p759_p11 = pnand %p401_p8, %p36_p1  ;;  %s155_s30 = scalar_lea.sflag [#allocation3], %s154_s10 }
  0x46   : > { %s499_s4 = scalar_lea.hbm %s755_s24, 128  ;;  %s504_s6 = scalar_lea.hbm %s858_s0, 256 }
  0x47   : > { %p500_p12 = scmp.ne.s32.totalorder %s755_s24, %s499_s4  ;;  %p501_p0 = pneg %p759_p11 }
  0x48   : > { %p505_p7 = scmp.lt.u32.totalorder %s755_s24, %s858_s0  ;;  %p506_p10 = scmp.lt.u32.totalorder %s504_s6, %s499_s4 }
  0x49   : > { %p502_p3 = pnand %p501_p0, %p500_p12  ;;  %p508_p9 = scmp.lt.u32.totalorder %s499_s4, %s755_s24 }
  0x4a   : > { %p507_p13 = por %p506_p10, %p505_p7 }
  0x4b   : > { %p503_p5 = pneg %p502_p3 }
  0x4c   : > { %p509_p2 = por %p508_p9, %p507_p13 }
  0x4e   : > { %p510_p1 = pnand %p509_p2, %p503_p5 }
  0x50   : > { %513 = shalt.err (!%p510_p1)
}
  0x51   : > { %s514_s10 = scalar_lea.vmem %s757_s28, 128  ;;  %s603_s11 = smov [#allocation2]  }
  0x52   : > { %p515_p4 = scmp.ne.s32.totalorder %s757_s28, %s514_s10  ;;  %s519_s17 = sshll.u32 %s603_s11, 4  ;;  %s520_s17 = int_to_ptr.vmem [resolvable:$false] %s519_s17 }
  0x53   : > { %s521_s21 = scalar_lea.vmem %s520_s17, 256  ;;  %p522_p3 = scmp.lt.s32.totalorder %s757_s28, %s520_s17 }
  0x54   : > { %p517_p8 = pnand %p515_p4, %p501_p0  ;;  %p523_p7 = scmp.lt.s32.totalorder %s521_s21, %s514_s10 }
  0x56   : > { %p518_p12 = pneg %p517_p8  ;;  %p524_p10 = por %p523_p7, %p522_p3 }
  0x58   : > { %p525_p13 = pnand %p524_p10, %p518_p12 }
  0x5a   : > { %528 = shalt.err (!%p525_p13)
}
  0x5b   : > { %394 = dma.hbm_to_vmem [thread:$0]  (!%p759_p11), %s755_s24, 128, %s757_s28, %s155_s30  }
  0x5c   : > { %p872_p5 = scmp.ne.s32.totalorder %s867_s20, 0 }
  0x5d   : > { %s791_s23 = sand.u32 (!%p872_p5), 1, %s591_s13   ;;  %p873_p0 = scmp.ne.s32.totalorder (!%p872_p5), %s865_s18, 0 }
  0x5e   : > { %174 = sbr.rel (%p872_p5) target bundleno = 448 (0x1c0), region = 32  ;;  %s362_s27 = sshll.u32 (!%p872_p5), %s791_s23, 3 }
  0x5f   : > { %s177_s4 = scalar_lea.sflag (!%p872_p5), [#allocation3], %s791_s23  ;;  %s180_s22 = scalar_lea.vmem (!%p872_p5), [#allocation2], %s362_s27 }
  0x65   : > { %574 = dma.done.wait (%p873_p0), %s177_s4, 128  }
  0x66   : > { %576 = vsyncadd (%p873_p0), %s177_s4, 4294967168  ;;  %p874_p11 = scmp.eq.s32.totalorder %s646_s16, 0 }
  0x68   : > { %578 = dma.done.wait (%p874_p11), [#allocation6], 32   ;;  %p875_p9 = pmov %p874_p11 }
  0x69   : > { %vm214_vm0 = vcmask 261120   ;;  %v211_v0 = vld [vmem:[%s180_s22] sm:$0xff]  ;;  %v366_v15 = vld [vmem:[#allocation5] ss:$0 sm:$0xff]  ;;  %v367_v18 = vld [vmem:[#allocation7] ss:$0 sm:$0xff] }
  0x6a   : > { %580 = vsyncadd (%p875_p9), [#allocation6], 4294967264  ;;  %v215_v1 = vsel %vm214_vm0, %v211_v0, 0.0  ;;  %s369_s18 = sshll.u32 %s646_s16, 7  ;;  %s210_s20 = scalar_lea.vmem [#allocation8], %s362_s27 }
  0x6b   : > { %216 = vadd.xlane.f32.xlu0 %v215_v1  ;;  %s265_s24 = sshll.u32 %s210_s20, 4  ;;  %s813_s30 = scalar_lea.hbm %s861_s3, %s369_s18  ;;  %s815_s24 = int_to_ptr.vmem [resolvable:$true] %s265_s24 }
  0x6c   : > { %s252_s5 = scalar_lea.sflag [#allocation4], %s791_s23  ;;  %s529_s6 = scalar_lea.vmem %s815_s24, 128 }
  0x6d   : > { %p530_p2 = scmp.ne.s32.totalorder %s815_s24, %s529_s6  ;;  %s604_s16 = smov [#allocation8]  }
  0x6e   : > { %s533_s7 = sshll.u32 %s604_s16, 4  ;;  %s534_s7 = int_to_ptr.vmem [resolvable:$false] %s533_s7 }
  0x6f   : > { %p531_p1 = pnand %p530_p2, %p745_p6  ;;  %s535_s8 = scalar_lea.vmem %s534_s7, 256 }
  0x70   : > { %p536_p8 = scmp.lt.s32.totalorder %s815_s24, %s534_s7  ;;  %p537_p12 = scmp.lt.s32.totalorder %s535_s8, %s529_s6 }
  0x71   : > { %p532_p4 = pneg %p531_p1 }
  0x72   : > { %p538_p3 = por %p537_p12, %p536_p8 }
  0x74   : > { %p539_p7 = pnand %p538_p3, %p532_p4 }
  0xf8   : > { %v217_v2 = vpop.xlane.xlu0 %216 }
  0xf9   : > { %v219_v3 = vmul.f32 0.03125, %v217_v2 }
  0xfb   : > { %v220_v4 = vsub.f32 %v211_v0, %v219_v3 }
  0xfd   : > { %v221_v5 = vmul.f32 %v220_v4, %v220_v4 }
  0xff   : > { %v222_v6 = vsel %vm214_vm0, %v221_v5, 0.0 }
 0x100   : > { %223 = vadd.xlane.f32.xlu0 %v222_v6 }
 0x18d   : > { %v224_v7 = vpop.xlane.xlu0 %223 }
 0x18e   : > { %v225_v8 = vmul.f32 0.032258064, %v224_v7 }
 0x190   : > { %439 = vrsqrt.f32 %v225_v8  ;;  %vm228_vm1 = vcmp.eq.f32.partialorder %v225_v8, inf  ;;  %v231_v11 = vand.u32 2147483648, %v225_v8  ;;  %vm230_vm2 = vcmp.eq.f32.partialorder %v225_v8, 0.0 }
 0x19a   : > { %v440_v9 = vpop.eup %439 }
 0x19b   : > { %v227_v10 = vmul.f32 %v440_v9, %v225_v8 }
 0x19d   : > { %v229_v12 = vsel %vm228_vm1, %v225_v8, %v227_v10 }
 0x19e   : > { %v232_v13 = vsel %vm230_vm2, %v231_v11, %v229_v12 }
 0x19f   : > { %v233_v14 = vadd.f32 1e-06, %v232_v13 }
 0x1a1   : > { %441 = vrcp.f32 %v233_v14 }
 0x1ab   : > { %v442_v16 = vpop.eup %441 }
 0x1ac   : > { %v241_v17 = vmul.f32 %v442_v16, %v366_v15 }
 0x1ae   : > { %v242_v19 = vmul.f32 %v241_v17, %v220_v4 }
 0x1b0   : > { %v249_v20 = vadd.f32 %v367_v18, %v242_v19 }
 0x1b2   : > { %250 = vst.msk [vmem:[%s210_s20] sm:$0xff] %vm214_vm0, %v249_v20 }
 0x1b3   : > { %542 = shalt.err (!%p539_p7)
}
 0x1b4   : > { %s543_s10 = scalar_lea.hbm %s813_s30, 128  ;;  %s547_s21 = scalar_lea.hbm %s861_s3, 256 }
 0x1b5   : > { %p544_p10 = scmp.ne.s32.totalorder %s813_s30, %s543_s10  ;;  %p548_p0 = scmp.lt.u32.totalorder %s813_s30, %s861_s3 }
 0x1b6   : > { %p549_p11 = scmp.lt.u32.totalorder %s547_s21, %s543_s10  ;;  %p551_p2 = scmp.lt.u32.totalorder %s543_s10, %s813_s30 }
 0x1b7   : > { %p545_p13 = pnand %p544_p10, %p745_p6 }
 0x1b8   : > { %p550_p9 = por %p549_p11, %p548_p0 }
 0x1b9   : > { %p546_p5 = pneg %p545_p13 }
 0x1ba   : > { %p552_p1 = por %p551_p2, %p550_p9 }
 0x1bc   : > { %p553_p4 = pnand %p552_p1, %p546_p5 }
 0x1be   : > { %556 = shalt.err (!%p553_p4)
}
 0x1bf   : > { %382 = dma.vmem_to_hbm [thread:$0]  (%p745_p6), %s815_s24, 128, %s813_s30, %s252_s5  }
 0x1c0 PF: > { %s277_s4 = sand.u32 1, %s587_s12   ;;  %p876_p8 = scmp.ne.s32.totalorder %s866_s19, 0 }
 0x1c1   : > { %p877_p12 = scmp.ge.s32.totalorder %s599_s15, 2  ;;  %s278_s22 = scalar_lea.sflag [#allocation4], %s277_s4 }
 0x1c3   : > { %p396_p3 = pnand %p877_p12, %p876_p8 }
 0x1c5   : > { %582 = dma.done.wait (!%p396_p3), %s278_s22, 128  }
 0x1c6   : > { %584 = vsyncadd (!%p396_p3), %s278_s22, 4294967168  ;;  %p17_p7 = scmp.ge.s32.totalorder %s681_s26, 4   ;;  %s878_s12 = smov %s591_s13 }
 0x1c7   : > { %s879_s13 = smov %s595_s14  ;;  %s880_s14 = smov %s741_s25 }
 0x1c8   : > { %s881_s15 = smov %s681_s26  ;;  %19 = sbr.rel (!%p17_p7) target bundleno = 6 (0x6), region = 85 }
 0x1cf   :  { %283 = vsyncpa [#allocation3], 1 }
 0x1d0   :  { %285 = vsyncpa [#allocation3 + $0x1], 1 }
 0x1d1   :  { %286 = vsyncpa [#allocation6], 1 }
 0x1d2   :  { %287 = vsyncpa [#allocation4], 1 }
 0x1d3   :  { %289 = vsyncpa [#allocation4 + $0x1], 1 }

// kernel: _lambda_.7
= control target key start
LH: loop header
LB: loop body
LE: loop exit
PB: predicated region body
PF: predicated region fallthrough
CT: control target
= control target key end

     0   :  { %s2760_s0 = inlined_call_operand.hbm [shape: f32[2,8,32], index: 0, kind: input, shape index: {}, may-alias: {0,1}]   ;;  %s2761_s1 = inlined_call_operand.hbm [shape: f32[2,8,32], index: 1, kind: input, shape index: {}, may-alias: {0,1}]   ;;  %s2762_s2 = inlined_call_operand.hbm [shape: s32[2,1,8], index: 2, kind: input, shape index: {}]   ;;  %s2763_s3 = inlined_call_operand.hbm [shape: bf16[32,96], index: 3, kind: input, shape index: {}]   ;;  %s2764_s4 = inlined_call_operand.hbm [shape: f32[1,96], index: 4, kind: input, shape index: {}]   ;;  %s2765_s5 = inlined_call_operand.hbm [shape: bf16[32,32], index: 5, kind: input, shape index: {}]   ;;  %s2766_s6 = inlined_call_operand.hbm [shape: f32[1,32], index: 6, kind: input, shape index: {}]   ;;  %s2767_s7 = inlined_call_operand.hbm [shape: f32[1,32], index: 7, kind: input, shape index: {}]   ;;  %s2768_s8 = inlined_call_operand.hbm [shape: f32[1,32], index: 8, kind: input, shape index: {}]   ;;  %s2769_s9 = inlined_call_operand.hbm [shape: f32[2,8,32], index: 9, kind: output, shape index: {}]  }
   0x1   :  { %2790 = sst [smem:[#allocation31_spill]] %s2761_s1 }
   0x2   :  { %2791 = sst [smem:[#allocation32_spill]] %s2763_s3 }
   0x3   :  { %2792 = sst [smem:[#allocation33_spill]] %s2765_s5 }
   0x4   :  { %2793 = sst [smem:[#allocation34_spill]] %s2767_s7 }
   0x5   :  { %2794 = sst [smem:[#allocation35_spill]] %s2769_s9 }
   0x6   :  { %14 = vsyncpa [#allocation4], 0 }
   0x7   :  { %16 = vsyncpa [#allocation4 + $0x1], 0 }
   0x8   :  { %17 = vsyncpa [#allocation7], 0 }
   0x9   :  { %19 = vsyncpa [#allocation7 + $0x1], 0 }
   0xa   :  { %20 = vsyncpa [#allocation10], 0 }
   0xb   :  { %21 = vsyncpa [#allocation13], 0 }
   0xc   :  { %22 = vsyncpa [#allocation16], 0 }
   0xd   :  { %23 = vsyncpa [#allocation5], 0 }
   0xe   :  { %25 = vsyncpa [#allocation5 + $0x1], 0  ;;  %s2241_s30 = smov 0   ;;  %s2243_s10 = smov 0  }
   0xf   :  { %s2245_s11 = smov 0   ;;  %s2247_s12 = smov 0  }
  0x10   :  { %s2249_s13 = smov 0   ;;  %s2251_s14 = smov 0  }
  0x11 LB: > { %2795 = sst [smem:[#allocation25_spill]] %s2152_s11  ;;  %s2272_s15 = sadd.s32 4294967295, %s2164_s14   ;;  %s2164_s14 = sphi %s2251_s14, %s31_s14   ;;  %s2160_s13 = sphi %s2249_s13, %s2846_s13   ;;  %s2156_s12 = sphi %s2247_s12, %s2845_s12   ;;  %s2152_s11 = sphi %s2245_s11, %s2844_s11   ;;  %s2148_s10 = sphi %s2243_s10, %s2843_s10   ;;  %s2144_s30 = sphi %s2241_s30, %s2842_s30  }
  0x12   : > { %2796 = sst [smem:[#allocation26_spill]] %s2156_s12  ;;  %p1482_p0 = scmp.ge.s32.totalorder %s2164_s14, 1 }
  0x13   : > { %2797 = sst [smem:[#allocation27_spill]] %s2164_s14  ;;  %p2772_p1 = scmp.eq.s32.totalorder %s2272_s15, 0 }
  0x14   : > { %p282_p2 = scmp.lt.s32.totalorder %s2164_s14, 3  ;;  %s2166_s17 = smov [#allocation9]  }
  0x15   : > { %s294_s18 = sshll.u32 %s2166_s17, 4  ;;  %s2167_s20 = smov [#allocation12]   ;;  %s2281_s18 = int_to_ptr.vmem [resolvable:$true] %s294_s18 }
  0x16   : > { %p2277_p3 = pnand %p1482_p0, %p282_p2  ;;  %s318_s21 = sshll.u32 %s2167_s20, 4  ;;  %s2292_s21 = int_to_ptr.vmem [resolvable:$true] %s318_s21 }
  0x17   : > { %s2168_s22 = smov [#allocation15]   ;;  %s2801_s3 = sld [smem:[#allocation32_spill]] }
  0x18   : > { %s2798_s16 = scalar_select %p2277_p3, 1, 0 }
  0x19   : > { %p1661_p4 = pneg %p2277_p3  ;;  %s2294_s23 = sshll.u32 %s2168_s22, 4  ;;  %s344_s23 = int_to_ptr.vmem [resolvable:$true] %s2294_s23 }
  0x1a   : > { %2799 = sst [smem:[#allocation28_spill]] %s2798_s16 }
  0x1b   : > { %p2288_p6 = pnand %p1661_p4, %p2772_p1 }
  0x1d   : > { %s2800_s19 = scalar_select %p2288_p6, 1, 0 }
  0x1e   : > { %s1808_s26 = scalar_lea.hbm %s2801_s3, 256  ;;  %p2304_p8 = pneg %p2288_p6 }
  0x1f   : > { %p1809_p7 = scmp.ne.s32.totalorder %s2801_s3, %s1808_s26  ;;  %p1815_p11 = scmp.lt.u32.totalorder %s1808_s26, %s2801_s3 }
  0x20   : > { %s2802_s29 = scalar_select %p2304_p8, 1, 0 }
  0x21   : > { %p1811_p9 = pnand %p2304_p8, %p1809_p7 }
  0x23   : > { %p1812_p10 = pneg %p1811_p9 }
  0x25   : > { %p1817_p12 = pnand %p1815_p11, %p1812_p10 }
  0x27   : > { %1820 = shalt.err (!%p1817_p12)
}
  0x28   : > { %s1821_s22 = scalar_lea.vmem %s2281_s18, 256  ;;  %p1829_p4 = scmp.lt.s32.totalorder %s2281_s18, %s2281_s18 }
  0x29   : > { %p1822_p13 = scmp.ne.s32.totalorder %s2281_s18, %s1821_s22  ;;  %p1830_p5 = scmp.lt.s32.totalorder %s1821_s22, %s1821_s22 }
  0x2b   : > { %p1824_p0 = pnand %p1822_p13, %p2304_p8  ;;  %p1831_p7 = por %p1830_p5, %p1829_p4 }
  0x2d   : > { %p1825_p2 = pneg %p1824_p0 }
  0x2f   : > { %p1832_p9 = pnand %p1831_p7, %p1825_p2 }
  0x31   : > { %1835 = shalt.err (!%p1832_p9)
}
  0x32   : > { %s2169_s24 = smov 64   ;;  %s2170_s25 = smov 4  }
  0x33   : > { %1664 = dma.hbm_to_vmem [thread:$0]  (!%p2288_p6), %s2801_s3, 256, %s2281_s18, [#allocation10], %s2169_s24, %s2169_s24, %s2170_s25  }
  0x34   : > { %s2803_s5 = sld [smem:[#allocation33_spill]] }
  0x3a   : > { %s1836_s20 = scalar_lea.hbm %s2803_s5, 256 }
  0x3b   : > { %p1837_p5 = scmp.ne.s32.totalorder %s2803_s5, %s1836_s20  ;;  %p1843_p12 = scmp.lt.u32.totalorder %s1836_s20, %s2803_s5 }
  0x3d   : > { %p1839_p10 = pnand %p1837_p5, %p2304_p8 }
  0x3f   : > { %p1840_p11 = pneg %p1839_p10 }
  0x41   : > { %p1845_p13 = pnand %p1843_p12, %p1840_p11 }
  0x43   : > { %1848 = shalt.err (!%p1845_p13)
}
  0x44   : > { %s1849_s18 = scalar_lea.vmem %s2292_s21, 256  ;;  %p1857_p7 = scmp.lt.s32.totalorder %s2292_s21, %s2292_s21 }
  0x45   : > { %p1850_p0 = scmp.ne.s32.totalorder %s2292_s21, %s1849_s18  ;;  %p1858_p9 = scmp.lt.s32.totalorder %s1849_s18, %s1849_s18 }
  0x47   : > { %p1852_p2 = pnand %p1850_p0, %p2304_p8  ;;  %p1859_p5 = por %p1858_p9, %p1857_p7 }
  0x49   : > { %p1853_p4 = pneg %p1852_p2 }
  0x4b   : > { %p1860_p10 = pnand %p1859_p5, %p1853_p4 }
  0x4d   : > { %1863 = shalt.err (!%p1860_p10)
}
  0x4e   : > { %1670 = dma.hbm_to_vmem [thread:$0]  (!%p2288_p6), %s2803_s5, 256, %s2292_s21, [#allocation13], %s2169_s24, %s2169_s24, %s2170_s25  }
  0x4f   : > { %s2804_s7 = sld [smem:[#allocation34_spill]] }
  0x55   : > { %s1864_s27 = scalar_lea.hbm %s2804_s7, 16 }
  0x56   : > { %p1865_p11 = scmp.ne.s32.totalorder %s2804_s7, %s1864_s27  ;;  %p1871_p0 = scmp.lt.u32.totalorder %s1864_s27, %s2804_s7 }
  0x58   : > { %p1867_p12 = pnand %p1865_p11, %p2304_p8 }
  0x5a   : > { %p1868_p13 = pneg %p1867_p12 }
  0x5c   : > { %p1873_p2 = pnand %p1871_p0, %p1868_p13 }
  0x5e   : > { %1876 = shalt.err (!%p1873_p2)
}
  0x5f   : > { %s1877_s18 = scalar_lea.vmem %s344_s23, 16  ;;  %s1884_s21 = scalar_lea.vmem %s344_s23, 32 }
  0x60   : > { %p1878_p4 = scmp.ne.s32.totalorder %s344_s23, %s1877_s18  ;;  %p1885_p5 = scmp.lt.s32.totalorder %s344_s23, %s344_s23 }
  0x61   : > { %p1886_p10 = scmp.lt.s32.totalorder %s1884_s21, %s1877_s18 }
  0x62   : > { %p1880_p7 = pnand %p1878_p4, %p2304_p8 }
  0x63   : > { %p1887_p1 = por %p1886_p10, %p1885_p5 }
  0x64   : > { %p1881_p9 = pneg %p1880_p7 }
  0x66   : > { %p1888_p3 = pnand %p1887_p1, %p1881_p9 }
  0x68   : > { %1891 = shalt.err (!%p1888_p3)
}
  0x69   : > { %1676 = dma.hbm_to_vmem [thread:$0]  (!%p2288_p6), %s2804_s7, 16, %s344_s23, [#allocation16]  }
  0x6a   : > { %s1481_s9 = sadd.s32 4294967294, %s2164_s14   ;;  %s43_s12 = sadd.s32 1, %s2160_s13 }
  0x6b   : > { %s52_s16 = sadd.s32 1, %s2152_s11  ;;  %p45_p1 = scmp.ge.s32.totalorder %s43_s12, 2 }
  0x6c   : > { %p59_p3 = scmp.ne.s32.totalorder %s2152_s11, %s2148_s10  ;;  %p60_p11 = scmp.eq.s32.totalorder %s2164_s14, 0 }
  0x6d   : > { %p65_p12 = scmp.ne.s32.totalorder %s2148_s10, %s2144_s30  ;;  %s2848_s12 = smov (%p45_p1, %s43_s12), 0 }
  0x6e   : > { %2805 = sst [smem:[#allocation29_spill]] %s2848_s12  ;;  %p2377_p13 = por %p60_p11, %p59_p3 }
  0x6f   : > { %p2807_p0 = scmp.eq.s32.totalorder %s2272_s15, 0  ;;  %s47_s27 = ssub.s32 %s2160_s13, %s2848_s12 }
  0x70   : > { %p269_p4 = scmp.eq.s32.totalorder %s2272_s15, 1  ;;  %p50_p7 = scmp.eq.s32.totalorder %s47_s27, 0 }
  0x71   : > { %p2383_p2 = por %p2807_p0, %p65_p12  ;;  %p275_p9 = scmp.eq.s32.totalorder %s1481_s9, 1 }
  0x72   : > { %p2390_p5 = por %p269_p4, %p59_p3  ;;  %p1700_p10 = scmp.lt.s32.totalorder %s2164_s14, 2 }
  0x73   : > { %s2808_s23 = scalar_select %p2383_p2, 1, 0 }
  0x74   : > { %s2809_s28 = scalar_select %p2390_p5, 1, 0 }
  0x75   : > { %s2396_s17 = scalar_select %p50_p7, %s2152_s11, %s52_s16  }
  0x76   : > { %p2398_p1 = por %p275_p9, %p65_p12  ;;  %s2403_s22 = sand.u32 1, %s2152_s11  }
  0x77   : > { %2810 = sst [smem:[#allocation30_spill]] %s2396_s17  ;;  %s2775_s18 = sshll.u32 %s2403_s22, 3 }
  0x78   : > { %s2811_s20 = scalar_select %p2398_p1, 1, 0 }
  0x79   : > { %s2776_s21 = sshll.u32 %s2160_s13, 7  ;;  %p2409_p11 = pnand %p1700_p10, %p2377_p13 }
  0x7a   : > { %s384_s25 = sand.u32 1, %s2164_s14   ;;  %s2813_s1 = sld [smem:[#allocation31_spill]] }
  0x7b   : > { %s2812_s24 = scalar_select %p2409_p11, 1, 0 }
  0x7c   : > { %s388_s3 = scalar_lea.vmem [#allocation6], %s2775_s18  ;;  %s2171_s26 = smov [#allocation11]  }
  0x7d   : > { %s395_s5 = sshll.u32 %s388_s3, 4  ;;  %s2425_s7 = sshll.u32 %s2171_s26, 4  ;;  %s2423_s5 = int_to_ptr.vmem [resolvable:$true] %s395_s5  ;;  %s309_s7 = int_to_ptr.vmem [resolvable:$true] %s2425_s7 }
  0x7e   : > { %s2427_s12 = scalar_lea.sflag [#allocation7], %s384_s25  ;;  %p2433_p12 = pneg %p2409_p11 }
  0x80   : > { %s2419_s27 = scalar_lea.hbm %s2813_s1, %s2776_s21  ;;  %s1897_s18 = scalar_lea.hbm %s2813_s1, 256 }
  0x81   : > { %s1892_s17 = scalar_lea.hbm %s2419_s27, 128  ;;  %p1898_p4 = scmp.lt.u32.totalorder %s2419_s27, %s2813_s1 }
  0x82   : > { %p1893_p3 = scmp.ne.s32.totalorder %s2419_s27, %s1892_s17  ;;  %p1899_p7 = scmp.lt.u32.totalorder %s1897_s18, %s1892_s17 }
  0x83   : > { %s2814_s9 = scalar_select %p2433_p12, 1, 0 }
  0x84   : > { %p1895_p13 = pnand %p2433_p12, %p1893_p3  ;;  %p1900_p9 = por %p1899_p7, %p1898_p4 }
  0x85   : > { %p1901_p10 = scmp.lt.u32.totalorder %s1892_s17, %s2419_s27 }
  0x86   : > { %p1896_p0 = pneg %p1895_p13 }
  0x87   : > { %p1902_p1 = por %p1901_p10, %p1900_p9 }
  0x89   : > { %p1903_p5 = pnand %p1902_p1, %p1896_p0 }
  0x8b   : > { %1906 = shalt.err (!%p1903_p5)
}
  0x8c   : > { %s1907_s25 = scalar_lea.vmem %s2423_s5, 128  ;;  %s2172_s16 = smov [#allocation6]  }
  0x8d   : > { %p1908_p3 = scmp.ne.s32.totalorder %s2423_s5, %s1907_s25  ;;  %s1912_s3 = sshll.u32 %s2172_s16, 4  ;;  %s1913_s3 = int_to_ptr.vmem [resolvable:$false] %s1912_s3 }
  0x8e   : > { %s1914_s21 = scalar_lea.vmem %s1913_s3, 256  ;;  %p1915_p6 = scmp.lt.s32.totalorder %s2423_s5, %s1913_s3 }
  0x8f   : > { %p1910_p13 = pnand %p1908_p3, %p2433_p12  ;;  %p1916_p8 = scmp.lt.s32.totalorder %s1914_s21, %s1907_s25 }
  0x91   : > { %p1911_p2 = pneg %p1910_p13  ;;  %p1917_p4 = por %p1916_p8, %p1915_p6 }
  0x93   : > { %p1918_p7 = pnand %p1917_p4, %p1911_p2 }
  0x95   : > { %1921 = shalt.err (!%p1918_p7)
}
  0x96   : > { %1686 = dma.hbm_to_vmem [thread:$0]  (!%p2409_p11), %s2419_s27, 128, %s2423_s5, %s2427_s12  }
  0x97   : > { %s1922_s26 = scalar_lea.hbm %s2764_s4, 16  ;;  %p2815_p6 = scmp.ne.s32.totalorder %s2802_s29, 0 }
  0x98   : > { %p1923_p5 = scmp.ne.s32.totalorder %s2764_s4, %s1922_s26  ;;  %p1929_p1 = scmp.lt.u32.totalorder %s1922_s26, %s2764_s4 }
  0x9a   : > { %p1925_p8 = pnand %p1923_p5, %p2815_p6 }
  0x9c   : > { %p1926_p2 = pneg %p1925_p8 }
  0x9e   : > { %p1931_p0 = pnand %p1929_p1, %p1926_p2 }
  0xa0   : > { %1934 = shalt.err (!%p1931_p0)
}
  0xa1   : > { %s1935_s21 = scalar_lea.vmem %s309_s7, 16  ;;  %s1942_s5 = scalar_lea.vmem %s309_s7, 32 }
  0xa2   : > { %p1936_p9 = scmp.ne.s32.totalorder %s309_s7, %s1935_s21  ;;  %p1943_p13 = scmp.lt.s32.totalorder %s309_s7, %s309_s7 }
  0xa3   : > { %p1944_p4 = scmp.lt.s32.totalorder %s1942_s5, %s1935_s21 }
  0xa4   : > { %p1938_p10 = pnand %p1936_p9, %p2815_p6 }
  0xa5   : > { %p1945_p7 = por %p1944_p4, %p1943_p13 }
  0xa6   : > { %p1939_p3 = pneg %p1938_p10 }
  0xa8   : > { %p1946_p11 = pnand %p1945_p7, %p1939_p3 }
  0xaa   : > { %1949 = shalt.err (!%p1946_p11)
}
  0xab   : > { %p2816_p5 = scmp.ne.s32.totalorder %s2800_s19, 0  ;;  %s2173_s17 = smov [#allocation14]  }
  0xac   : > { %s332_s18 = sshll.u32 %s2173_s17, 4  ;;  %s2174_s26 = smov [#allocation17]   ;;  %s333_s18 = int_to_ptr.vmem [resolvable:$true] %s332_s18 }
  0xad   : > { %1667 = dma.hbm_to_vmem [thread:$0]  (!%p2816_p5), %s2764_s4, 16, %s309_s7, [#allocation10]  }
  0xae   : > { %s354_s16 = sshll.u32 %s2174_s26, 4  ;;  %s1950_s11 = scalar_lea.hbm %s2766_s6, 16  ;;  %s355_s16 = int_to_ptr.vmem [resolvable:$true] %s354_s16 }
  0xaf   : > { %p1951_p11 = scmp.ne.s32.totalorder %s2766_s6, %s1950_s11  ;;  %p1957_p1 = scmp.lt.u32.totalorder %s1950_s11, %s2766_s6 }
  0xb1   : > { %p1953_p8 = pnand %p1951_p11, %p2815_p6 }
  0xb3   : > { %p1954_p2 = pneg %p1953_p8 }
  0xb5   : > { %p1959_p0 = pnand %p1957_p1, %p1954_p2 }
  0xb7   : > { %1962 = shalt.err (!%p1959_p0)
}
  0xb8   : > { %s1963_s7 = scalar_lea.vmem %s333_s18, 16  ;;  %s1970_s27 = scalar_lea.vmem %s333_s18, 32 }
  0xb9   : > { %p1964_p9 = scmp.ne.s32.totalorder %s333_s18, %s1963_s7  ;;  %p1971_p13 = scmp.lt.s32.totalorder %s333_s18, %s333_s18 }
  0xba   : > { %p1972_p4 = scmp.lt.s32.totalorder %s1970_s27, %s1963_s7 }
  0xbb   : > { %p1966_p10 = pnand %p1964_p9, %p2815_p6 }
  0xbc   : > { %p1973_p7 = por %p1972_p4, %p1971_p13 }
  0xbd   : > { %p1967_p3 = pneg %p1966_p10 }
  0xbf   : > { %p1974_p12 = pnand %p1973_p7, %p1967_p3 }
  0xc1   : > { %1977 = shalt.err (!%p1974_p12)
}
  0xc2   : > { %1673 = dma.hbm_to_vmem [thread:$0]  (!%p2816_p5), %s2766_s6, 16, %s333_s18, [#allocation13]  }
  0xc3   : > { %s1978_s25 = scalar_lea.hbm %s2768_s8, 16 }
  0xc4   : > { %p1979_p11 = scmp.ne.s32.totalorder %s2768_s8, %s1978_s25  ;;  %p1985_p12 = scmp.lt.u32.totalorder %s1978_s25, %s2768_s8 }
  0xc6   : > { %p1981_p8 = pnand %p1979_p11, %p2815_p6 }
  0xc8   : > { %p1982_p2 = pneg %p1981_p8 }
  0xca   : > { %p1987_p1 = pnand %p1985_p12, %p1982_p2 }
  0xcc   : > { %1990 = shalt.err (!%p1987_p1)
}
  0xcd   : > { %s1991_s7 = scalar_lea.vmem %s355_s16, 16  ;;  %s1998_s18 = scalar_lea.vmem %s355_s16, 32 }
  0xce   : > { %p1992_p0 = scmp.ne.s32.totalorder %s355_s16, %s1991_s7  ;;  %p1999_p3 = scmp.lt.s32.totalorder %s355_s16, %s355_s16 }
  0xcf   : > { %p2000_p13 = scmp.lt.s32.totalorder %s1998_s18, %s1991_s7 }
  0xd0   : > { %p1994_p9 = pnand %p1992_p0, %p2815_p6 }
  0xd1   : > { %p2001_p4 = por %p2000_p13, %p1999_p3 }
  0xd2   : > { %p1995_p10 = pneg %p1994_p9 }
  0xd4   : > { %p2002_p7 = pnand %p2001_p4, %p1995_p10 }
  0xd6   : > { %2005 = shalt.err (!%p2002_p7)
}
  0xd7   : > { %1679 = dma.hbm_to_vmem [thread:$0]  (!%p2816_p5), %s2768_s8, 16, %s355_s16, [#allocation16]  }
  0xd8   : > { %s2817_s29 = sshll.u32 %s2160_s13, 7  ;;  %s2818_s25 = sshll.u32 %s2403_s22, 3 }
  0xd9   : > { %s2517_s14 = scalar_lea.hbm %s2760_s0, %s2817_s29  ;;  %s369_s19 = scalar_lea.vmem [#allocation3], %s2818_s25 }
  0xda   : > { %s377_s3 = sshll.u32 %s369_s19, 4  ;;  %s1494_s21 = sshll.u32 %s2160_s13, 4  ;;  %s2521_s3 = int_to_ptr.vmem [resolvable:$true] %s377_s3 }
  0xdb   : > { %s366_s5 = scalar_lea.sflag [#allocation4], %s2403_s22  ;;  %s2006_s1 = scalar_lea.hbm %s2517_s14, 128 }
  0xdc   : > { %p2007_p6 = scmp.ne.s32.totalorder %s2517_s14, %s2006_s1  ;;  %p2819_p5 = scmp.ne.s32.totalorder %s2814_s9, 0 }
  0xdd   : > { %s2011_s18 = scalar_lea.hbm %s2760_s0, 256  ;;  %p2012_p2 = scmp.lt.u32.totalorder %s2517_s14, %s2760_s0 }
  0xde   : > { %p2009_p11 = pnand %p2007_p6, %p2819_p5  ;;  %p2013_p12 = scmp.lt.u32.totalorder %s2011_s18, %s2006_s1 }
  0xdf   : > { %p2015_p0 = scmp.lt.u32.totalorder %s2006_s1, %s2517_s14 }
  0xe0   : > { %p2010_p8 = pneg %p2009_p11  ;;  %p2014_p1 = por %p2013_p12, %p2012_p2 }
  0xe2   : > { %p2016_p9 = por %p2015_p0, %p2014_p1 }
  0xe4   : > { %p2017_p10 = pnand %p2016_p9, %p2010_p8 }
  0xe6   : > { %2020 = shalt.err (!%p2017_p10)
}
  0xe7   : > { %s2021_s29 = scalar_lea.vmem %s2521_s3, 128  ;;  %s2175_s26 = smov [#allocation3]  }
  0xe8   : > { %p2022_p3 = scmp.ne.s32.totalorder %s2521_s3, %s2021_s29  ;;  %s2026_s11 = sshll.u32 %s2175_s26, 4  ;;  %s2027_s11 = int_to_ptr.vmem [resolvable:$false] %s2026_s11 }
  0xe9   : > { %s2028_s25 = scalar_lea.vmem %s2027_s11, 256  ;;  %p2029_p7 = scmp.lt.s32.totalorder %s2521_s3, %s2027_s11 }
  0xea   : > { %p2024_p13 = pnand %p2022_p3, %p2819_p5  ;;  %p2030_p6 = scmp.lt.s32.totalorder %s2028_s25, %s2021_s29 }
  0xec   : > { %p2025_p4 = pneg %p2024_p13  ;;  %p2031_p11 = por %p2030_p6, %p2029_p7 }
  0xee   : > { %p2032_p2 = pnand %p2031_p11, %p2025_p4 }
  0xf0   : > { %2035 = shalt.err (!%p2032_p2)
}
  0xf1   : > { %p2820_p8 = scmp.ne.s32.totalorder %s2812_s24, 0  ;;  %s2551_s16 = scalar_lea.hbm %s2762_s2, %s1494_s21 }
  0xf2   : > { %s405_s7 = scalar_lea.vmem [#allocation8], %s2403_s22  ;;  %s2036_s27 = scalar_lea.hbm %s2551_s16, 16 }
  0xf3   : > { %1683 = dma.hbm_to_vmem [thread:$0]  (!%p2820_p8), %s2517_s14, 128, %s2521_s3, %s366_s5  }
  0xf4   : > { %s412_s18 = sshll.u32 %s405_s7, 4  ;;  %p2037_p12 = scmp.ne.s32.totalorder %s2551_s16, %s2036_s27  ;;  %s413_s18 = int_to_ptr.vmem [resolvable:$true] %s412_s18 }
  0xf5   : > { %s2041_s3 = scalar_lea.hbm %s2762_s2, 32  ;;  %p2042_p9 = scmp.lt.u32.totalorder %s2551_s16, %s2762_s2 }
  0xf6   : > { %p2039_p1 = pnand %p2037_p12, %p2819_p5  ;;  %p2043_p10 = scmp.lt.u32.totalorder %s2041_s3, %s2036_s27 }
  0xf7   : > { %p2045_p13 = scmp.lt.u32.totalorder %s2036_s27, %s2551_s16 }
  0xf8   : > { %p2040_p0 = pneg %p2039_p1  ;;  %p2044_p3 = por %p2043_p10, %p2042_p9 }
  0xfa   : > { %p2046_p4 = por %p2045_p13, %p2044_p3 }
  0xfc   : > { %p2047_p7 = pnand %p2046_p4, %p2040_p0 }
  0xfe   : > { %2050 = shalt.err (!%p2047_p7)
}
  0xff   : > { %s2051_s22 = scalar_lea.vmem %s413_s18, 16  ;;  %s2176_s21 = smov [#allocation8]  }
 0x100   : > { %p2052_p6 = scmp.ne.s32.totalorder %s413_s18, %s2051_s22  ;;  %s2056_s26 = sshll.u32 %s2176_s21, 4  ;;  %s2057_s26 = int_to_ptr.vmem [resolvable:$false] %s2056_s26 }
 0x101   : > { %s2058_s11 = scalar_lea.vmem %s2057_s26, 32  ;;  %p2059_p12 = scmp.lt.s32.totalorder %s413_s18, %s2057_s26 }
 0x102   : > { %p2054_p11 = pnand %p2052_p6, %p2819_p5  ;;  %p2060_p1 = scmp.lt.s32.totalorder %s2058_s11, %s2051_s22 }
 0x104   : > { %p2055_p2 = pneg %p2054_p11  ;;  %p2061_p8 = por %p2060_p1, %p2059_p12 }
 0x106   : > { %p2062_p9 = pnand %p2061_p8, %p2055_p2 }
 0x108   : > { %2065 = shalt.err (!%p2062_p9)
}
 0x109   : > { %p2821_p10 = scmp.ne.s32.totalorder %s2812_s24, 0  ;;  %s2822_s25 = sld [smem:[#allocation28_spill]] }
 0x10b   : > { %1689 = dma.hbm_to_vmem [thread:$0]  (!%p2821_p10), %s2551_s16, 16, %s413_s18, %s2427_s12  }
 0x10f   : > { %p2823_p0 = scmp.ne.s32.totalorder %s2822_s25, 0 }
 0x110   : > { %s2575_s9 = sand.u32 (!%p2823_p0), 1, %s2148_s10   ;;  %p2824_p5 = scmp.ne.s32.totalorder (!%p2823_p0), %s2808_s23, 0 }
 0x111   : > { %421 = sbr.rel (%p2823_p0) target bundleno = 2088 (0x828), region = 56  ;;  %s2578_s19 = sshll.u32 (!%p2823_p0), %s2575_s9, 3 }
 0x112   : > { %s424_s1 = scalar_lea.sflag (!%p2823_p0), [#allocation4], %s2575_s9  ;;  %s427_s7 = scalar_lea.vmem (!%p2823_p0), [#allocation3], %s2578_s19 }
 0x118   : > { %2119 = dma.done.wait (%p2824_p5), %s424_s1, 128  }
 0x119   : > { %2121 = vsyncadd (%p2824_p5), %s424_s1, 4294967168  ;;  %s432_s12 = sand.u32 1, %s2272_s15   ;;  %s436_s16 = scalar_lea.vmem [#allocation6], %s2578_s19 }
 0x11a   : > { %s433_s24 = scalar_lea.sflag [#allocation7], %s432_s12 }
 0x11b   : > { %2123 = dma.done.wait (%p2824_p5), %s433_s24, 144  }
 0x11c   : > { %2125 = vsyncadd (%p2824_p5), %s433_s24, 4294967152  ;;  %s444_s18 = scalar_lea.vmem [#allocation8], %s2575_s9  ;;  %p2825_p8 = scmp.eq.s32.totalorder %s2272_s15, 0 }
 0x11e   : > { %2127 = dma.done.wait (%p2825_p8), [#allocation10], 272   ;;  %p2826_p3 = pmov %p2825_p8 }
 0x120   : > { %2129 = vsyncadd (%p2826_p3), [#allocation10], 4294967024  ;;  %p2827_p13 = pmov %p2826_p3 }
 0x121   : > { %p2828_p4 = pmov %p2826_p3 }
 0x122   : > { %2131 = dma.done.wait (%p2827_p13), [#allocation13], 272  }
 0x123   : > { %2133 = vsyncadd (%p2828_p4), [#allocation13], 4294967024  ;;  %p2829_p7 = pmov %p2826_p3 }
 0x124   : > { %p2830_p6 = pmov %p2826_p3 }
 0x125   : > { %2135 = dma.done.wait (%p2829_p7), [#allocation16], 32  }
 0x126   : > { %2137 = vsyncadd (%p2830_p6), [#allocation16], 4294967264  ;;  %vm521_vm0 = vcmask 261120   ;;  %v520_v0 = vld [vmem:[%s436_s16] sm:$0xff]  ;;  %v2605_v1 = vld [vmem:[%s427_s7] sm:$0xff]  ;;  %s2177_s23 = smov 96  }
 0x127   : > { %v522_v2 = vsel %vm521_vm0, %v520_v0, 0.0  ;;  %v634_v3 = vsel %vm521_vm0, %v2605_v1, 0.0  ;;  %v1777_v4 = vld [vmem:[#allocation9] sm:$0xff]   ;;  %v1778_v15 = vld [vmem:[#allocation9 + $0x8] sm:$0xff]   ;;  %v2178_v18 = vmov 0.0   ;;  %vm2179_vm1 = vmmov 0  }
 0x128   : > { %523 = vadd.xlane.f32.xlu0 %v522_v2  ;;  %v1779_v17 = vld [vmem:[#allocation9] sm:$0xff]   ;;  %1557 = vmatprep.subr.bf16.mxu0 %v2178_v18  ;;  %v1780_v19 = vld [vmem:[#allocation9 + $0x8] sm:$0xff]   ;;  %v1505_v20 = vld [vmem:[#allocation11] ss:$0 sm:$0xff]  ;;  %vm631_vm6 = vcmask 519168   ;;  %s2180_s15 = smov 120  }
 0x129   : > { %1565 = vmatprep.subr.bf16.mxu1 %v2178_v18  ;;  %1561 = vmatprep.mubr.msk.bf16.mxu0 %vm2179_vm1, %v2178_v18  ;;  %v1530_v38 = vld [vmem:[#allocation15] ss:$0 sm:$0xff]  ;;  %v1531_v41 = vld [vmem:[#allocation17] ss:$0 sm:$0xff]  ;;  %vm755_vm7 = vcmask 64512   ;;  %s2181_s27 = smov 112  }
 0x12a   : > { %1566 = vmatpush3.bf16.msra.mxu1 %v1779_v17  ;;  %1569 = vmatprep.mubr.msk.bf16.mxu1 %vm2179_vm1, %v2178_v18  ;;  %s2182_s17 = smov 104   ;;  %s2184_s14 = smov 80   ;;  %vm823_vm12 = vcmask 1043456   ;;  %vm1214_vm13 = vcmask 130048   ;;  %vm1216_vm14 = vcmask 195584  }
 0x12b   : > { %1567 = vmatprep.subr.bf16.mxu1 %v2178_v18  ;;  %s2185_s3 = smov 72   ;;  %s2186_s5 = smov 88  }
 0x12c   : > { %635 = vadd.xlane.f32.xlu0 %v634_v3  ;;  %s2187_s29 = smov 8   ;;  %s2188_s22 = smov 16  }
 0x12d   : > { %s2189_s21 = smov 24   ;;  %s2833_s26 = sld [smem:[#allocation26_spill]] }
 0x12e   : > { %1568 = vmatpush3.bf16.msra.mxu1 %v1780_v19  ;;  %s511_s25 = scalar_lea.vmem [#allocation18], %s2578_s19  ;;  %s2834_s24 = sld [smem:[#allocation35_spill]] }
 0x12f   : > { %1579 = vmatprep.subr.bf16.mxu1 %v2178_v18  ;;  %s1303_s1 = sshll.u32 %s511_s25, 4  ;;  %s1289_s19 = scalar_lea.sflag [#allocation5], %s2575_s9  ;;  %s2712_s1 = int_to_ptr.vmem [resolvable:$true] %s1303_s1 }
 0x130   : > { %p2835_p2 = scmp.ne.s32.totalorder %s2809_s28, 0 }
 0x133   : > { %s1527_s11 = sshll.u32 %s2833_s26, 7 }
 0x134   : > { %s2710_s16 = scalar_lea.hbm %s2834_s24, %s1527_s11 }
 0x142   : > { %578 = vrot.lane.b32.xlu0 %v1777_v4, %s2177_s23 }
 0x1b5   : > { %v524_v5 = vpop.xlane.xlu0 %523 }
 0x1b6   : > { %v526_v6 = vmul.f32 0.03125, %v524_v5 }
 0x1b8   : > { %v527_v7 = vsub.f32 %v520_v0, %v526_v6 }
 0x1b9   : > { %v636_v8 = vpop.xlane.xlu0 %635 }
 0x1ba   : > { %v638_v9 = vmul.f32 0.03125, %v636_v8  ;;  %v528_v10 = vmul.f32 %v527_v7, %v527_v7 }
 0x1bc   : > { %v639_v11 = vsub.f32 %v2605_v1, %v638_v9  ;;  %v529_v12 = vsel %vm521_vm0, %v528_v10, 0.0 }
 0x1bd   : > { %530 = vadd.xlane.f32.xlu1 %v529_v12  ;;  %v579_v16 = vpop.permute.xlu0 %578  ;;  %v543_v12 = vlaneseq }
 0x1be   : > { %v640_v13 = vmul.f32 %v639_v11, %v639_v11  ;;  %1558 = vmatpush3.bf16.msra.mxu0 %v579_v16  ;;  %v2183_v16 = vmov 0  }
 0x1bf   : > { %1559 = vmatprep.subr.bf16.mxu0 %v2178_v18  ;;  %v743_v19 = vand.u32 127, %v543_v12 }
 0x1c0   : > { %v641_v14 = vsel %vm521_vm0, %v640_v13, 0.0  ;;  %v745_v13 = vld [vmem:[%s444_s18] sm:$0x1]  ;;  %s2066_s18 = scalar_lea.vmem %s2712_s1, 128 }
 0x1c1   : > { %642 = vadd.xlane.f32.xlu1 %v641_v14  ;;  %v544_v14 = vshrl.u32 %v543_v12, 7  ;;  %vm746_vm8 = vcmp.ne.s32.totalorder %v745_v13, 0  ;;  %p2067_p11 = scmp.ne.s32.totalorder %s2712_s1, %s2066_s18 }
 0x1c2   : > { %v747_v17 = vsel %vm746_vm8, 1, %v2183_v16 }
 0x1c3   : > { %vm744_vm9 = vcmp.ge.s32.totalorder %v544_v14, %v743_v19  ;;  %p2068_p12 = pnand %p2067_p11, %p2835_p2 }
 0x1c5   : > { %p2069_p1 = pneg %p2068_p12 }
 0x1d2   : > { %580 = vrot.lane.b32.xlu1 %v1778_v15, %s2177_s23  ;;  %v545_v15 = vsub.s32 0, %v544_v14 }
 0x1d6   : > { %584 = vrot.lane.b32.xlu1 %v1505_v20, %s2177_s23 }
 0x24a   : > { %v531_v21 = vpop.xlane.xlu1 %530 }
 0x24b   : > { %v532_v22 = vmul.f32 0.032258064, %v531_v21 }
 0x24d   : > { %1784 = vrsqrt.f32 %v532_v22  ;;  %vm535_vm2 = vcmp.eq.f32.partialorder %v532_v22, inf  ;;  %v538_v28 = vand.u32 2147483648, %v532_v22  ;;  %vm537_vm3 = vcmp.eq.f32.partialorder %v532_v22, 0.0 }
 0x24e   : > { %v643_v23 = vpop.xlane.xlu1 %642 }
 0x24f   : > { %v644_v24 = vmul.f32 0.032258064, %v643_v23 }
 0x251   : > { %1786 = vrsqrt.f32 %v644_v24  ;;  %vm647_vm4 = vcmp.eq.f32.partialorder %v644_v24, inf  ;;  %v650_v32 = vand.u32 2147483648, %v644_v24  ;;  %vm649_vm5 = vcmp.eq.f32.partialorder %v644_v24, 0.0 }
 0x252   : > { %v581_v25 = vpop.permute.xlu1 %580 }
 0x253   : > { %1560 = vmatpush3.bf16.msra.mxu0 %v581_v25 }
 0x254   : > { %1573 = vmatprep.subr.bf16.mxu0 %v2178_v18 }
 0x256   : > { %v585_v50 = vpop.permute.xlu1 %584 }
 0x257   : > { %v1785_v26 = vpop.eup %1784 }
 0x258   : > { %v534_v27 = vmul.f32 %v1785_v26, %v532_v22 }
 0x25a   : > { %v536_v29 = vsel %vm535_vm2, %v532_v22, %v534_v27 }
 0x25b   : > { %v1787_v30 = vpop.eup %1786  ;;  %v539_v31 = vsel %vm537_vm3, %v538_v28, %v536_v29 }
 0x25c   : > { %v540_v33 = vadd.f32 1e-06, %v539_v31  ;;  %v646_v34 = vmul.f32 %v1787_v30, %v644_v24 }
 0x25e   : > { %1788 = vrcp.f32 %v540_v33  ;;  %v648_v35 = vsel %vm647_vm4, %v644_v24, %v646_v34 }
 0x25f   : > { %v651_v36 = vsel %vm649_vm5, %v650_v32, %v648_v35 }
 0x260   : > { %v652_v37 = vadd.f32 1e-06, %v651_v36 }
 0x262   : > { %1790 = vrcp.f32 %v652_v37 }
 0x268   : > { %v1789_v39 = vpop.eup %1788 }
 0x269   : > { %v548_v40 = vmul.f32 %v1789_v39, %v1530_v38 }
 0x26b   : > { %v549_v42 = vmul.f32 %v548_v40, %v527_v7 }
 0x26c   : > { %v1791_v43 = vpop.eup %1790 }
 0x26d   : > { %v556_v44 = vadd.f32 %v1531_v41, %v549_v42  ;;  %v660_v45 = vmul.f32 %v1791_v43, %v1530_v38 }
 0x26f   : > { %v557_v46 = vpack.c.bf16 %v556_v44, %v556_v44  ;;  %v661_v47 = vmul.f32 %v660_v45, %v639_v11 }
 0x271   : > { %1562 = vmatmul.mubr.msk.bf16.vlgmr.msra.gmra.mrb[0].mxu0 %vm521_vm0, %v557_v46  ;;  %v668_v48 = vadd.f32 %v1531_v41, %v661_v47 }
 0x272   : > { %1575 = vmatprep.mubr.msk.bf16.mxu0 %vm2179_vm1, %v2178_v18 }
 0x273   : > { %v669_v49 = vpack.c.bf16 %v668_v48, %v668_v48 }
 0x275   : > { %1570 = vmatmul.mubr.msk.bf16.vlgmr.msra.gmra.mrb[0].mxu1 %vm521_vm0, %v669_v49 }
 0x276   : > { %1581 = vmatprep.mubr.msk.bf16.mxu1 %vm2179_vm1, %v2178_v18 }
 0x344   : > { %v624_v51 = vpop.f32.mrb[0].mxu0 }
 0x345   : > { %v625_v52 = vadd.f32 %v624_v51, %v585_v50  ;;  %v1563_v53 = vpop.f32.mrb[1].mxu0 }
 0x346   : > { %v627_v54 = vpop.f32.mrb[2].mxu0 }
 0x347   : > { %v630_v55 = vpack.c.bf16 %v625_v52, %v625_v52  ;;  %v1564_v56 = vpop.f32.mrb[3].mxu0 }
 0x348   : > { %v730_v57 = vpop.f32.mrb[0].mxu1 }
 0x349   : > { %632 = vst.msk [vmem:[#allocation2] sm:$0xf] %vm631_vm6, %v630_v55  ;;  %v731_v58 = vadd.f32 %v1505_v20, %v730_v57  ;;  %v1571_v59 = vpop.f32.mrb[1].mxu1  ;;  %v751_v20 = vrot.slane %v747_v17, %v545_v15 }
 0x34a   : > { %v733_v60 = vpop.f32.mrb[2].mxu1 }
 0x34b   : > { %v736_v61 = vpack.c.bf16 %v731_v58, %v731_v58  ;;  %v1572_v62 = vpop.f32.mrb[3].mxu1  ;;  %vm752_vm10 = vcmp.eq.s32.totalorder %v751_v20, 1 }
 0x34c   : > { %vm2659_vm11 = vmand %vm744_vm9, %vm752_vm10 }
 0x34d   : > { %868 = vrot.lane.b32.xlu0 %v736_v61, %s2180_s15 }
 0x350   : > { %v754_v63 = vld [vmem:[#allocation2] sm:$0xf] }
 0x351   : > { %979 = vrot.lane.b32.xlu0 %v736_v61, %s2181_s27  ;;  %v760_v0 = vsel %vm755_vm7, %v754_v63, 0  ;;  %v2633_v2 = vcombine.low %v754_v63, %v754_v63 }
 0x352   : > { %1574 = vmatpush3.bf16.xpose.msra.mxu0 %v760_v0 }
 0x353   : > { %870 = vrot.lane.b32.xlu1 %v2633_v2, %s2180_s15  ;;  %1585 = vmatprep.subr.bf16.mxu0 %v2178_v18 }
 0x355   : > { %1090 = vrot.lane.b32.xlu0 %v736_v61, %s2182_s17 }
 0x357   : > { %981 = vrot.lane.b32.xlu1 %v2633_v2, %s2181_s27 }
 0x359   : > { %1576 = vmatmul.mubr.msk.bf16.vlgmr.msra.gmra.mrb[4].mxu0 %vm755_vm7, %v736_v61 }
 0x35a   : > { %1587 = vmatprep.mubr.msk.bf16.mxu0 %vm2179_vm1, %v2178_v18 }
 0x35b   : > { %1092 = vrot.lane.b32.xlu1 %v2633_v2, %s2182_s17 }
 0x3bf   : > { %v869_v6 = vpop.permute.xlu0 %868 }
 0x3c3   : > { %v980_v9 = vpop.permute.xlu0 %979 }
 0x3c5   : > { %v871_v3 = vpop.permute.xlu1 %870 }
 0x3c6   : > { %v876_v4 = vsel %vm755_vm7, %v871_v3, 0 }
 0x3c7   : > { %1586 = vmatpush3.bf16.xpose.msra.mxu0 %v876_v4  ;;  %v1091_v11 = vpop.permute.xlu0 %1090 }
 0x3c8   : > { %1597 = vmatprep.subr.bf16.mxu0 %v2178_v18 }
 0x3c9   : > { %v982_v5 = vpop.permute.xlu1 %981 }
 0x3ca   : > { %v987_v7 = vsel %vm755_vm7, %v982_v5, 0 }
 0x3cd   : > { %v1093_v8 = vpop.permute.xlu1 %1092 }
 0x3ce   : > { %1588 = vmatmul.mubr.msk.bf16.vlgmr.msra.gmra.mrb[8].mxu0 %vm755_vm7, %v869_v6  ;;  %v1098_v10 = vsel %vm755_vm7, %v1093_v8, 0 }
 0x3cf   : > { %1598 = vmatpush3.bf16.xpose.msra.mxu0 %v987_v7  ;;  %1599 = vmatprep.mubr.msk.bf16.mxu0 %vm2179_vm1, %v2178_v18 }
 0x3d0   : > { %1609 = vmatprep.subr.bf16.mxu0 %v2178_v18 }
 0x3d6   : > { %1600 = vmatmul.mubr.msk.bf16.vlgmr.msra.gmra.mrb[12].mxu0 %vm755_vm7, %v980_v9 }
 0x3d7   : > { %1610 = vmatpush3.bf16.xpose.msra.mxu0 %v1098_v10  ;;  %1611 = vmatprep.mubr.msk.bf16.mxu0 %vm2179_vm1, %v2178_v18 }
 0x3d8   : > { %1621 = vmatprep.subr.bf16.mxu0 %v2178_v18 }
 0x3de   : > { %1612 = vmatmul.mubr.msk.bf16.vlgmr.msra.gmra.mrb[16].mxu0 %vm755_vm7, %v1091_v11 }
 0x3df   : > { %1625 = vmatprep.mubr.msk.bf16.mxu0 %vm2179_vm1, %v2178_v18 }
 0x42c   : > { %v796_v22 = vpop.f32.mrb[4].mxu0 }
 0x42d   : > { %v802_v23 = vsel %vm2659_vm11, %v796_v22, -1e+30  ;;  %v1577_v24 = vpop.f32.mrb[5].mxu0 }
 0x42e   : > { %v799_v25 = vpop.f32.mrb[6].mxu0  ;;  %v803_v26 = vsel %vm755_vm7, %v802_v23, -inf }
 0x42f   : > { %804 = vmax.xlane.f32.xlu1 %v803_v26  ;;  %v1578_v27 = vpop.f32.mrb[7].mxu0 }
 0x4a1   : > { %v912_v28 = vpop.f32.mrb[8].mxu0 }
 0x4a2   : > { %v918_v29 = vsel %vm2659_vm11, %v912_v28, -1e+30  ;;  %v1589_v30 = vpop.f32.mrb[9].mxu0 }
 0x4a3   : > { %v915_v31 = vpop.f32.mrb[10].mxu0  ;;  %v919_v32 = vsel %vm755_vm7, %v918_v29, -inf }
 0x4a4   : > { %920 = vmax.xlane.f32.xlu0 %v919_v32  ;;  %v1590_v33 = vpop.f32.mrb[11].mxu0  ;;  %v1782_v32 = vld [vmem:[#allocation12] sm:$0xff]  }
 0x4a5   : > { %1622 = vmatpush3.bf16.msra.mxu0 %v1782_v32 }
 0x4a6   : > { %1623 = vmatprep.subr.bf16.mxu0 %v2178_v18 }
 0x4a9   : > { %v1023_v34 = vpop.f32.mrb[12].mxu0 }
 0x4aa   : > { %v1029_v35 = vsel %vm2659_vm11, %v1023_v34, -1e+30  ;;  %v1601_v36 = vpop.f32.mrb[13].mxu0 }
 0x4ab   : > { %v1026_v37 = vpop.f32.mrb[14].mxu0  ;;  %v1030_v38 = vsel %vm755_vm7, %v1029_v35, -inf }
 0x4ac   : > { %1031 = vmax.xlane.f32.xlu0 %v1030_v38  ;;  %v1602_v39 = vpop.f32.mrb[15].mxu0  ;;  %v1783_v37 = vld [vmem:[#allocation12 + $0x8] sm:$0xff]  }
 0x4ad   : > { %1624 = vmatpush3.bf16.msra.mxu0 %v1783_v37 }
 0x4b1   : > { %v1134_v40 = vpop.f32.mrb[16].mxu0 }
 0x4b2   : > { %v1140_v41 = vsel %vm2659_vm11, %v1134_v40, -1e+30  ;;  %v1613_v42 = vpop.f32.mrb[17].mxu0 }
 0x4b3   : > { %v1137_v43 = vpop.f32.mrb[18].mxu0  ;;  %v1141_v44 = vsel %vm755_vm7, %v1140_v41, -inf }
 0x4b4   : > { %1142 = vmax.xlane.f32.xlu0 %v1141_v44  ;;  %v1614_v45 = vpop.f32.mrb[19].mxu0 }
 0x4bc   : > { %v805_v46 = vpop.xlane.xlu1 %804 }
 0x4bd   : > { %v806_v47 = vsub.f32 %v802_v23, %v805_v46 }
 0x4bf   : > { %v807_v48 = vmul.f32 1.442695, %v806_v47 }
 0x4c1   : > { %1792 = vpow2.f32 %v807_v48 }
 0x4cb   : > { %v1793_v49 = vpop.eup %1792 }
 0x4cc   : > { %v809_v50 = vsel %vm755_vm7, %v1793_v49, 0.0 }
 0x4cd   : > { %810 = vadd.xlane.f32.xlu1 %v809_v50 }
 0x4de   : > { %818 = vrot.lane.b32.xlu1 %v2633_v2, %s2177_s23  ;;  %s2190_s23 = smov [#allocation18]  }
 0x4df   : > { %s2070_s15 = sshll.u32 %s2190_s23, 4  ;;  %s2071_s15 = int_to_ptr.vmem [resolvable:$false] %s2070_s15 }
 0x4e0   : > { %s2072_s27 = scalar_lea.vmem %s2071_s15, 256  ;;  %p2073_p9 = scmp.lt.s32.totalorder %s2712_s1, %s2071_s15 }
 0x4e1   : > { %p2074_p10 = scmp.lt.s32.totalorder %s2072_s27, %s2066_s18 }
 0x4e3   : > { %p2075_p0 = por %p2074_p10, %p2073_p9 }
 0x4e5   : > { %p2076_p5 = pnand %p2075_p0, %p2069_p1 }
 0x531   : > { %v921_v51 = vpop.xlane.xlu0 %920 }
 0x532   : > { %v922_v52 = vsub.f32 %v918_v29, %v921_v51 }
 0x534   : > { %v923_v53 = vmul.f32 1.442695, %v922_v52 }
 0x536   : > { %1794 = vpow2.f32 %v923_v53  ;;  %v1525_v53 = vld [vmem:[#allocation14] ss:$0 sm:$0xff] }
 0x539   : > { %v1032_v54 = vpop.xlane.xlu0 %1031 }
 0x53a   : > { %v1033_v55 = vsub.f32 %v1029_v35, %v1032_v54 }
 0x53c   : > { %v1034_v56 = vmul.f32 1.442695, %v1033_v55 }
 0x53e   : > { %1796 = vpow2.f32 %v1034_v56 }
 0x540   : > { %v1795_v57 = vpop.eup %1794 }
 0x541   : > { %v1143_v58 = vpop.xlane.xlu0 %1142  ;;  %v925_v59 = vsel %vm755_vm7, %v1795_v57, 0.0 }
 0x542   : > { %v1144_v60 = vsub.f32 %v1140_v41, %v1143_v58  ;;  %926 = vadd.xlane.f32.xlu0 %v925_v59 }
 0x544   : > { %v1145_v61 = vmul.f32 1.442695, %v1144_v60 }
 0x546   : > { %1798 = vpow2.f32 %v1145_v61 }
 0x548   : > { %v1797_v62 = vpop.eup %1796 }
 0x549   : > { %v1036_v63 = vsel %vm755_vm7, %v1797_v62, 0.0 }
 0x54a   : > { %1037 = vadd.xlane.f32.xlu1 %v1036_v63 }
 0x550   : > { %v1799_v0 = vpop.eup %1798 }
 0x551   : > { %v1147_v3 = vsel %vm755_vm7, %v1799_v0, 0.0 }
 0x552   : > { %1148 = vadd.xlane.f32.xlu0 %v1147_v3 }
 0x55a   : > { %v811_v4 = vpop.xlane.xlu1 %810 }
 0x55b   : > { %1800 = vrcp.f32 %v811_v4  ;;  %1042 = vrot.lane.b32.xlu1 %v2633_v2, %s2184_s14 }
 0x55e   : > { %v819_v5 = vpop.permute.xlu1 %818 }
 0x55f   : > { %v825_v6 = vsel %vm823_vm12, %v819_v5, 0  ;;  %1153 = vrot.lane.b32.xlu1 %v2633_v2, %s2185_s3 }
 0x560   : > { %1580 = vmatpush3.bf16.msra.mxu1 %v825_v6 }
 0x561   : > { %1591 = vmatprep.subr.bf16.mxu1 %v2178_v18 }
 0x565   : > { %v1801_v7 = vpop.eup %1800 }
 0x566   : > { %v813_v8 = vmul.f32 %v1801_v7, %v1793_v49 }
 0x568   : > { %931 = vrot.lane.b32.xlu0 %v2633_v2, %s2186_s5  ;;  %v814_v9 = vpack.c.bf16 %v813_v8, %v813_v8 }
 0x56a   : > { %1582 = vmatmul.mubr.msk.bf16.vlgmr.msra.gmra.mrb[4].mxu1 %vm755_vm7, %v814_v9 }
 0x56b   : > { %1593 = vmatprep.mubr.msk.bf16.mxu1 %vm2179_vm1, %v2178_v18 }
 0x5cf   : > { %v927_v10 = vpop.xlane.xlu0 %926 }
 0x5d0   : > { %1802 = vrcp.f32 %v927_v10 }
 0x5d7   : > { %v1038_v11 = vpop.xlane.xlu1 %1037 }
 0x5d8   : > { %1804 = vrcp.f32 %v1038_v11 }
 0x5da   : > { %v1803_v12 = vpop.eup %1802 }
 0x5db   : > { %v929_v14 = vmul.f32 %v1803_v12, %v1795_v57  ;;  %v1043_v17 = vpop.permute.xlu1 %1042 }
 0x5dc   : > { %v1048_v20 = vsel %vm823_vm12, %v1043_v17, 0 }
 0x5dd   : > { %v930_v2 = vpack.c.bf16 %v929_v14, %v929_v14 }
 0x5df   : > { %v1149_v13 = vpop.xlane.xlu0 %1148  ;;  %v1154_v22 = vpop.permute.xlu1 %1153 }
 0x5e0   : > { %1806 = vrcp.f32 %v1149_v13  ;;  %v1159_v25 = vsel %vm823_vm12, %v1154_v22, 0 }
 0x5e2   : > { %v1805_v19 = vpop.eup %1804 }
 0x5e3   : > { %v932_v15 = vpop.permute.xlu0 %931  ;;  %v1040_v21 = vmul.f32 %v1805_v19, %v1797_v62 }
 0x5e4   : > { %v937_v16 = vsel %vm823_vm12, %v932_v15, 0 }
 0x5e5   : > { %1592 = vmatpush3.bf16.msra.mxu1 %v937_v16  ;;  %v1041_v23 = vpack.c.bf16 %v1040_v21, %v1040_v21 }
 0x5e6   : > { %1603 = vmatprep.subr.bf16.mxu1 %v2178_v18 }
 0x5e8   : > { %1594 = vmatmul.mubr.msk.bf16.vlgmr.msra.gmra.mrb[8].mxu1 %vm755_vm7, %v930_v2 }
 0x5e9   : > { %1604 = vmatpush3.bf16.msra.mxu1 %v1048_v20  ;;  %1605 = vmatprep.mubr.msk.bf16.mxu1 %vm2179_vm1, %v2178_v18 }
 0x5ea   : > { %1615 = vmatprep.subr.bf16.mxu1 %v2178_v18  ;;  %v1807_v24 = vpop.eup %1806 }
 0x5eb   : > { %v1151_v26 = vmul.f32 %v1807_v24, %v1799_v0 }
 0x5ed   : > { %v1152_v27 = vpack.c.bf16 %v1151_v26, %v1151_v26 }
 0x5f0   : > { %1606 = vmatmul.mubr.msk.bf16.vlgmr.msra.gmra.mrb[12].mxu1 %vm755_vm7, %v1041_v23 }
 0x5f1   : > { %1616 = vmatpush3.bf16.msra.mxu1 %v1159_v25  ;;  %1617 = vmatprep.mubr.msk.bf16.mxu1 %vm2179_vm1, %v2178_v18 }
 0x5f8   : > { %1618 = vmatmul.mubr.msk.bf16.vlgmr.msra.gmra.mrb[16].mxu1 %vm755_vm7, %v1152_v27 }
 0x63d   : > { %v861_v28 = vpop.f32.mrb[4].mxu1 }
 0x63e   : > { %v1583_v29 = vpop.f32.mrb[5].mxu1 }
 0x63f   : > { %v864_v30 = vpop.f32.mrb[6].mxu1 }
 0x640   : > { %v1584_v31 = vpop.f32.mrb[7].mxu1 }
 0x6bb   : > { %v973_v33 = vpop.f32.mrb[8].mxu1 }
 0x6bc   : > { %1202 = vrot.lane.b32.xlu1 %v973_v33, %s2187_s29  ;;  %v1595_v34 = vpop.f32.mrb[9].mxu1 }
 0x6bd   : > { %v976_v35 = vpop.f32.mrb[10].mxu1 }
 0x6be   : > { %v1596_v36 = vpop.f32.mrb[11].mxu1 }
 0x6c3   : > { %v1084_v38 = vpop.f32.mrb[12].mxu1 }
 0x6c4   : > { %1206 = vrot.lane.b32.xlu0 %v1084_v38, %s2188_s22  ;;  %v1607_v39 = vpop.f32.mrb[13].mxu1 }
 0x6c5   : > { %v1087_v40 = vpop.f32.mrb[14].mxu1 }
 0x6c6   : > { %v1608_v41 = vpop.f32.mrb[15].mxu1 }
 0x6cb   : > { %v1195_v42 = vpop.f32.mrb[16].mxu1 }
 0x6cc   : > { %1210 = vrot.lane.b32.xlu1 %v1195_v42, %s2189_s21  ;;  %v1619_v43 = vpop.f32.mrb[17].mxu1 }
 0x6cd   : > { %v1198_v18 = vpop.f32.mrb[18].mxu1 }
 0x6ce   : > { %v1620_v44 = vpop.f32.mrb[19].mxu1 }
 0x72e   : > { %v1203_v45 = vpop.permute.xlu1 %1202 }
 0x72f   : > { %v1213_v47 = vsel %vm755_vm7, %v861_v28, %v1203_v45 }
 0x736   : > { %v1207_v46 = vpop.permute.xlu0 %1206 }
 0x737   : > { %v1215_v48 = vsel %vm1214_vm13, %v1213_v47, %v1207_v46 }
 0x73e   : > { %v1211_v49 = vpop.permute.xlu1 %1210 }
 0x73f   : > { %v1217_v50 = vsel %vm1216_vm14, %v1215_v48, %v1211_v49 }
 0x740   : > { %v1218_v51 = vpack.c.bf16 %v1217_v50, %v1217_v50 }
 0x742   : > { %1626 = vmatmul.mubr.msk.bf16.vlgmr.msra.gmra.mrb[20].mxu0 %vm521_vm0, %v1218_v51 }
 0x815   : > { %v1272_v52 = vpop.f32.mrb[20].mxu0 }
 0x816   : > { %v1278_v54 = vadd.f32 %v1272_v52, %v2605_v1  ;;  %v1627_v55 = vpop.f32.mrb[21].mxu0 }
 0x817   : > { %v1275_v56 = vpop.f32.mrb[22].mxu0 }
 0x818   : > { %v1286_v57 = vadd.f32 %v1525_v53, %v1278_v54  ;;  %v1628_v58 = vpop.f32.mrb[23].mxu0 }
 0x81a   : > { %1287 = vst.msk [vmem:[%s511_s25] sm:$0xff] %vm521_vm0, %v1286_v57 }
 0x81b   : > { %2079 = shalt.err (!%p2076_p5)
}
 0x81c   : > { %s2080_s9 = scalar_lea.hbm %s2710_s16, 128  ;;  %s2084_s3 = scalar_lea.hbm %s2834_s24, 256 }
 0x81d   : > { %p2081_p8 = scmp.ne.s32.totalorder %s2710_s16, %s2080_s9  ;;  %p2085_p4 = scmp.lt.u32.totalorder %s2710_s16, %s2834_s24 }
 0x81e   : > { %p2086_p7 = scmp.lt.u32.totalorder %s2084_s3, %s2080_s9  ;;  %p2088_p11 = scmp.lt.u32.totalorder %s2080_s9, %s2710_s16 }
 0x81f   : > { %p2082_p3 = pnand %p2081_p8, %p2835_p2 }
 0x820   : > { %p2087_p6 = por %p2086_p7, %p2085_p4 }
 0x821   : > { %p2083_p13 = pneg %p2082_p3 }
 0x822   : > { %p2089_p12 = por %p2088_p11, %p2087_p6 }
 0x824   : > { %p2090_p1 = pnand %p2089_p12, %p2083_p13 }
 0x826   : > { %2093 = shalt.err (!%p2090_p1)
}
 0x827   : > { %1659 = dma.vmem_to_hbm [thread:$0]  (%p2835_p2), %s2712_s1, 128, %s2710_s16, %s1289_s19  }
 0x828 PF: > { %s2836_s22 = sld [smem:[#allocation27_spill]]  ;;  %s1315_s21 = sand.u32 1, %s2144_s30  }
 0x829   : > { %p2837_p9 = scmp.ne.s32.totalorder %s2811_s20, 0  ;;  %s1316_s26 = scalar_lea.sflag [#allocation5], %s1315_s21 }
 0x82e   : > { %p2838_p10 = scmp.ge.s32.totalorder %s2836_s22, 2 }
 0x830   : > { %p1691_p0 = pnand %p2838_p10, %p2837_p9 }
 0x832   : > { %2139 = dma.done.wait (!%p1691_p0), %s1316_s26, 128  }
 0x833   : > { %2141 = vsyncadd (!%p1691_p0), %s1316_s26, 4294967168  ;;  %s31_s14 = sadd.s32 1, %s2836_s22   ;;  %s2839_s11 = sld [smem:[#allocation25_spill]] }
 0x834   : > { %p28_p5 = scmp.ge.s32.totalorder %s31_s14, 4   ;;  %s2840_s28 = sld [smem:[#allocation30_spill]] }
 0x835   : > { %s2841_s25 = sld [smem:[#allocation29_spill]]  ;;  %s2842_s30 = smov %s2148_s10 }
 0x836   : > { %s2845_s12 = smov %s2160_s13  ;;  %30 = sbr.rel (!%p28_p5) target bundleno = 17 (0x11), region = 153 }
 0x839   : > { %s2843_s10 = smov %s2839_s11 }
 0x83a   : > { %s2844_s11 = smov %s2840_s28 }
 0x83b   : > { %s2846_s13 = smov %s2841_s25 }
 0x83d   :  { %1321 = vsyncpa [#allocation4], 1 }
 0x83e   :  { %1323 = vsyncpa [#allocation4 + $0x1], 1 }
 0x83f   :  { %1324 = vsyncpa [#allocation7], 1 }
 0x840   :  { %1326 = vsyncpa [#allocation7 + $0x1], 1 }
 0x841   :  { %1327 = vsyncpa [#allocation10], 1 }
 0x842   :  { %1328 = vsyncpa [#allocation13], 1 }
 0x843   :  { %1329 = vsyncpa [#allocation16], 1 }
 0x844   :  { %1330 = vsyncpa [#allocation5], 1 }
 0x845   :  { %1332 = vsyncpa [#allocation5 + $0x1], 1 }

// kernel: _lambda_.8
= control target key start
LH: loop header
LB: loop body
LE: loop exit
PB: predicated region body
PF: predicated region fallthrough
CT: control target
= control target key end

     0   :  { %s2934_s0 = inlined_call_operand.hbm [shape: f32[2,8,32], index: 0, kind: input, shape index: {}]   ;;  %s2935_s1 = inlined_call_operand.hbm [shape: f32[2,8,32], index: 1, kind: input, shape index: {}]   ;;  %s2936_s2 = inlined_call_operand.hbm [shape: s32[2,1,8], index: 2, kind: input, shape index: {}]   ;;  %s2937_s3 = inlined_call_operand.hbm [shape: bf16[32,32], index: 3, kind: input, shape index: {}]   ;;  %s2938_s4 = inlined_call_operand.hbm [shape: f32[1,32], index: 4, kind: input, shape index: {}]   ;;  %s2939_s5 = inlined_call_operand.hbm [shape: bf16[32,64], index: 5, kind: input, shape index: {}]   ;;  %s2940_s6 = inlined_call_operand.hbm [shape: f32[1,64], index: 6, kind: input, shape index: {}]   ;;  %s2941_s7 = inlined_call_operand.hbm [shape: bf16[32,32], index: 7, kind: input, shape index: {}]   ;;  %s2942_s8 = inlined_call_operand.hbm [shape: f32[1,32], index: 8, kind: input, shape index: {}]   ;;  %s2943_s9 = inlined_call_operand.hbm [shape: f32[1,32], index: 9, kind: input, shape index: {}]   ;;  %s2944_s10 = inlined_call_operand.hbm [shape: f32[1,32], index: 10, kind: input, shape index: {}]   ;;  %s2945_s11 = inlined_call_operand.hbm [shape: f32[2,8,32], index: 11, kind: output, shape index: {}]  }
   0x1   :  { %2966 = sst [smem:[#allocation34_spill]] %s2934_s0 }
   0x2   :  { %2967 = sst [smem:[#allocation35_spill]] %s2935_s1 }
   0x3   :  { %2968 = sst [smem:[#allocation36_spill]] %s2936_s2 }
   0x4   :  { %2969 = sst [smem:[#allocation37_spill]] %s2937_s3 }
   0x5   :  { %2970 = sst [smem:[#allocation38_spill]] %s2939_s5 }
   0x6   :  { %2971 = sst [smem:[#allocation39_spill]] %s2941_s7 }
   0x7   :  { %2972 = sst [smem:[#allocation40_spill]] %s2943_s9 }
   0x8   :  { %2973 = sst [smem:[#allocation41_spill]] %s2945_s11 }
   0x9   :  { %16 = vsyncpa [#allocation4], 0 }
   0xa   :  { %18 = vsyncpa [#allocation4 + $0x1], 0 }
   0xb   :  { %19 = vsyncpa [#allocation7], 0 }
   0xc   :  { %21 = vsyncpa [#allocation7 + $0x1], 0 }
   0xd   :  { %22 = vsyncpa [#allocation10], 0 }
   0xe   :  { %23 = vsyncpa [#allocation13], 0 }
   0xf   :  { %24 = vsyncpa [#allocation16], 0 }
  0x10   :  { %25 = vsyncpa [#allocation19], 0 }
  0x11   :  { %26 = vsyncpa [#allocation5], 0 }
  0x12   :  { %28 = vsyncpa [#allocation5 + $0x1], 0  ;;  %s2383_s17 = smov 0   ;;  %s2385_s18 = smov 0  }
  0x13   :  { %s2387_s19 = smov 0   ;;  %s2389_s20 = smov 0  }
  0x14   :  { %s2391_s21 = smov 0   ;;  %s2393_s22 = smov 0  }
  0x15 LB: > { %2974 = sst [smem:[#allocation29_spill]] %s2282_s19  ;;  %s2414_s23 = sadd.s32 4294967295, %s2294_s22   ;;  %s2294_s22 = sphi %s2393_s22, %s34_s22   ;;  %s2290_s21 = sphi %s2391_s21, %s3026_s21   ;;  %s2286_s20 = sphi %s2389_s20, %s3025_s20   ;;  %s2282_s19 = sphi %s2387_s19, %s3021_s19   ;;  %s2278_s18 = sphi %s2385_s18, %s3024_s18   ;;  %s2274_s17 = sphi %s2383_s17, %s3023_s17  }
  0x16   : > { %2975 = sst [smem:[#allocation30_spill]] %s2286_s20  ;;  %p1532_p0 = scmp.ge.s32.totalorder %s2294_s22, 1 }
  0x17   : > { %p2950_p1 = scmp.eq.s32.totalorder %s2414_s23, 0  ;;  %p327_p2 = scmp.lt.s32.totalorder %s2294_s22, 3 }
  0x18   : > { %s2296_s25 = smov [#allocation9]   ;;  %s2297_s28 = smov [#allocation12]  }
  0x19   : > { %p2419_p3 = pnand %p1532_p0, %p327_p2  ;;  %s339_s26 = sshll.u32 %s2296_s25, 4  ;;  %s2423_s26 = int_to_ptr.vmem [resolvable:$true] %s339_s26 }
  0x1a   : > { %s363_s29 = sshll.u32 %s2297_s28, 4  ;;  %s2298_s30 = smov [#allocation15]   ;;  %s2434_s29 = int_to_ptr.vmem [resolvable:$true] %s363_s29 }
  0x1b   : > { %s2976_s24 = scalar_select %p2419_p3, 1, 0 }
  0x1c   : > { %p1723_p4 = pneg %p2419_p3  ;;  %s2436_s12 = sshll.u32 %s2298_s30, 4  ;;  %s388_s12 = int_to_ptr.vmem [resolvable:$true] %s2436_s12 }
  0x1d   : > { %2977 = sst [smem:[#allocation31_spill]] %s2976_s24  ;;  %s2979_s3 = sld [smem:[#allocation37_spill]] }
  0x1e   : > { %p2430_p6 = pnand %p1723_p4, %p2950_p1 }
  0x20   : > { %s2978_s27 = scalar_select %p2430_p6, 1, 0 }
  0x21   : > { %p2446_p8 = pneg %p2430_p6 }
  0x23   : > { %s1878_s15 = scalar_lea.hbm %s2979_s3, 256 }
  0x24   : > { %p1879_p7 = scmp.ne.s32.totalorder %s2979_s3, %s1878_s15  ;;  %p1885_p11 = scmp.lt.u32.totalorder %s1878_s15, %s2979_s3 }
  0x25   : > { %s2980_s11 = scalar_select %p2446_p8, 1, 0 }
  0x26   : > { %p1881_p9 = pnand %p2446_p8, %p1879_p7 }
  0x28   : > { %p1882_p10 = pneg %p1881_p9 }
  0x2a   : > { %p1887_p12 = pnand %p1885_p11, %p1882_p10 }
  0x2c   : > { %1890 = shalt.err (!%p1887_p12)
}
  0x2d   : > { %s1891_s13 = scalar_lea.vmem %s2423_s26, 256  ;;  %p1899_p4 = scmp.lt.s32.totalorder %s2423_s26, %s2423_s26 }
  0x2e   : > { %p1892_p13 = scmp.ne.s32.totalorder %s2423_s26, %s1891_s13  ;;  %p1900_p5 = scmp.lt.s32.totalorder %s1891_s13, %s1891_s13 }
  0x30   : > { %p1894_p0 = pnand %p1892_p13, %p2446_p8  ;;  %p1901_p7 = por %p1900_p5, %p1899_p4 }
  0x32   : > { %p1895_p2 = pneg %p1894_p0 }
  0x34   : > { %p1902_p9 = pnand %p1901_p7, %p1895_p2 }
  0x36   : > { %1905 = shalt.err (!%p1902_p9)
}
  0x37   : > { %s2299_s14 = smov 64   ;;  %s2300_s15 = smov 4  }
  0x38   : > { %1726 = dma.hbm_to_vmem [thread:$0]  (!%p2430_p6), %s2979_s3, 256, %s2423_s26, [#allocation10], %s2299_s14, %s2299_s14, %s2300_s15  }
  0x39   : > { %s2981_s5 = sld [smem:[#allocation38_spill]] }
  0x3f   : > { %s1906_s13 = scalar_lea.hbm %s2981_s5, 256 }
  0x40   : > { %p1907_p5 = scmp.ne.s32.totalorder %s2981_s5, %s1906_s13  ;;  %p1913_p12 = scmp.lt.u32.totalorder %s1906_s13, %s2981_s5 }
  0x42   : > { %p1909_p10 = pnand %p1907_p5, %p2446_p8 }
  0x44   : > { %p1910_p11 = pneg %p1909_p10 }
  0x46   : > { %p1915_p13 = pnand %p1913_p12, %p1910_p11 }
  0x48   : > { %1918 = shalt.err (!%p1915_p13)
}
  0x49   : > { %s1919_s26 = scalar_lea.vmem %s2434_s29, 256  ;;  %p1927_p7 = scmp.lt.s32.totalorder %s2434_s29, %s2434_s29 }
  0x4a   : > { %p1920_p0 = scmp.ne.s32.totalorder %s2434_s29, %s1919_s26  ;;  %p1928_p9 = scmp.lt.s32.totalorder %s1919_s26, %s1919_s26 }
  0x4c   : > { %p1922_p2 = pnand %p1920_p0, %p2446_p8  ;;  %p1929_p5 = por %p1928_p9, %p1927_p7 }
  0x4e   : > { %p1923_p4 = pneg %p1922_p2 }
  0x50   : > { %p1930_p10 = pnand %p1929_p5, %p1923_p4 }
  0x52   : > { %1933 = shalt.err (!%p1930_p10)
}
  0x53   : > { %1732 = dma.hbm_to_vmem [thread:$0]  (!%p2430_p6), %s2981_s5, 256, %s2434_s29, [#allocation13], %s2299_s14, %s2299_s14, %s2300_s15  }
  0x54   : > { %s2982_s7 = sld [smem:[#allocation39_spill]] }
  0x5a   : > { %s1934_s16 = scalar_lea.hbm %s2982_s7, 256 }
  0x5b   : > { %p1935_p11 = scmp.ne.s32.totalorder %s2982_s7, %s1934_s16  ;;  %p1941_p0 = scmp.lt.u32.totalorder %s1934_s16, %s2982_s7 }
  0x5d   : > { %p1937_p12 = pnand %p1935_p11, %p2446_p8 }
  0x5f   : > { %p1938_p13 = pneg %p1937_p12 }
  0x61   : > { %p1943_p2 = pnand %p1941_p0, %p1938_p13 }
  0x63   : > { %1946 = shalt.err (!%p1943_p2)
}
  0x64   : > { %s1947_s26 = scalar_lea.vmem %s388_s12, 256  ;;  %p1955_p5 = scmp.lt.s32.totalorder %s388_s12, %s388_s12 }
  0x65   : > { %p1948_p4 = scmp.ne.s32.totalorder %s388_s12, %s1947_s26  ;;  %p1956_p10 = scmp.lt.s32.totalorder %s1947_s26, %s1947_s26 }
  0x67   : > { %p1950_p7 = pnand %p1948_p4, %p2446_p8  ;;  %p1957_p1 = por %p1956_p10, %p1955_p5 }
  0x69   : > { %p1951_p9 = pneg %p1950_p7 }
  0x6b   : > { %p1958_p3 = pnand %p1957_p1, %p1951_p9 }
  0x6d   : > { %1961 = shalt.err (!%p1958_p3)
}
  0x6e   : > { %1738 = dma.hbm_to_vmem [thread:$0]  (!%p2430_p6), %s2982_s7, 256, %s388_s12, [#allocation16], %s2299_s14, %s2299_s14, %s2300_s15  }
  0x6f   : > { %s2301_s2 = smov [#allocation18]   ;;  %s2983_s9 = sld [smem:[#allocation40_spill]] }
  0x70   : > { %s412_s20 = sshll.u32 %s2301_s2, 4  ;;  %s413_s20 = int_to_ptr.vmem [resolvable:$true] %s412_s20 }
  0x75   : > { %s1962_s25 = scalar_lea.hbm %s2983_s9, 16 }
  0x76   : > { %p1963_p1 = scmp.ne.s32.totalorder %s2983_s9, %s1962_s25  ;;  %p1969_p12 = scmp.lt.u32.totalorder %s1962_s25, %s2983_s9 }
  0x78   : > { %p1965_p3 = pnand %p1963_p1, %p2446_p8 }
  0x7a   : > { %p1966_p11 = pneg %p1965_p3 }
  0x7c   : > { %p1971_p13 = pnand %p1969_p12, %p1966_p11 }
  0x7e   : > { %1974 = shalt.err (!%p1971_p13)
}
  0x7f   : > { %s1975_s12 = scalar_lea.vmem %s413_s20, 16  ;;  %s1982_s14 = scalar_lea.vmem %s413_s20, 32 }
  0x80   : > { %p1976_p0 = scmp.ne.s32.totalorder %s413_s20, %s1975_s12  ;;  %p1983_p7 = scmp.lt.s32.totalorder %s413_s20, %s413_s20 }
  0x81   : > { %p1984_p9 = scmp.lt.s32.totalorder %s1982_s14, %s1975_s12 }
  0x82   : > { %p1978_p2 = pnand %p1976_p0, %p2446_p8 }
  0x83   : > { %p1985_p5 = por %p1984_p9, %p1983_p7 }
  0x84   : > { %p1979_p4 = pneg %p1978_p2 }
  0x86   : > { %p1986_p10 = pnand %p1985_p5, %p1979_p4 }
  0x88   : > { %1989 = shalt.err (!%p1986_p10)
}
  0x89   : > { %1744 = dma.hbm_to_vmem [thread:$0]  (!%p2430_p6), %s2983_s9, 16, %s413_s20, [#allocation19]  }
  0x8a   : > { %s1531_s0 = sadd.s32 4294967294, %s2294_s22   ;;  %s46_s2 = sadd.s32 1, %s2290_s21 }
  0x8b   : > { %p48_p1 = scmp.ge.s32.totalorder %s46_s2, 2  ;;  %s55_s24 = sadd.s32 1, %s2282_s19 }
  0x8c   : > { %p62_p3 = scmp.ne.s32.totalorder %s2282_s19, %s2278_s18  ;;  %p63_p11 = scmp.eq.s32.totalorder %s2294_s22, 0 }
  0x8d   : > { %s3028_s2 = smov (%p48_p1, %s46_s2), 0  ;;  %p68_p13 = scmp.ne.s32.totalorder %s2278_s18, %s2274_s17 }
  0x8e   : > { %2984 = sst [smem:[#allocation32_spill]] %s3028_s2  ;;  %p2544_p12 = por %p63_p11, %p62_p3 }
  0x8f   : > { %s50_s20 = ssub.s32 %s2290_s21, %s3028_s2  ;;  %p314_p0 = scmp.eq.s32.totalorder %s2414_s23, 1 }
  0x90   : > { %p53_p2 = scmp.eq.s32.totalorder %s50_s20, 0  ;;  %p2986_p4 = scmp.eq.s32.totalorder %s2414_s23, 0 }
  0x91   : > { %p2559_p9 = por %p314_p0, %p62_p3  ;;  %p320_p5 = scmp.eq.s32.totalorder %s1531_s0, 1 }
  0x92   : > { %p2555_p7 = por %p2986_p4, %p68_p13  ;;  %p1770_p1 = scmp.lt.s32.totalorder %s2294_s22, 2 }
  0x93   : > { %s2988_s28 = scalar_select %p2559_p9, 1, 0 }
  0x94   : > { %s2987_s25 = scalar_select %p2555_p7, 1, 0 }
  0x95   : > { %s2564_s30 = scalar_select %p53_p2, %s2282_s19, %s55_s24  }
  0x96   : > { %p2566_p10 = por %p320_p5, %p68_p13  ;;  %s2572_s26 = sand.u32 1, %s2282_s19  }
  0x97   : > { %2989 = sst [smem:[#allocation33_spill]] %s2564_s30  ;;  %s2953_s12 = sshll.u32 %s2290_s21, 7 }
  0x98   : > { %s2990_s13 = scalar_select %p2566_p10, 1, 0 }
  0x99   : > { %s2952_s14 = sshll.u32 %s2572_s26, 3  ;;  %p2578_p11 = pnand %p1770_p1, %p2544_p12 }
  0x9a   : > { %s453_s29 = sand.u32 1, %s2294_s22   ;;  %s2992_s1 = sld [smem:[#allocation35_spill]] }
  0x9b   : > { %s2991_s15 = scalar_select %p2578_p11, 1, 0 }
  0x9c   : > { %s457_s3 = scalar_lea.vmem [#allocation6], %s2952_s14  ;;  %s2594_s16 = scalar_lea.sflag [#allocation7], %s453_s29 }
  0x9d   : > { %s464_s5 = sshll.u32 %s457_s3, 4  ;;  %p2600_p12 = pneg %p2578_p11  ;;  %s2592_s5 = int_to_ptr.vmem [resolvable:$true] %s464_s5 }
  0x9f   : > { %s2993_s9 = scalar_select %p2600_p12, 1, 0 }
  0xa0   : > { %s2588_s20 = scalar_lea.hbm %s2992_s1, %s2953_s12  ;;  %s1995_s14 = scalar_lea.hbm %s2992_s1, 256 }
  0xa1   : > { %s1990_s7 = scalar_lea.hbm %s2588_s20, 128  ;;  %p1996_p2 = scmp.lt.u32.totalorder %s2588_s20, %s2992_s1 }
  0xa2   : > { %p1991_p3 = scmp.ne.s32.totalorder %s2588_s20, %s1990_s7  ;;  %p1997_p4 = scmp.lt.u32.totalorder %s1995_s14, %s1990_s7 }
  0xa3   : > { %p1999_p1 = scmp.lt.u32.totalorder %s1990_s7, %s2588_s20 }
  0xa4   : > { %p1993_p13 = pnand %p2600_p12, %p1991_p3  ;;  %p1998_p5 = por %p1997_p4, %p1996_p2 }
  0xa6   : > { %p1994_p0 = pneg %p1993_p13  ;;  %p2000_p10 = por %p1999_p1, %p1998_p5 }
  0xa8   : > { %p2001_p9 = pnand %p2000_p10, %p1994_p0 }
  0xaa   : > { %2004 = shalt.err (!%p2001_p9)
}
  0xab   : > { %s2005_s29 = scalar_lea.vmem %s2592_s5, 128  ;;  %s2302_s0 = smov [#allocation6]  }
  0xac   : > { %p2006_p3 = scmp.ne.s32.totalorder %s2592_s5, %s2005_s29  ;;  %s2010_s24 = sshll.u32 %s2302_s0, 4  ;;  %s2011_s24 = int_to_ptr.vmem [resolvable:$false] %s2010_s24 }
  0xad   : > { %s2012_s12 = scalar_lea.vmem %s2011_s24, 256  ;;  %p2013_p6 = scmp.lt.s32.totalorder %s2592_s5, %s2011_s24 }
  0xae   : > { %p2008_p13 = pnand %p2006_p3, %p2600_p12  ;;  %p2014_p8 = scmp.lt.s32.totalorder %s2012_s12, %s2005_s29 }
  0xb0   : > { %p2009_p7 = pneg %p2008_p13  ;;  %p2015_p2 = por %p2014_p8, %p2013_p6 }
  0xb2   : > { %p2016_p4 = pnand %p2015_p2, %p2009_p7 }
  0xb4   : > { %2019 = shalt.err (!%p2016_p4)
}
  0xb5   : > { %1754 = dma.hbm_to_vmem [thread:$0]  (!%p2578_p11), %s2588_s20, 128, %s2592_s5, %s2594_s16  }
  0xb6   : > { %s2303_s7 = smov [#allocation11]   ;;  %s2304_s3 = smov [#allocation14]  }
  0xb7   : > { %s353_s14 = sshll.u32 %s2303_s7, 4  ;;  %s377_s1 = sshll.u32 %s2304_s3, 4  ;;  %s354_s14 = int_to_ptr.vmem [resolvable:$true] %s353_s14  ;;  %s378_s1 = int_to_ptr.vmem [resolvable:$true] %s377_s1 }
  0xb8   : > { %s2020_s24 = scalar_lea.hbm %s2938_s4, 16  ;;  %p2994_p8 = scmp.ne.s32.totalorder %s2980_s11, 0 }
  0xb9   : > { %p2021_p6 = scmp.ne.s32.totalorder %s2938_s4, %s2020_s24  ;;  %p2027_p10 = scmp.lt.u32.totalorder %s2020_s24, %s2938_s4 }
  0xbb   : > { %p2023_p7 = pnand %p2021_p6, %p2994_p8 }
  0xbd   : > { %p2024_p9 = pneg %p2023_p7 }
  0xbf   : > { %p2029_p0 = pnand %p2027_p10, %p2024_p9 }
  0xc1   : > { %2032 = shalt.err (!%p2029_p0)
}
  0xc2   : > { %s2033_s5 = scalar_lea.vmem %s354_s14, 16  ;;  %s2040_s2 = scalar_lea.vmem %s354_s14, 32 }
  0xc3   : > { %p2034_p5 = scmp.ne.s32.totalorder %s354_s14, %s2033_s5  ;;  %p2041_p13 = scmp.lt.s32.totalorder %s354_s14, %s354_s14 }
  0xc4   : > { %p2042_p2 = scmp.lt.s32.totalorder %s2040_s2, %s2033_s5 }
  0xc5   : > { %p2036_p1 = pnand %p2034_p5, %p2994_p8 }
  0xc6   : > { %p2043_p4 = por %p2042_p2, %p2041_p13 }
  0xc7   : > { %p2037_p3 = pneg %p2036_p1 }
  0xc9   : > { %p2044_p11 = pnand %p2043_p4, %p2037_p3 }
  0xcb   : > { %2047 = shalt.err (!%p2044_p11)
}
  0xcc   : > { %p2995_p6 = scmp.ne.s32.totalorder %s2978_s27, 0  ;;  %s2048_s3 = scalar_lea.hbm %s2940_s6, 16 }
  0xcd   : > { %p2049_p7 = scmp.ne.s32.totalorder %s2940_s6, %s2048_s3  ;;  %p2055_p11 = scmp.lt.u32.totalorder %s2048_s3, %s2940_s6 }
  0xce   : > { %1729 = dma.hbm_to_vmem [thread:$0]  (!%p2995_p6), %s2938_s4, 16, %s354_s14, [#allocation10]  }
  0xcf   : > { %p2051_p9 = pnand %p2049_p7, %p2994_p8 }
  0xd1   : > { %p2052_p10 = pneg %p2051_p9 }
  0xd3   : > { %p2057_p0 = pnand %p2055_p11, %p2052_p10 }
  0xd5   : > { %2060 = shalt.err (!%p2057_p0)
}
  0xd6   : > { %s2061_s5 = scalar_lea.vmem %s378_s1, 16  ;;  %s2068_s14 = scalar_lea.vmem %s378_s1, 32 }
  0xd7   : > { %p2062_p5 = scmp.ne.s32.totalorder %s378_s1, %s2061_s5  ;;  %p2069_p13 = scmp.lt.s32.totalorder %s378_s1, %s378_s1 }
  0xd8   : > { %p2070_p2 = scmp.lt.s32.totalorder %s2068_s14, %s2061_s5 }
  0xd9   : > { %p2064_p1 = pnand %p2062_p5, %p2994_p8 }
  0xda   : > { %p2071_p4 = por %p2070_p2, %p2069_p13 }
  0xdb   : > { %p2065_p3 = pneg %p2064_p1 }
  0xdd   : > { %p2072_p12 = pnand %p2071_p4, %p2065_p3 }
  0xdf   : > { %2075 = shalt.err (!%p2072_p12)
}
  0xe0   : > { %1735 = dma.hbm_to_vmem [thread:$0]  (!%p2995_p6), %s2940_s6, 16, %s378_s1, [#allocation13]  }
  0xe1   : > { %s2305_s7 = smov [#allocation17]   ;;  %s2306_s30 = smov [#allocation20]  }
  0xe2   : > { %s401_s19 = sshll.u32 %s2305_s7, 4  ;;  %s423_s3 = sshll.u32 %s2306_s30, 4  ;;  %s402_s19 = int_to_ptr.vmem [resolvable:$true] %s401_s19  ;;  %s424_s3 = int_to_ptr.vmem [resolvable:$true] %s423_s3 }
  0xe3   : > { %s2076_s29 = scalar_lea.hbm %s2942_s8, 16 }
  0xe4   : > { %p2077_p12 = scmp.ne.s32.totalorder %s2942_s8, %s2076_s29  ;;  %p2083_p10 = scmp.lt.u32.totalorder %s2076_s29, %s2942_s8 }
  0xe6   : > { %p2079_p7 = pnand %p2077_p12, %p2994_p8 }
  0xe8   : > { %p2080_p9 = pneg %p2079_p7 }
  0xea   : > { %p2085_p11 = pnand %p2083_p10, %p2080_p9 }
  0xec   : > { %2088 = shalt.err (!%p2085_p11)
}
  0xed   : > { %s2089_s1 = scalar_lea.vmem %s402_s19, 16  ;;  %s2096_s20 = scalar_lea.vmem %s402_s19, 32 }
  0xee   : > { %p2090_p0 = scmp.ne.s32.totalorder %s402_s19, %s2089_s1  ;;  %p2097_p3 = scmp.lt.s32.totalorder %s402_s19, %s402_s19 }
  0xef   : > { %p2098_p13 = scmp.lt.s32.totalorder %s2096_s20, %s2089_s1 }
  0xf0   : > { %p2092_p5 = pnand %p2090_p0, %p2994_p8 }
  0xf1   : > { %p2099_p2 = por %p2098_p13, %p2097_p3 }
  0xf2   : > { %p2093_p1 = pneg %p2092_p5 }
  0xf4   : > { %p2100_p4 = pnand %p2099_p2, %p2093_p1 }
  0xf6   : > { %2103 = shalt.err (!%p2100_p4)
}
  0xf7   : > { %1741 = dma.hbm_to_vmem [thread:$0]  (!%p2995_p6), %s2942_s8, 16, %s402_s19, [#allocation16]  }
  0xf8   : > { %s2104_s29 = scalar_lea.hbm %s2944_s10, 16 }
  0xf9   : > { %p2105_p12 = scmp.ne.s32.totalorder %s2944_s10, %s2104_s29  ;;  %p2111_p10 = scmp.lt.u32.totalorder %s2104_s29, %s2944_s10 }
  0xfb   : > { %p2107_p7 = pnand %p2105_p12, %p2994_p8 }
  0xfd   : > { %p2108_p9 = pneg %p2107_p7 }
  0xff   : > { %p2113_p11 = pnand %p2111_p10, %p2108_p9 }
 0x101   : > { %2116 = shalt.err (!%p2113_p11)
}
 0x102   : > { %s2117_s1 = scalar_lea.vmem %s424_s3, 16  ;;  %s2124_s19 = scalar_lea.vmem %s424_s3, 32 }
 0x103   : > { %p2118_p0 = scmp.ne.s32.totalorder %s424_s3, %s2117_s1  ;;  %p2125_p3 = scmp.lt.s32.totalorder %s424_s3, %s424_s3 }
 0x104   : > { %p2126_p13 = scmp.lt.s32.totalorder %s2124_s19, %s2117_s1 }
 0x105   : > { %p2120_p5 = pnand %p2118_p0, %p2994_p8 }
 0x106   : > { %p2127_p2 = por %p2126_p13, %p2125_p3 }
 0x107   : > { %p2121_p1 = pneg %p2120_p5 }
 0x109   : > { %p2128_p4 = pnand %p2127_p2, %p2121_p1 }
 0x10b   : > { %2131 = shalt.err (!%p2128_p4)
}
 0x10c   : > { %1747 = dma.hbm_to_vmem [thread:$0]  (!%p2995_p6), %s2944_s10, 16, %s424_s3, [#allocation19]  }
 0x10d   : > { %s2996_s11 = sshll.u32 %s2290_s21, 7  ;;  %s2997_s24 = sld [smem:[#allocation34_spill]] }
 0x10e   : > { %s2998_s12 = sshll.u32 %s2572_s26, 3  ;;  %s1546_s14 = sshll.u32 %s2290_s21, 4 }
 0x10f   : > { %s438_s27 = scalar_lea.vmem [#allocation3], %s2998_s12  ;;  %s435_s2 = scalar_lea.sflag [#allocation4], %s2572_s26 }
 0x110   : > { %s446_s5 = sshll.u32 %s438_s27, 4  ;;  %p2999_p6 = scmp.ne.s32.totalorder %s2993_s9, 0  ;;  %s2705_s5 = int_to_ptr.vmem [resolvable:$true] %s446_s5 }
 0x113   : > { %s2701_s29 = scalar_lea.hbm %s2997_s24, %s2996_s11  ;;  %s2137_s20 = scalar_lea.hbm %s2997_s24, 256 }
 0x114   : > { %s2132_s1 = scalar_lea.hbm %s2701_s29, 128  ;;  %p2138_p9 = scmp.lt.u32.totalorder %s2701_s29, %s2997_s24 }
 0x115   : > { %p2133_p8 = scmp.ne.s32.totalorder %s2701_s29, %s2132_s1  ;;  %p2139_p10 = scmp.lt.u32.totalorder %s2137_s20, %s2132_s1 }
 0x116   : > { %p2141_p0 = scmp.lt.u32.totalorder %s2132_s1, %s2701_s29 }
 0x117   : > { %p2135_p12 = pnand %p2133_p8, %p2999_p6  ;;  %p2140_p11 = por %p2139_p10, %p2138_p9 }
 0x119   : > { %p2136_p7 = pneg %p2135_p12  ;;  %p2142_p5 = por %p2141_p0, %p2140_p11 }
 0x11b   : > { %p2143_p1 = pnand %p2142_p5, %p2136_p7 }
 0x11d   : > { %2146 = shalt.err (!%p2143_p1)
}
 0x11e   : > { %s2147_s30 = scalar_lea.vmem %s2705_s5, 128  ;;  %s2307_s0 = smov [#allocation3]  }
 0x11f   : > { %p2148_p3 = scmp.ne.s32.totalorder %s2705_s5, %s2147_s30  ;;  %s2152_s12 = sshll.u32 %s2307_s0, 4  ;;  %s2153_s12 = int_to_ptr.vmem [resolvable:$false] %s2152_s12 }
 0x120   : > { %s2154_s27 = scalar_lea.vmem %s2153_s12, 256  ;;  %p2155_p4 = scmp.lt.s32.totalorder %s2705_s5, %s2153_s12 }
 0x121   : > { %p2150_p13 = pnand %p2148_p3, %p2999_p6  ;;  %p2156_p8 = scmp.lt.s32.totalorder %s2154_s27, %s2147_s30 }
 0x123   : > { %p2151_p2 = pneg %p2150_p13  ;;  %p2157_p12 = por %p2156_p8, %p2155_p4 }
 0x125   : > { %p2158_p9 = pnand %p2157_p12, %p2151_p2 }
 0x127   : > { %2161 = shalt.err (!%p2158_p9)
}
 0x128   : > { %p3000_p7 = scmp.ne.s32.totalorder %s2991_s15, 0  ;;  %s3001_s19 = sld [smem:[#allocation36_spill]] }
 0x129   : > { %s474_s11 = scalar_lea.vmem [#allocation8], %s2572_s26 }
 0x12a   : > { %1751 = dma.hbm_to_vmem [thread:$0]  (!%p3000_p7), %s2701_s29, 128, %s2705_s5, %s435_s2  }
 0x12b   : > { %s481_s30 = sshll.u32 %s474_s11, 4  ;;  %s482_s30 = int_to_ptr.vmem [resolvable:$true] %s481_s30 }
 0x12e   : > { %s3002_s7 = smov %s3001_s19  ;;  %s2735_s20 = scalar_lea.hbm %s3001_s19, %s1546_s14 }
 0x12f   : > { %s2162_s0 = scalar_lea.hbm %s2735_s20, 16  ;;  %s2167_s5 = scalar_lea.hbm %s3002_s7, 32 }
 0x130   : > { %p2163_p10 = scmp.ne.s32.totalorder %s2735_s20, %s2162_s0  ;;  %p2168_p5 = scmp.lt.u32.totalorder %s2735_s20, %s3002_s7 }
 0x131   : > { %p2169_p1 = scmp.lt.u32.totalorder %s2167_s5, %s2162_s0  ;;  %p2171_p13 = scmp.lt.u32.totalorder %s2162_s0, %s2735_s20 }
 0x132   : > { %p2165_p11 = pnand %p2163_p10, %p2999_p6 }
 0x133   : > { %p2170_p3 = por %p2169_p1, %p2168_p5 }
 0x134   : > { %p2166_p0 = pneg %p2165_p11 }
 0x135   : > { %p2172_p2 = por %p2171_p13, %p2170_p3 }
 0x137   : > { %p2173_p4 = pnand %p2172_p2, %p2166_p0 }
 0x139   : > { %2176 = shalt.err (!%p2173_p4)
}
 0x13a   : > { %s2177_s26 = scalar_lea.vmem %s482_s30, 16  ;;  %s2308_s14 = smov [#allocation8]  }
 0x13b   : > { %p2178_p8 = scmp.ne.s32.totalorder %s482_s30, %s2177_s26  ;;  %s2182_s1 = sshll.u32 %s2308_s14, 4  ;;  %s2183_s1 = int_to_ptr.vmem [resolvable:$false] %s2182_s1 }
 0x13c   : > { %s2184_s3 = scalar_lea.vmem %s2183_s1, 32  ;;  %p2185_p10 = scmp.lt.s32.totalorder %s482_s30, %s2183_s1 }
 0x13d   : > { %p2180_p12 = pnand %p2178_p8, %p2999_p6  ;;  %p2186_p11 = scmp.lt.s32.totalorder %s2184_s3, %s2177_s26 }
 0x13f   : > { %p2181_p9 = pneg %p2180_p12  ;;  %p2187_p7 = por %p2186_p11, %p2185_p10 }
 0x141   : > { %p2188_p1 = pnand %p2187_p7, %p2181_p9 }
 0x143   : > { %2191 = shalt.err (!%p2188_p1)
}
 0x144   : > { %p3003_p5 = scmp.ne.s32.totalorder %s2991_s15, 0  ;;  %s3004_s19 = sld [smem:[#allocation31_spill]] }
 0x146   : > { %1757 = dma.hbm_to_vmem [thread:$0]  (!%p3003_p5), %s2735_s20, 16, %s482_s30, %s2594_s16  }
 0x14a   : > { %p3005_p0 = scmp.ne.s32.totalorder %s3004_s19, 0 }
 0x14b   : > { %s2759_s9 = sand.u32 (!%p3005_p0), 1, %s2278_s18   ;;  %p3006_p6 = scmp.ne.s32.totalorder (!%p3005_p0), %s2987_s25, 0 }
 0x14c   : > { %490 = sbr.rel (%p3005_p0) target bundleno = 2161 (0x871), region = 64  ;;  %s2762_s11 = sshll.u32 (!%p3005_p0), %s2759_s9, 3 }
 0x14d   : > { %s493_s0 = scalar_lea.sflag (!%p3005_p0), [#allocation4], %s2759_s9  ;;  %s496_s12 = scalar_lea.vmem (!%p3005_p0), [#allocation3], %s2762_s11 }
 0x153   : > { %2245 = dma.done.wait (%p3006_p6), %s493_s0, 128  }
 0x154   : > { %2247 = vsyncadd (%p3006_p6), %s493_s0, 4294967168  ;;  %s501_s15 = sand.u32 1, %s2414_s23   ;;  %s505_s20 = scalar_lea.vmem [#allocation6], %s2762_s11 }
 0x155   : > { %s502_s16 = scalar_lea.sflag [#allocation7], %s501_s15 }
 0x156   : > { %2249 = dma.done.wait (%p3006_p6), %s502_s16, 144  }
 0x157   : > { %2251 = vsyncadd (%p3006_p6), %s502_s16, 4294967152  ;;  %s513_s30 = scalar_lea.vmem [#allocation8], %s2759_s9  ;;  %p3007_p7 = scmp.eq.s32.totalorder %s2414_s23, 0 }
 0x159   : > { %2253 = dma.done.wait (%p3007_p7), [#allocation10], 272   ;;  %p3008_p3 = pmov %p3007_p7 }
 0x15b   : > { %2255 = vsyncadd (%p3008_p3), [#allocation10], 4294967024  ;;  %p3009_p13 = pmov %p3008_p3 }
 0x15c   : > { %p3010_p2 = pmov %p3008_p3 }
 0x15d   : > { %2257 = dma.done.wait (%p3009_p13), [#allocation13], 272  }
 0x15e   : > { %2259 = vsyncadd (%p3010_p2), [#allocation13], 4294967024  ;;  %p3011_p4 = pmov %p3010_p2 }
 0x15f   : > { %p3012_p8 = pmov %p3010_p2 }
 0x160   : > { %2261 = dma.done.wait (%p3011_p4), [#allocation16], 272  }
 0x161   : > { %2263 = vsyncadd (%p3012_p8), [#allocation16], 4294967024  ;;  %p3013_p12 = pmov %p3010_p2 }
 0x162   : > { %p3014_p9 = pmov %p3010_p2 }
 0x163   : > { %2265 = dma.done.wait (%p3013_p12), [#allocation19], 32  }
 0x164   : > { %2267 = vsyncadd (%p3014_p9), [#allocation19], 4294967264  ;;  %vm624_vm0 = vcmask 261120   ;;  %v2793_v0 = vld [vmem:[%s496_s12] sm:$0xff]  ;;  %v1851_v7 = vld [vmem:[#allocation12] sm:$0xff]   ;;  %v2309_v8 = vmov 0.0   ;;  %v828_v55 = vlaneseq }
 0x165   : > { %v674_v1 = vsel %vm624_vm0, %v2793_v0, 0.0  ;;  %1611 = vmatprep.subr.bf16.mxu0 %v2309_v8  ;;  %1619 = vmatprep.subr.bf16.mxu1 %v2309_v8  ;;  %v1852_v9 = vld [vmem:[#allocation12 + $0x8] sm:$0xff]   ;;  %vm2310_vm1 = vmmov 0   ;;  %v1854_v13 = vld [vmem:[#allocation9 + $0x8] sm:$0xff]   ;;  %v1563_v22 = vld [vmem:[#allocation18] ss:$0 sm:$0xff] }
 0x166   : > { %675 = vadd.xlane.f32.xlu0 %v674_v1  ;;  %1612 = vmatpush3.bf16.msra.mxu0 %v1851_v7  ;;  %v599_v10 = vld [vmem:[%s505_s20] sm:$0xff]  ;;  %v1853_v12 = vld [vmem:[#allocation9] sm:$0xff]   ;;  %vm669_vm4 = vcmask 519168   ;;  %vm780_vm5 = vcmask 64512   ;;  %s2311_s23 = smov 120   ;;  %s2312_s25 = smov 112  }
 0x167   : > { %1613 = vmatprep.subr.bf16.mxu0 %v2309_v8  ;;  %v600_v11 = vpack.c.bf16 %v599_v10, %v599_v10  ;;  %1615 = vmatprep.mubr.msk.bf16.mxu0 %vm2310_vm1, %v2309_v8  ;;  %v1564_v25 = vld [vmem:[#allocation20] ss:$0 sm:$0xff]  ;;  %v1559_v29 = vld [vmem:[#allocation14] ss:$0 sm:$0xff]  ;;  %v1565_v39 = vld [vmem:[#allocation11] ss:$0 sm:$0xff] }
 0x168   : > { %1623 = vmatprep.mubr.msk.bf16.mxu1 %vm2310_vm1, %v2309_v8  ;;  %1620 = vmatpush3.bf16.msra.mxu1 %v1853_v12  ;;  %s2313_s29 = smov 104   ;;  %v777_v56 = vld [vmem:[%s513_s30] sm:$0x1]  ;;  %v829_v57 = vshrl.u32 %v828_v55, 7  ;;  %v2314_v59 = vmov 0   ;;  %s2315_s5 = smov 88  }
 0x169   : > { %1621 = vmatprep.subr.bf16.mxu1 %v2309_v8  ;;  %vm778_vm6 = vcmp.ne.s32.totalorder %v777_v56, 0  ;;  %s2316_s2 = smov 96   ;;  %s2317_s27 = smov 72   ;;  %vm854_vm8 = vcmask 1043456   ;;  %vm1245_vm9 = vcmask 130048   ;;  %vm1247_vm10 = vcmask 195584  }
 0x16a   : > { %1614 = vmatpush3.bf16.msra.mxu0 %v1852_v9  ;;  %v830_v58 = vsub.s32 0, %v829_v57  ;;  %v827_v60 = vsel %vm778_vm6, 1, %v2314_v59  ;;  %s2318_s26 = smov 80   ;;  %s2319_s14 = smov 8  }
 0x16b   : > { %1627 = vmatprep.subr.bf16.mxu0 %v2309_v8  ;;  %s2320_s1 = smov 16   ;;  %s2321_s3 = smov 24  }
 0x16c   : > { %1622 = vmatpush3.bf16.msra.mxu1 %v1854_v13  ;;  %v831_v61 = vrot.slane %v827_v60, %v830_v58  ;;  %s3015_s19 = sld [smem:[#allocation30_spill]]  ;;  %s592_s12 = scalar_lea.vmem [#allocation21], %s2762_s11 }
 0x16d   : > { %1616 = vmatmul.mubr.msk.bf16.vlgmr.msra.gmra.mrb[0].mxu0 %vm624_vm0, %v600_v11  ;;  %1633 = vmatprep.subr.bf16.mxu1 %v2309_v8  ;;  %s1334_s15 = sshll.u32 %s592_s12, 4  ;;  %s3016_s30 = sld [smem:[#allocation41_spill]]  ;;  %s2886_s15 = int_to_ptr.vmem [resolvable:$true] %s1334_s15 }
 0x16e   : > { %1629 = vmatprep.mubr.msk.bf16.mxu0 %vm2310_vm1, %v2309_v8  ;;  %vm832_vm7 = vcmp.eq.s32.totalorder %v831_v61, 1  ;;  %s1320_s11 = scalar_lea.sflag [#allocation5], %s2759_s9  ;;  %p3017_p11 = scmp.ne.s32.totalorder %s2988_s28, 0 }
 0x172   : > { %s1583_s0 = sshll.u32 %s3015_s19, 7 }
 0x1f3   : > { %v676_v2 = vpop.xlane.xlu0 %675 }
 0x1f4   : > { %v678_v3 = vmul.f32 0.03125, %v676_v2 }
 0x1f6   : > { %v679_v4 = vsub.f32 %v2793_v0, %v678_v3 }
 0x1f8   : > { %v680_v5 = vmul.f32 %v679_v4, %v679_v4 }
 0x1fa   : > { %v681_v6 = vsel %vm624_vm0, %v680_v5, 0.0 }
 0x1fb   : > { %682 = vadd.xlane.f32.xlu0 %v681_v6 }
 0x240   : > { %v662_v30 = vpop.f32.mrb[0].mxu0 }
 0x241   : > { %v663_v31 = vadd.f32 %v1559_v29, %v662_v30  ;;  %v1617_v32 = vpop.f32.mrb[1].mxu0 }
 0x242   : > { %v665_v33 = vpop.f32.mrb[2].mxu0 }
 0x243   : > { %v668_v34 = vpack.c.bf16 %v663_v31, %v663_v31  ;;  %v1618_v35 = vpop.f32.mrb[3].mxu0 }
 0x245   : > { %670 = vst.msk [vmem:[#allocation2] sm:$0xf] %vm669_vm4, %v668_v34 }
 0x24c   : > { %v779_v36 = vld [vmem:[#allocation2] sm:$0xf] }
 0x24d   : > { %v2815_v37 = vcombine.low %v779_v36, %v779_v36  ;;  %v785_v38 = vsel %vm780_vm5, %v779_v36, 0 }
 0x24e   : > { %1628 = vmatpush3.bf16.xpose.msra.mxu0 %v785_v38 }
 0x24f   : > { %901 = vrot.lane.b32.xlu1 %v2815_v37, %s2311_s23  ;;  %1012 = vrot.lane.b32.xlu0 %v2815_v37, %s2312_s25 }
 0x250   : > { %1639 = vmatprep.subr.bf16.mxu0 %v2309_v8 }
 0x288   : > { %v683_v14 = vpop.xlane.xlu0 %682 }
 0x289   : > { %v684_v15 = vmul.f32 0.032258064, %v683_v14 }
 0x28b   : > { %1858 = vrsqrt.f32 %v684_v15  ;;  %vm687_vm2 = vcmp.eq.f32.partialorder %v684_v15, inf  ;;  %v690_v18 = vand.u32 2147483648, %v684_v15  ;;  %vm689_vm3 = vcmp.eq.f32.partialorder %v684_v15, 0.0 }
 0x295   : > { %v1859_v16 = vpop.eup %1858 }
 0x296   : > { %v686_v17 = vmul.f32 %v1859_v16, %v684_v15 }
 0x298   : > { %v688_v19 = vsel %vm687_vm2, %v684_v15, %v686_v17 }
 0x299   : > { %v691_v20 = vsel %vm689_vm3, %v690_v18, %v688_v19 }
 0x29a   : > { %v692_v21 = vadd.f32 1e-06, %v691_v20 }
 0x29c   : > { %1860 = vrcp.f32 %v692_v21 }
 0x2a6   : > { %v1861_v23 = vpop.eup %1860 }
 0x2a7   : > { %v700_v24 = vmul.f32 %v1861_v23, %v1563_v22 }
 0x2a9   : > { %v701_v26 = vmul.f32 %v700_v24, %v679_v4 }
 0x2ab   : > { %v708_v27 = vadd.f32 %v1564_v25, %v701_v26 }
 0x2ad   : > { %v709_v28 = vpack.c.bf16 %v708_v27, %v708_v27 }
 0x2af   : > { %1624 = vmatmul.mubr.msk.bf16.vlgmr.msra.gmra.mrb[0].mxu1 %vm624_vm0, %v709_v28 }
 0x2b0   : > { %1635 = vmatprep.mubr.msk.bf16.mxu1 %vm2310_vm1, %v2309_v8 }
 0x2c1   : > { %v902_v41 = vpop.permute.xlu1 %901  ;;  %v1013_v48 = vpop.permute.xlu0 %1012 }
 0x2c2   : > { %v907_v47 = vsel %vm780_vm5, %v902_v41, 0  ;;  %v1018_v50 = vsel %vm780_vm5, %v1013_v48, 0 }
 0x382   : > { %v770_v40 = vpop.f32.mrb[0].mxu1 }
 0x383   : > { %v771_v42 = vadd.f32 %v1565_v39, %v770_v40  ;;  %v1625_v43 = vpop.f32.mrb[1].mxu1 }
 0x384   : > { %v773_v44 = vpop.f32.mrb[2].mxu1 }
 0x385   : > { %v776_v45 = vpack.c.bf16 %v771_v42, %v771_v42  ;;  %v1626_v46 = vpop.f32.mrb[3].mxu1 }
 0x387   : > { %899 = vrot.lane.b32.xlu1 %v776_v45, %s2311_s23  ;;  %1630 = vmatmul.mubr.msk.bf16.vlgmr.msra.gmra.mrb[4].mxu0 %vm780_vm5, %v776_v45  ;;  %s2884_s23 = scalar_lea.hbm %s3016_s30, %s1583_s0 }
 0x388   : > { %1640 = vmatpush3.bf16.xpose.msra.mxu0 %v907_v47  ;;  %1641 = vmatprep.mubr.msk.bf16.mxu0 %vm2310_vm1, %v2309_v8 }
 0x389   : > { %1651 = vmatprep.subr.bf16.mxu0 %v2309_v8 }
 0x38b   : > { %1010 = vrot.lane.b32.xlu1 %v776_v45, %s2312_s25  ;;  %s2192_s25 = scalar_lea.vmem %s2886_s15, 128 }
 0x38c   : > { %p2193_p10 = scmp.ne.s32.totalorder %s2886_s15, %s2192_s25 }
 0x38e   : > { %p2194_p1 = pnand %p2193_p10, %p3017_p11 }
 0x38f   : > { %1123 = vrot.lane.b32.xlu1 %v2815_v37, %s2313_s29 }
 0x390   : > { %p2195_p5 = pneg %p2194_p1 }
 0x393   : > { %1121 = vrot.lane.b32.xlu1 %v776_v45, %s2313_s29  ;;  %s2322_s29 = smov [#allocation21]  }
 0x3f9   : > { %v900_v49 = vpop.permute.xlu1 %899 }
 0x3fa   : > { %1642 = vmatmul.mubr.msk.bf16.vlgmr.msra.gmra.mrb[8].mxu0 %vm780_vm5, %v900_v49 }
 0x3fb   : > { %1652 = vmatpush3.bf16.xpose.msra.mxu0 %v1018_v50  ;;  %1653 = vmatprep.mubr.msk.bf16.mxu0 %vm2310_vm1, %v2309_v8 }
 0x3fc   : > { %1663 = vmatprep.subr.bf16.mxu0 %v2309_v8 }
 0x3fd   : > { %v1011_v51 = vpop.permute.xlu1 %1010 }
 0x401   : > { %v1124_v52 = vpop.permute.xlu1 %1123 }
 0x402   : > { %v1129_v53 = vsel %vm780_vm5, %v1124_v52, 0  ;;  %1654 = vmatmul.mubr.msk.bf16.vlgmr.msra.gmra.mrb[12].mxu0 %vm780_vm5, %v1011_v51 }
 0x403   : > { %1664 = vmatpush3.bf16.xpose.msra.mxu0 %v1129_v53  ;;  %1665 = vmatprep.mubr.msk.bf16.mxu0 %vm2310_vm1, %v2309_v8 }
 0x404   : > { %1675 = vmatprep.subr.bf16.mxu0 %v2309_v8 }
 0x405   : > { %v1122_v54 = vpop.permute.xlu1 %1121 }
 0x40a   : > { %1666 = vmatmul.mubr.msk.bf16.vlgmr.msra.gmra.mrb[16].mxu0 %vm780_vm5, %v1122_v54 }
 0x40b   : > { %1679 = vmatprep.mubr.msk.bf16.mxu0 %vm2310_vm1, %v2309_v8 }
 0x45a   : > { %v821_v62 = vpop.f32.mrb[4].mxu0 }
 0x45b   : > { %v833_v63 = vsel %vm832_vm7, %v821_v62, -1e+30  ;;  %v1631_v1 = vpop.f32.mrb[5].mxu0 }
 0x45c   : > { %v824_v2 = vpop.f32.mrb[6].mxu0  ;;  %v834_v3 = vsel %vm780_vm5, %v833_v63, -inf }
 0x45d   : > { %835 = vmax.xlane.f32.xlu1 %v834_v3  ;;  %v1632_v4 = vpop.f32.mrb[7].mxu0 }
 0x4cd   : > { %v943_v5 = vpop.f32.mrb[8].mxu0 }
 0x4ce   : > { %v949_v6 = vsel %vm832_vm7, %v943_v5, -1e+30  ;;  %v1643_v7 = vpop.f32.mrb[9].mxu0 }
 0x4cf   : > { %v946_v9 = vpop.f32.mrb[10].mxu0  ;;  %v950_v10 = vsel %vm780_vm5, %v949_v6, -inf }
 0x4d0   : > { %951 = vmax.xlane.f32.xlu0 %v950_v10  ;;  %v1644_v11 = vpop.f32.mrb[11].mxu0 }
 0x4d5   : > { %v1054_v12 = vpop.f32.mrb[12].mxu0 }
 0x4d6   : > { %v1060_v13 = vsel %vm832_vm7, %v1054_v12, -1e+30  ;;  %v1655_v14 = vpop.f32.mrb[13].mxu0 }
 0x4d7   : > { %v1057_v15 = vpop.f32.mrb[14].mxu0  ;;  %v1061_v16 = vsel %vm780_vm5, %v1060_v13, -inf  ;;  %v1856_v14 = vld [vmem:[#allocation15] sm:$0xff]  }
 0x4d8   : > { %1062 = vmax.xlane.f32.xlu1 %v1061_v16  ;;  %v1656_v17 = vpop.f32.mrb[15].mxu0  ;;  %1676 = vmatpush3.bf16.msra.mxu0 %v1856_v14  ;;  %v1857_v15 = vld [vmem:[#allocation15 + $0x8] sm:$0xff]  }
 0x4d9   : > { %1677 = vmatprep.subr.bf16.mxu0 %v2309_v8 }
 0x4dc   : > { %1678 = vmatpush3.bf16.msra.mxu0 %v1857_v15 }
 0x4dd   : > { %v1165_v18 = vpop.f32.mrb[16].mxu0 }
 0x4de   : > { %v1171_v19 = vsel %vm832_vm7, %v1165_v18, -1e+30  ;;  %v1667_v20 = vpop.f32.mrb[17].mxu0 }
 0x4df   : > { %v1168_v21 = vpop.f32.mrb[18].mxu0  ;;  %v1172_v22 = vsel %vm780_vm5, %v1171_v19, -inf }
 0x4e0   : > { %1173 = vmax.xlane.f32.xlu1 %v1172_v22  ;;  %v1668_v23 = vpop.f32.mrb[19].mxu0 }
 0x4ea   : > { %v836_v24 = vpop.xlane.xlu1 %835 }
 0x4eb   : > { %v837_v25 = vsub.f32 %v833_v63, %v836_v24 }
 0x4ed   : > { %v838_v26 = vmul.f32 1.442695, %v837_v25 }
 0x4ef   : > { %1862 = vpow2.f32 %v838_v26 }
 0x4f9   : > { %v1863_v27 = vpop.eup %1862 }
 0x4fa   : > { %v840_v28 = vsel %vm780_vm5, %v1863_v27, 0.0 }
 0x4fb   : > { %841 = vadd.xlane.f32.xlu0 %v840_v28 }
 0x55d   : > { %v952_v29 = vpop.xlane.xlu0 %951 }
 0x55e   : > { %v953_v30 = vsub.f32 %v949_v6, %v952_v29 }
 0x560   : > { %v954_v31 = vmul.f32 1.442695, %v953_v30 }
 0x562   : > { %1864 = vpow2.f32 %v954_v31  ;;  %v1581_v31 = vld [vmem:[#allocation17] ss:$0 sm:$0xff] }
 0x565   : > { %v1063_v32 = vpop.xlane.xlu1 %1062 }
 0x566   : > { %v1064_v33 = vsub.f32 %v1060_v13, %v1063_v32 }
 0x568   : > { %v1065_v34 = vmul.f32 1.442695, %v1064_v33 }
 0x56a   : > { %1866 = vpow2.f32 %v1065_v34 }
 0x56c   : > { %v1865_v35 = vpop.eup %1864 }
 0x56d   : > { %v956_v36 = vsel %vm780_vm5, %v1865_v35, 0.0  ;;  %v1174_v40 = vpop.xlane.xlu1 %1173 }
 0x56e   : > { %957 = vadd.xlane.f32.xlu1 %v956_v36  ;;  %v1175_v41 = vsub.f32 %v1171_v19, %v1174_v40 }
 0x570   : > { %v1176_v42 = vmul.f32 1.442695, %v1175_v41 }
 0x572   : > { %1868 = vpow2.f32 %v1176_v42 }
 0x574   : > { %v1867_v38 = vpop.eup %1866 }
 0x575   : > { %v1067_v39 = vsel %vm780_vm5, %v1867_v38, 0.0 }
 0x576   : > { %1068 = vadd.xlane.f32.xlu0 %v1067_v39 }
 0x57c   : > { %v1869_v43 = vpop.eup %1868 }
 0x57d   : > { %v1178_v44 = vsel %vm780_vm5, %v1869_v43, 0.0 }
 0x57f   : > { %962 = vrot.lane.b32.xlu1 %v2815_v37, %s2315_s5  ;;  %s2196_s5 = sshll.u32 %s2322_s29, 4  ;;  %s2197_s5 = int_to_ptr.vmem [resolvable:$false] %s2196_s5 }
 0x580   : > { %p2199_p0 = scmp.lt.s32.totalorder %s2886_s15, %s2197_s5 }
 0x588   : > { %v842_v45 = vpop.xlane.xlu0 %841 }
 0x589   : > { %1870 = vrcp.f32 %v842_v45 }
 0x58c   : > { %849 = vrot.lane.b32.xlu0 %v2815_v37, %s2316_s2  ;;  %s2198_s2 = scalar_lea.vmem %s2197_s5, 256 }
 0x58d   : > { %p2200_p6 = scmp.lt.s32.totalorder %s2198_s2, %s2192_s25 }
 0x58f   : > { %p2201_p7 = por %p2200_p6, %p2199_p0 }
 0x590   : > { %1184 = vrot.lane.b32.xlu0 %v2815_v37, %s2317_s27 }
 0x591   : > { %p2202_p3 = pnand %p2201_p7, %p2195_p5 }
 0x593   : > { %v1871_v47 = vpop.eup %1870 }
 0x594   : > { %v844_v49 = vmul.f32 %v1871_v47, %v1863_v27 }
 0x596   : > { %v845_v53 = vpack.c.bf16 %v844_v49, %v844_v49 }
 0x5a3   : > { %1179 = vadd.xlane.f32.xlu1 %v1178_v44 }
 0x5b4   : > { %1073 = vrot.lane.b32.xlu1 %v2815_v37, %s2318_s26 }
 0x5fb   : > { %v958_v46 = vpop.xlane.xlu1 %957 }
 0x5fc   : > { %1872 = vrcp.f32 %v958_v46 }
 0x5ff   : > { %v963_v52 = vpop.permute.xlu1 %962 }
 0x600   : > { %v968_v55 = vsel %vm854_vm8, %v963_v52, 0 }
 0x603   : > { %v1069_v48 = vpop.xlane.xlu0 %1068 }
 0x604   : > { %1874 = vrcp.f32 %v1069_v48 }
 0x606   : > { %v1873_v54 = vpop.eup %1872 }
 0x607   : > { %v850_v50 = vpop.permute.xlu0 %849  ;;  %v960_v37 = vmul.f32 %v1873_v54, %v1865_v35 }
 0x608   : > { %v856_v51 = vsel %vm854_vm8, %v850_v50, 0 }
 0x609   : > { %1634 = vmatpush3.bf16.msra.mxu1 %v856_v51  ;;  %v961_v56 = vpack.c.bf16 %v960_v37, %v960_v37 }
 0x60a   : > { %1645 = vmatprep.subr.bf16.mxu1 %v2309_v8 }
 0x60b   : > { %v1185_v62 = vpop.permute.xlu0 %1184 }
 0x60c   : > { %1636 = vmatmul.mubr.msk.bf16.vlgmr.msra.gmra.mrb[4].mxu1 %vm780_vm5, %v845_v53  ;;  %v1190_v1 = vsel %vm854_vm8, %v1185_v62, 0 }
 0x60d   : > { %1646 = vmatpush3.bf16.msra.mxu1 %v968_v55  ;;  %1647 = vmatprep.mubr.msk.bf16.mxu1 %vm2310_vm1, %v2309_v8 }
 0x60e   : > { %1657 = vmatprep.subr.bf16.mxu1 %v2309_v8  ;;  %v1875_v57 = vpop.eup %1874 }
 0x60f   : > { %v1071_v59 = vmul.f32 %v1875_v57, %v1867_v38 }
 0x611   : > { %v1072_v63 = vpack.c.bf16 %v1071_v59, %v1071_v59 }
 0x614   : > { %1648 = vmatmul.mubr.msk.bf16.vlgmr.msra.gmra.mrb[8].mxu1 %vm780_vm5, %v961_v56 }
 0x615   : > { %1659 = vmatprep.mubr.msk.bf16.mxu1 %vm2310_vm1, %v2309_v8 }
 0x630   : > { %v1180_v58 = vpop.xlane.xlu1 %1179 }
 0x631   : > { %1876 = vrcp.f32 %v1180_v58 }
 0x634   : > { %v1074_v60 = vpop.permute.xlu1 %1073 }
 0x635   : > { %v1079_v61 = vsel %vm854_vm8, %v1074_v60, 0 }
 0x636   : > { %1658 = vmatpush3.bf16.msra.mxu1 %v1079_v61 }
 0x637   : > { %1669 = vmatprep.subr.bf16.mxu1 %v2309_v8 }
 0x639   : > { %1660 = vmatmul.mubr.msk.bf16.vlgmr.msra.gmra.mrb[12].mxu1 %vm780_vm5, %v1072_v63 }
 0x63a   : > { %1670 = vmatpush3.bf16.msra.mxu1 %v1190_v1  ;;  %1671 = vmatprep.mubr.msk.bf16.mxu1 %vm2310_vm1, %v2309_v8 }
 0x63b   : > { %v1877_v2 = vpop.eup %1876 }
 0x63c   : > { %v1182_v3 = vmul.f32 %v1877_v2, %v1869_v43 }
 0x63e   : > { %v1183_v4 = vpack.c.bf16 %v1182_v3, %v1182_v3 }
 0x641   : > { %1672 = vmatmul.mubr.msk.bf16.vlgmr.msra.gmra.mrb[16].mxu1 %vm780_vm5, %v1183_v4 }
 0x6df   : > { %v892_v5 = vpop.f32.mrb[4].mxu1 }
 0x6e0   : > { %v1637_v6 = vpop.f32.mrb[5].mxu1 }
 0x6e1   : > { %v895_v7 = vpop.f32.mrb[6].mxu1 }
 0x6e2   : > { %v1638_v9 = vpop.f32.mrb[7].mxu1 }
 0x6e7   : > { %v1004_v10 = vpop.f32.mrb[8].mxu1 }
 0x6e8   : > { %1233 = vrot.lane.b32.xlu1 %v1004_v10, %s2319_s14  ;;  %v1649_v11 = vpop.f32.mrb[9].mxu1 }
 0x6e9   : > { %v1007_v12 = vpop.f32.mrb[10].mxu1 }
 0x6ea   : > { %v1650_v13 = vpop.f32.mrb[11].mxu1 }
 0x70c   : > { %v1115_v16 = vpop.f32.mrb[12].mxu1 }
 0x70d   : > { %1237 = vrot.lane.b32.xlu0 %v1115_v16, %s2320_s1  ;;  %v1661_v17 = vpop.f32.mrb[13].mxu1 }
 0x70e   : > { %v1118_v18 = vpop.f32.mrb[14].mxu1 }
 0x70f   : > { %v1662_v19 = vpop.f32.mrb[15].mxu1 }
 0x714   : > { %v1226_v20 = vpop.f32.mrb[16].mxu1 }
 0x715   : > { %1241 = vrot.lane.b32.xlu1 %v1226_v20, %s2321_s3  ;;  %v1673_v21 = vpop.f32.mrb[17].mxu1 }
 0x716   : > { %v1229_v22 = vpop.f32.mrb[18].mxu1 }
 0x717   : > { %v1674_v23 = vpop.f32.mrb[19].mxu1 }
 0x75a   : > { %v1234_v24 = vpop.permute.xlu1 %1233 }
 0x75b   : > { %v1244_v8 = vsel %vm780_vm5, %v892_v5, %v1234_v24 }
 0x77f   : > { %v1238_v25 = vpop.permute.xlu0 %1237 }
 0x780   : > { %v1246_v26 = vsel %vm1245_vm9, %v1244_v8, %v1238_v25 }
 0x787   : > { %v1242_v27 = vpop.permute.xlu1 %1241 }
 0x788   : > { %v1248_v28 = vsel %vm1247_vm10, %v1246_v26, %v1242_v27 }
 0x789   : > { %v1249_v29 = vpack.c.bf16 %v1248_v28, %v1248_v28 }
 0x78b   : > { %1680 = vmatmul.mubr.msk.bf16.vlgmr.msra.gmra.mrb[20].mxu0 %vm624_vm0, %v1249_v29 }
 0x85e   : > { %v1303_v30 = vpop.f32.mrb[20].mxu0 }
 0x85f   : > { %v1309_v32 = vadd.f32 %v1303_v30, %v2793_v0  ;;  %v1681_v33 = vpop.f32.mrb[21].mxu0 }
 0x860   : > { %v1306_v34 = vpop.f32.mrb[22].mxu0 }
 0x861   : > { %v1317_v35 = vadd.f32 %v1581_v31, %v1309_v32  ;;  %v1682_v36 = vpop.f32.mrb[23].mxu0 }
 0x863   : > { %1318 = vst.msk [vmem:[%s592_s12] sm:$0xff] %vm624_vm0, %v1317_v35 }
 0x864   : > { %2205 = shalt.err (!%p2202_p3)
}
 0x865   : > { %s2206_s9 = scalar_lea.hbm %s2884_s23, 128  ;;  %s2210_s14 = scalar_lea.hbm %s3016_s30, 256 }
 0x866   : > { %p2207_p13 = scmp.ne.s32.totalorder %s2884_s23, %s2206_s9  ;;  %p2211_p8 = scmp.lt.u32.totalorder %s2884_s23, %s3016_s30 }
 0x867   : > { %p2212_p12 = scmp.lt.u32.totalorder %s2210_s14, %s2206_s9  ;;  %p2214_p10 = scmp.lt.u32.totalorder %s2206_s9, %s2884_s23 }
 0x868   : > { %p2208_p2 = pnand %p2207_p13, %p3017_p11 }
 0x869   : > { %p2213_p9 = por %p2212_p12, %p2211_p8 }
 0x86a   : > { %p2209_p4 = pneg %p2208_p2 }
 0x86b   : > { %p2215_p1 = por %p2214_p10, %p2213_p9 }
 0x86d   : > { %p2216_p5 = pnand %p2215_p1, %p2209_p4 }
 0x86f   : > { %2219 = shalt.err (!%p2216_p5)
}
 0x870   : > { %1721 = dma.vmem_to_hbm [thread:$0]  (%p3017_p11), %s2886_s15, 128, %s2884_s23, %s1320_s11  }
 0x871 PF: > { %s1346_s19 = sand.u32 1, %s2274_s17   ;;  %p3018_p0 = scmp.ne.s32.totalorder %s2990_s13, 0 }
 0x872   : > { %p3019_p6 = scmp.ge.s32.totalorder %s2294_s22, 2  ;;  %s1347_s0 = scalar_lea.sflag [#allocation5], %s1346_s19 }
 0x874   : > { %p1759_p7 = pnand %p3019_p6, %p3018_p0 }
 0x876   : > { %2269 = dma.done.wait (!%p1759_p7), %s1347_s0, 128  }
 0x877   : > { %2271 = vsyncadd (!%p1759_p7), %s1347_s0, 4294967168  ;;  %s34_s22 = sadd.s32 1, %s2294_s22   ;;  %s3020_s12 = sld [smem:[#allocation29_spill]] }
 0x878   : > { %p31_p3 = scmp.ge.s32.totalorder %s34_s22, 4   ;;  %s3021_s19 = sld [smem:[#allocation33_spill]] }
 0x879   : > { %s3022_s28 = sld [smem:[#allocation32_spill]]  ;;  %s3023_s17 = smov %s2278_s18 }
 0x87a   : > { %s3025_s20 = smov %s2290_s21  ;;  %33 = sbr.rel (!%p31_p3) target bundleno = 21 (0x15), region = 169 }
 0x87d   : > { %s3024_s18 = smov %s3020_s12 }
 0x87f   : > { %s3026_s21 = smov %s3022_s28 }
 0x881   :  { %1352 = vsyncpa [#allocation4], 1 }
 0x882   :  { %1354 = vsyncpa [#allocation4 + $0x1], 1 }
 0x883   :  { %1355 = vsyncpa [#allocation7], 1 }
 0x884   :  { %1357 = vsyncpa [#allocation7 + $0x1], 1 }
 0x885   :  { %1358 = vsyncpa [#allocation10], 1 }
 0x886   :  { %1359 = vsyncpa [#allocation13], 1 }
 0x887   :  { %1360 = vsyncpa [#allocation16], 1 }
 0x888   :  { %1361 = vsyncpa [#allocation19], 1 }
 0x889   :  { %1362 = vsyncpa [#allocation5], 1 }
 0x88a   :  { %1364 = vsyncpa [#allocation5 + $0x1], 1 }

// kernel: _lambda_.9
= control target key start
LH: loop header
LB: loop body
LE: loop exit
PB: predicated region body
PF: predicated region fallthrough
CT: control target
= control target key end

     0   :  { %12 = vsyncpa [#allocation3], 0  ;;  %s3928_s0 = inlined_call_operand.hbm [shape: f32[16,32], index: 0, kind: input, shape index: {}]   ;;  %s3929_s1 = inlined_call_operand.hbm [shape: f32[1,32], index: 1, kind: input, shape index: {}]   ;;  %s3930_s2 = inlined_call_operand.hbm [shape: f32[1,32], index: 2, kind: input, shape index: {}]   ;;  %s3931_s3 = inlined_call_operand.hbm [shape: bf16[32,2048], index: 3, kind: input, shape index: {}]   ;;  %s3932_s4 = inlined_call_operand.hbm [shape: f32[1,2048], index: 4, kind: input, shape index: {}]   ;;  %s3933_s5 = inlined_call_operand.hbm [shape: bf16[2048,32], index: 5, kind: input, shape index: {}]   ;;  %s3934_s6 = inlined_call_operand.hbm [shape: f32[1,32], index: 6, kind: input, shape index: {}]   ;;  %s3935_s7 = inlined_call_operand.hbm [shape: f32[16,32], index: 7, kind: output, shape index: {}]  }
   0x1   :  { %14 = vsyncpa [#allocation3 + $0x1], 0 }
   0x2   :  { %15 = vsyncpa [#allocation6], 0 }
   0x3   :  { %16 = vsyncpa [#allocation9], 0 }
   0x4   :  { %17 = vsyncpa [#allocation12], 0 }
   0x5   :  { %18 = vsyncpa [#allocation4], 0 }
   0x6   :  { %20 = vsyncpa [#allocation4 + $0x1], 0  ;;  %s3492_s24 = smov 0   ;;  %s3494_s25 = smov 0  }
   0x7   :  { %s3496_s26 = smov 0   ;;  %s3498_s27 = smov 0  }
   0x8 LB: > { %s3440_s28 = smov [#allocation5]   ;;  %s3513_s30 = sadd.s32 4294967295, %s3438_s27   ;;  %s3438_s27 = sphi %s3498_s27, %s3960_s27   ;;  %s3434_s26 = sphi %s3496_s26, %s3959_s26   ;;  %s3430_s25 = sphi %s3494_s25, %s3958_s25   ;;  %s3426_s24 = sphi %s3492_s24, %s3957_s24  }
   0x9   : > { %s222_s29 = sshll.u32 %s3440_s28, 4  ;;  %p2548_p0 = scmp.ge.s32.totalorder %s3438_s27, 1  ;;  %s3518_s29 = int_to_ptr.vmem [resolvable:$true] %s222_s29 }
   0xa   : > { %p3936_p1 = scmp.eq.s32.totalorder %s3513_s30, 0  ;;  %p209_p2 = scmp.lt.s32.totalorder %s3438_s27, 3 }
   0xb   : > { %s3441_s9 = smov [#allocation8]   ;;  %s3442_s12 = smov [#allocation11]  }
   0xc   : > { %p3520_p3 = pnand %p2548_p0, %p209_p2  ;;  %s243_s10 = sshll.u32 %s3441_s9, 4  ;;  %s3527_s10 = int_to_ptr.vmem [resolvable:$true] %s243_s10 }
   0xd   : > { %s267_s13 = sshll.u32 %s3442_s12, 4  ;;  %s3162_s16 = scalar_lea.hbm %s3929_s1, 16  ;;  %s3535_s13 = int_to_ptr.vmem [resolvable:$true] %s267_s13 }
   0xe   : > { %s3939_s8 = scalar_select %p3520_p3, 1, 0 }
   0xf   : > { %p2946_p5 = pneg %p3520_p3  ;;  %p3163_p7 = scmp.ne.s32.totalorder %s3929_s1, %s3162_s16 }
  0x10   : > { %p3169_p11 = scmp.lt.u32.totalorder %s3162_s16, %s3929_s1 }
  0x11   : > { %p3531_p6 = pnand %p2946_p5, %p3936_p1 }
  0x13   : > { %p3545_p8 = pneg %p3531_p6 }
  0x15   : > { %p3165_p9 = pnand %p3545_p8, %p3163_p7 }
  0x17   : > { %p3166_p10 = pneg %p3165_p9 }
  0x19   : > { %p3171_p12 = pnand %p3169_p11, %p3166_p10 }
  0x1b   : > { %3174 = shalt.err (!%p3171_p12)
}
  0x1c   : > { %s3175_s22 = scalar_lea.vmem %s3518_s29, 16  ;;  %s3182_s23 = scalar_lea.vmem %s3518_s29, 32 }
  0x1d   : > { %p3176_p13 = scmp.ne.s32.totalorder %s3518_s29, %s3175_s22  ;;  %p3183_p5 = scmp.lt.s32.totalorder %s3518_s29, %s3518_s29 }
  0x1e   : > { %p3184_p7 = scmp.lt.s32.totalorder %s3182_s23, %s3175_s22 }
  0x1f   : > { %p3178_p0 = pnand %p3176_p13, %p3545_p8 }
  0x20   : > { %p3185_p9 = por %p3184_p7, %p3183_p5 }
  0x21   : > { %p3179_p2 = pneg %p3178_p0 }
  0x23   : > { %p3186_p4 = pnand %p3185_p9, %p3179_p2 }
  0x25   : > { %3189 = shalt.err (!%p3186_p4)
}
  0x26   : > { %2949 = dma.hbm_to_vmem [thread:$0]  (!%p3531_p6), %s3929_s1, 16, %s3518_s29, [#allocation6]  }
  0x27   : > { %s3190_s15 = scalar_lea.hbm %s3931_s3, 4096 }
  0x28   : > { %p3191_p10 = scmp.ne.s32.totalorder %s3931_s3, %s3190_s15  ;;  %p3197_p4 = scmp.lt.u32.totalorder %s3190_s15, %s3931_s3 }
  0x2a   : > { %p3193_p11 = pnand %p3191_p10, %p3545_p8 }
  0x2c   : > { %p3194_p12 = pneg %p3193_p11 }
  0x2e   : > { %p3199_p13 = pnand %p3197_p4, %p3194_p12 }
  0x30   : > { %3202 = shalt.err (!%p3199_p13)
}
  0x31   : > { %s3203_s29 = scalar_lea.vmem %s3527_s10, 4096  ;;  %p3211_p7 = scmp.lt.s32.totalorder %s3527_s10, %s3527_s10 }
  0x32   : > { %p3204_p0 = scmp.ne.s32.totalorder %s3527_s10, %s3203_s29  ;;  %p3212_p9 = scmp.lt.s32.totalorder %s3203_s29, %s3203_s29 }
  0x34   : > { %p3206_p2 = pnand %p3204_p0, %p3545_p8  ;;  %p3213_p10 = por %p3212_p9, %p3211_p7 }
  0x36   : > { %p3207_p5 = pneg %p3206_p2 }
  0x38   : > { %p3214_p11 = pnand %p3213_p10, %p3207_p5 }
  0x3a   : > { %3217 = shalt.err (!%p3214_p11)
}
  0x3b   : > { %s3443_s21 = smov 1024   ;;  %s3444_s22 = smov 64  }
  0x3c   : > { %2955 = dma.hbm_to_vmem [thread:$0]  (!%p3531_p6), %s3931_s3, 4096, %s3527_s10, [#allocation9], %s3443_s21, %s3443_s21, %s3444_s22  }
  0x3d   : > { %s3218_s14 = scalar_lea.hbm %s3933_s5, 16384 }
  0x3e   : > { %p3219_p12 = scmp.ne.s32.totalorder %s3933_s5, %s3218_s14  ;;  %p3225_p0 = scmp.lt.u32.totalorder %s3218_s14, %s3933_s5 }
  0x40   : > { %p3221_p4 = pnand %p3219_p12, %p3545_p8 }
  0x42   : > { %p3222_p13 = pneg %p3221_p4 }
  0x44   : > { %p3227_p2 = pnand %p3225_p0, %p3222_p13 }
  0x46   : > { %3230 = shalt.err (!%p3227_p2)
}
  0x47   : > { %s3231_s10 = scalar_lea.vmem %s3535_s13, 16384  ;;  %p3239_p10 = scmp.lt.s32.totalorder %s3535_s13, %s3535_s13 }
  0x48   : > { %p3232_p5 = scmp.ne.s32.totalorder %s3535_s13, %s3231_s10  ;;  %p3240_p11 = scmp.lt.s32.totalorder %s3231_s10, %s3231_s10 }
  0x4a   : > { %p3234_p7 = pnand %p3232_p5, %p3545_p8  ;;  %p3241_p12 = por %p3240_p11, %p3239_p10 }
  0x4c   : > { %p3235_p9 = pneg %p3234_p7 }
  0x4e   : > { %p3242_p4 = pnand %p3241_p12, %p3235_p9 }
  0x50   : > { %3245 = shalt.err (!%p3242_p4)
}
  0x51   : > { %s3445_s20 = smov 4   ;;  %s3446_s23 = smov [#allocation7]  }
  0x52   : > { %2961 = dma.hbm_to_vmem [thread:$0]  (!%p3531_p6), %s3933_s5, 16384, %s3535_s13, [#allocation12], %s3444_s22, %s3444_s22, %s3445_s20  }
  0x53   : > { %s233_s28 = sshll.u32 %s3446_s23, 4  ;;  %s3447_s9 = smov [#allocation10]   ;;  %s234_s28 = int_to_ptr.vmem [resolvable:$true] %s233_s28 }
  0x54   : > { %s257_s12 = sshll.u32 %s3447_s9, 4  ;;  %s3246_s16 = scalar_lea.hbm %s3930_s2, 16  ;;  %s3613_s12 = int_to_ptr.vmem [resolvable:$true] %s257_s12 }
  0x55   : > { %p3247_p13 = scmp.ne.s32.totalorder %s3930_s2, %s3246_s16  ;;  %p3253_p5 = scmp.lt.u32.totalorder %s3246_s16, %s3930_s2 }
  0x57   : > { %p3249_p0 = pnand %p3247_p13, %p3545_p8 }
  0x59   : > { %p3250_p2 = pneg %p3249_p0 }
  0x5b   : > { %p3255_p7 = pnand %p3253_p5, %p3250_p2 }
  0x5d   : > { %3258 = shalt.err (!%p3255_p7)
}
  0x5e   : > { %s3259_s22 = scalar_lea.vmem %s234_s28, 16  ;;  %s3266_s20 = scalar_lea.vmem %s234_s28, 32 }
  0x5f   : > { %p3260_p9 = scmp.ne.s32.totalorder %s234_s28, %s3259_s22  ;;  %p3267_p12 = scmp.lt.s32.totalorder %s234_s28, %s234_s28 }
  0x60   : > { %p3268_p4 = scmp.lt.s32.totalorder %s3266_s20, %s3259_s22 }
  0x61   : > { %p3262_p10 = pnand %p3260_p9, %p3545_p8 }
  0x62   : > { %p3269_p1 = por %p3268_p4, %p3267_p12 }
  0x63   : > { %p3263_p11 = pneg %p3262_p10 }
  0x65   : > { %p3270_p3 = pnand %p3269_p1, %p3263_p11 }
  0x67   : > { %3273 = shalt.err (!%p3270_p3)
}
  0x68   : > { %2952 = dma.hbm_to_vmem [thread:$0]  (!%p3531_p6), %s3930_s2, 16, %s234_s28, [#allocation6]  }
  0x69   : > { %s3274_s14 = scalar_lea.hbm %s3932_s4, 256 }
  0x6a   : > { %p3275_p13 = scmp.ne.s32.totalorder %s3932_s4, %s3274_s14  ;;  %p3281_p1 = scmp.lt.u32.totalorder %s3274_s14, %s3932_s4 }
  0x6c   : > { %p3277_p0 = pnand %p3275_p13, %p3545_p8 }
  0x6e   : > { %p3278_p2 = pneg %p3277_p0 }
  0x70   : > { %p3283_p3 = pnand %p3281_p1, %p3278_p2 }
  0x72   : > { %3286 = shalt.err (!%p3283_p3)
}
  0x73   : > { %s3287_s28 = scalar_lea.vmem %s3613_s12, 256  ;;  %p3295_p10 = scmp.lt.s32.totalorder %s3613_s12, %s3613_s12 }
  0x74   : > { %p3288_p5 = scmp.ne.s32.totalorder %s3613_s12, %s3287_s28  ;;  %p3296_p11 = scmp.lt.s32.totalorder %s3287_s28, %s3287_s28 }
  0x76   : > { %p3290_p7 = pnand %p3288_p5, %p3545_p8  ;;  %p3297_p12 = por %p3296_p11, %p3295_p10 }
  0x78   : > { %p3291_p9 = pneg %p3290_p7 }
  0x7a   : > { %p3298_p4 = pnand %p3297_p12, %p3291_p9 }
  0x7c   : > { %3301 = shalt.err (!%p3298_p4)
}
  0x7d   : > { %2958 = dma.hbm_to_vmem [thread:$0]  (!%p3531_p6), %s3932_s4, 256, %s3613_s12, [#allocation9]  }
  0x7e   : > { %s3448_s22 = smov [#allocation13]   ;;  %s3302_s23 = scalar_lea.hbm %s3934_s6, 16 }
  0x7f   : > { %s281_s20 = sshll.u32 %s3448_s22, 4  ;;  %p3303_p13 = scmp.ne.s32.totalorder %s3934_s6, %s3302_s23  ;;  %s282_s20 = int_to_ptr.vmem [resolvable:$true] %s281_s20 }
  0x80   : > { %p3309_p1 = scmp.lt.u32.totalorder %s3302_s23, %s3934_s6 }
  0x81   : > { %p3305_p0 = pnand %p3303_p13, %p3545_p8 }
  0x83   : > { %p3306_p2 = pneg %p3305_p0 }
  0x85   : > { %p3311_p3 = pnand %p3309_p1, %p3306_p2 }
  0x87   : > { %3314 = shalt.err (!%p3311_p3)
}
  0x88   : > { %s3315_s12 = scalar_lea.vmem %s282_s20, 16  ;;  %s3322_s17 = scalar_lea.vmem %s282_s20, 32 }
  0x89   : > { %p3316_p5 = scmp.ne.s32.totalorder %s282_s20, %s3315_s12  ;;  %p3323_p10 = scmp.lt.s32.totalorder %s282_s20, %s282_s20 }
  0x8a   : > { %p3324_p11 = scmp.lt.s32.totalorder %s3322_s17, %s3315_s12 }
  0x8b   : > { %p3318_p7 = pnand %p3316_p5, %p3545_p8 }
  0x8c   : > { %p3325_p12 = por %p3324_p11, %p3323_p10 }
  0x8d   : > { %p3319_p9 = pneg %p3318_p7 }
  0x8f   : > { %p3326_p4 = pnand %p3325_p12, %p3319_p9 }
  0x91   : > { %3329 = shalt.err (!%p3326_p4)
}
  0x92   : > { %2964 = dma.hbm_to_vmem [thread:$0]  (!%p3531_p6), %s3934_s6, 16, %s282_s20, [#allocation12]  }
  0x93   : > { %s2547_s19 = sadd.s32 4294967294, %s3438_s27   ;;  %s3676_s11 = sadd.s32 1, %s3438_s27  }
  0x94   : > { %s33_s10 = sadd.s32 1, %s3434_s26  ;;  %s30_s13 = ssub.s32 %s3438_s27, %s3676_s11 }
  0x95   : > { %p40_p8 = scmp.ne.s32.totalorder %s3434_s26, %s3430_s25  ;;  %p31_p13 = scmp.eq.s32.totalorder %s30_s13, 0 }
  0x96   : > { %p41_p0 = scmp.eq.s32.totalorder %s3438_s27, 0  ;;  %p46_p2 = scmp.ne.s32.totalorder %s3430_s25, %s3426_s24 }
  0x97   : > { %p196_p1 = scmp.eq.s32.totalorder %s3513_s30, 1  ;;  %p3942_p5 = scmp.eq.s32.totalorder %s3513_s30, 0 }
  0x98   : > { %s3688_s22 = scalar_select %p31_p13, %s3434_s26, %s33_s10  }
  0x99   : > { %p42_p3 = por %p41_p0, %p40_p8  ;;  %p3692_p7 = por %p3942_p5, %p46_p2 }
  0x9a   : > { %p3696_p6 = por %p196_p1, %p40_p8  ;;  %p202_p9 = scmp.eq.s32.totalorder %s2547_s19, 1 }
  0x9b   : > { %p2979_p10 = scmp.lt.s32.totalorder %s3438_s27, 2  ;;  %s292_s21 = sand.u32 1, %s3434_s26  }
  0x9c   : > { %s3944_s20 = scalar_select %p3696_p6, 1, 0 }
  0x9d   : > { %p3702_p11 = por %p202_p9, %p46_p2  ;;  %s2556_s9 = sshll.u32 %s292_s21, 3 }
  0x9e   : > { %s2557_s14 = sshll.u32 %s3438_s27, 7  ;;  %s296_s17 = scalar_lea.vmem [#allocation2], %s2556_s9 }
  0x9f   : > { %s3945_s23 = scalar_select %p3702_p11, 1, 0 }
  0xa0   : > { %s3710_s12 = scalar_lea.hbm %s3928_s0, %s2557_s14  ;;  %s303_s18 = sshll.u32 %s296_s17, 4  ;;  %s3716_s18 = int_to_ptr.vmem [resolvable:$true] %s303_s18 }
  0xa1   : > { %p3712_p12 = pnand %p2979_p10, %p42_p3  ;;  %s293_s19 = scalar_lea.sflag [#allocation3], %s292_s21 }
  0xa2   : > { %s3330_s10 = scalar_lea.hbm %s3710_s12, 128  ;;  %s3335_s14 = scalar_lea.hbm %s3928_s0, 256 }
  0xa3   : > { %p3331_p4 = scmp.ne.s32.totalorder %s3710_s12, %s3330_s10  ;;  %p3332_p8 = pneg %p3712_p12 }
  0xa4   : > { %p3336_p2 = scmp.lt.u32.totalorder %s3710_s12, %s3928_s0  ;;  %p3337_p1 = scmp.lt.u32.totalorder %s3335_s14, %s3330_s10 }
  0xa5   : > { %p3333_p13 = pnand %p3332_p8, %p3331_p4  ;;  %p3339_p5 = scmp.lt.u32.totalorder %s3330_s10, %s3710_s12 }
  0xa6   : > { %p3338_p3 = por %p3337_p1, %p3336_p2 }
  0xa7   : > { %p3334_p0 = pneg %p3333_p13 }
  0xa8   : > { %p3340_p9 = por %p3339_p5, %p3338_p3 }
  0xaa   : > { %p3341_p10 = pnand %p3340_p9, %p3334_p0 }
  0xac   : > { %3344 = shalt.err (!%p3341_p10)
}
  0xad   : > { %s3345_s21 = scalar_lea.vmem %s3716_s18, 128  ;;  %s3449_s17 = smov [#allocation2]  }
  0xae   : > { %p3346_p4 = scmp.ne.s32.totalorder %s3716_s18, %s3345_s21  ;;  %s3350_s13 = sshll.u32 %s3449_s17, 4  ;;  %s3351_s13 = int_to_ptr.vmem [resolvable:$false] %s3350_s13 }
  0xaf   : > { %s3352_s9 = scalar_lea.vmem %s3351_s13, 256  ;;  %p3353_p6 = scmp.lt.s32.totalorder %s3716_s18, %s3351_s13 }
  0xb0   : > { %p3348_p13 = pnand %p3346_p4, %p3332_p8  ;;  %p3354_p2 = scmp.lt.s32.totalorder %s3352_s9, %s3345_s21 }
  0xb2   : > { %p3349_p11 = pneg %p3348_p13  ;;  %p3355_p1 = por %p3354_p2, %p3353_p6 }
  0xb4   : > { %p3356_p3 = pnand %p3355_p1, %p3349_p11 }
  0xb6   : > { %3359 = shalt.err (!%p3356_p3)
}
  0xb7   : > { %2968 = dma.hbm_to_vmem [thread:$0]  (!%p3712_p12), %s3710_s12, 128, %s3716_s18, %s293_s19  }
  0xb8   : > { %p3947_p0 = scmp.ne.s32.totalorder %s3939_s8, 0 }
  0xb9   : > { %s3746_s10 = sand.u32 (!%p3947_p0), 1, %s3430_s25  }
  0xba   : > { %312 = sbr.rel (%p3947_p0) target bundleno = 1085 (0x43d), region = 48  ;;  %s2559_s14 = sshll.u32 (!%p3947_p0), %s3746_s10, 3 }
  0xbb   : > { %s315_s15 = scalar_lea.sflag (!%p3947_p0), [#allocation3], %s3746_s10  ;;  %s3752_s16 = scalar_lea.vmem (!%p3947_p0), [#allocation2], %s2559_s14 }
  0xc1   : > { %3405 = dma.done.wait (%p3692_p7), %s315_s15, 128  }
  0xc2   : > { %3407 = vsyncadd (%p3692_p7), %s315_s15, 4294967168  ;;  %p3948_p6 = scmp.eq.s32.totalorder %s3513_s30, 0 }
  0xc4   : > { %3409 = dma.done.wait (%p3948_p6), [#allocation6], 32   ;;  %p3949_p11 = pmov %p3948_p6 }
  0xc5   : > { %p3950_p12 = pmov %p3948_p6 }
  0xc6   : > { %3411 = vsyncadd (%p3949_p11), [#allocation6], 4294967264 }
  0xc7   : > { %3413 = dma.done.wait (%p3950_p12), [#allocation9], 4352   ;;  %p3951_p8 = pmov %p3948_p6 }
  0xc8   : > { %p3952_p5 = pmov %p3948_p6 }
  0xc9   : > { %3415 = vsyncadd (%p3951_p8), [#allocation9], 4294962944 }
  0xca   : > { %3417 = dma.done.wait (%p3952_p5), [#allocation12], 16400   ;;  %p3953_p9 = pmov %p3952_p5 }
  0xcb   : > { %vm377_vm0 = vcmask 261120   ;;  %v374_v0 = vld [vmem:[%s3752_s16] sm:$0xff]  ;;  %v414_v7 = vld [vmem:[#allocation8] sm:$0xff]  ;;  %v3450_v23 = vmov 0   ;;  %v2567_v40 = vld [vmem:[#allocation5] ss:$0 sm:$0xff] }
  0xcc   : > { %3419 = vsyncadd (%p3953_p9), [#allocation12], 4294950896  ;;  %v378_v1 = vsel %vm377_vm0, %v374_v0, 0.0  ;;  %v422_v8 = vld [vmem:[#allocation8 + $0x40] sm:$0xff]  ;;  %v415_v9 = vld [vmem:[#allocation8 + $0x8] sm:$0xff]  ;;  %725 = vmatprep.mubr.bf16.mxu0 %v3450_v23  ;;  %766 = vmatprep.mubr.bf16.mxu1 %v3450_v23  ;;  %s2739_s8 = sshll.u32 %s3513_s30, 7 }
  0xcd   : > { %379 = vadd.xlane.f32.xlu0 %v378_v1  ;;  %v2570_v10 = vcombine.high %v414_v7, %v422_v8  ;;  %v423_v11 = vld [vmem:[#allocation8 + $0x48] sm:$0xff]  ;;  %v2569_v13 = vcombine.low %v414_v7, %v422_v8  ;;  %v430_v15 = vld [vmem:[#allocation8 + $0x80] sm:$0xff]  ;;  %v416_v24 = vld [vmem:[#allocation8 + $0x10] sm:$0xff]  ;;  %s372_s29 = scalar_lea.vmem [#allocation14], %s2559_s14  ;;  %s3883_s19 = scalar_lea.hbm %s3935_s7, %s2739_s8 }
  0xce   : > { %v2572_v12 = vcombine.high %v415_v9, %v423_v11  ;;  %v2571_v14 = vcombine.low %v415_v9, %v423_v11  ;;  %v438_v16 = vld [vmem:[#allocation8 + $0xc0] sm:$0xff]  ;;  %v431_v17 = vld [vmem:[#allocation8 + $0x88] sm:$0xff]  ;;  %v424_v25 = vld [vmem:[#allocation8 + $0x50] sm:$0xff]  ;;  %s2420_s12 = sshll.u32 %s372_s29, 4  ;;  %s2407_s21 = scalar_lea.sflag [#allocation4], %s3746_s10  ;;  %s3885_s12 = int_to_ptr.vmem [resolvable:$true] %s2420_s12 }
  0xcf   : > { %693 = vmatprep.subr.bf16.mxu0 %v2570_v10  ;;  %v2586_v18 = vcombine.high %v430_v15, %v438_v16  ;;  %v439_v19 = vld [vmem:[#allocation8 + $0xc8] sm:$0xff]  ;;  %v2585_v20 = vcombine.low %v430_v15, %v438_v16  ;;  %v417_v26 = vld [vmem:[#allocation8 + $0x18] sm:$0xff]  ;;  %v2574_v27 = vcombine.high %v416_v24, %v424_v25  ;;  %v2573_v29 = vcombine.low %v416_v24, %v424_v25  ;;  %v432_v45 = vld [vmem:[#allocation8 + $0x90] sm:$0xff]  ;;  %s3360_s30 = scalar_lea.vmem %s3885_s12, 128  ;;  %p3954_p10 = scmp.ne.s32.totalorder %s3944_s20, 0 }
  0xd0   : > { %734 = vmatprep.subr.bf16.mxu1 %v2572_v12  ;;  %694 = vmatpush1.bf16.msra.mxu0 %v2569_v13  ;;  %v2588_v21 = vcombine.high %v431_v17, %v439_v19  ;;  %v2587_v22 = vcombine.low %v431_v17, %v439_v19  ;;  %v425_v28 = vld [vmem:[#allocation8 + $0x58] sm:$0xff]  ;;  %v440_v46 = vld [vmem:[#allocation8 + $0xd0] sm:$0xff]  ;;  %v418_v53 = vld [vmem:[#allocation8 + $0x20] sm:$0xff]  ;;  %p3361_p7 = scmp.ne.s32.totalorder %s3885_s12, %s3360_s30  ;;  %s3451_s17 = smov [#allocation14]  }
  0xd1   : > { %735 = vmatpush1.bf16.msra.mxu1 %v2571_v14  ;;  %695 = vmatprep.subr.bf16.mxu0 %v2586_v18  ;;  %v2575_v30 = vcombine.low %v417_v26, %v425_v28  ;;  %v2576_v31 = vcombine.high %v417_v26, %v425_v28  ;;  %v2568_v43 = vld [vmem:[#allocation7] ss:$0 sm:$0xff]  ;;  %v2590_v51 = vcombine.high %v432_v45, %v440_v46  ;;  %v426_v54 = vld [vmem:[#allocation8 + $0x60] sm:$0xff]  ;;  %v419_v55 = vld [vmem:[#allocation8 + $0x28] sm:$0xff]  ;;  %s3364_s13 = sshll.u32 %s3451_s17, 4  ;;  %s3365_s13 = int_to_ptr.vmem [resolvable:$false] %s3364_s13 }
  0xd2   : > { %736 = vmatprep.subr.bf16.mxu1 %v2588_v21  ;;  %v433_v47 = vld [vmem:[#allocation8 + $0x98] sm:$0xff]  ;;  %v427_v56 = vld [vmem:[#allocation8 + $0x68] sm:$0xff]  ;;  %v2589_v57 = vcombine.low %v432_v45, %v440_v46  ;;  %v2578_v59 = vcombine.high %v418_v53, %v426_v54  ;;  %v434_v61 = vld [vmem:[#allocation8 + $0xa0] sm:$0xff]  ;;  %v2577_v1 = vcombine.low %v418_v53, %v426_v54  ;;  %p3362_p4 = pnand %p3361_p7, %p3954_p10  ;;  %s3366_s9 = scalar_lea.vmem %s3365_s13, 256 }
  0xd3   : > { %v441_v48 = vld [vmem:[#allocation8 + $0xd8] sm:$0xff]  ;;  %v2580_v60 = vcombine.high %v419_v55, %v427_v56  ;;  %v442_v62 = vld [vmem:[#allocation8 + $0xe0] sm:$0xff]  ;;  %v435_v63 = vld [vmem:[#allocation8 + $0xa8] sm:$0xff]  ;;  %p3367_p2 = scmp.lt.s32.totalorder %s3885_s12, %s3365_s13  ;;  %p3368_p1 = scmp.lt.s32.totalorder %s3366_s9, %s3360_s30 }
  0xd4   : > { %696 = vmatpush1.bf16.msra.mxu0 %v2585_v20  ;;  %v2592_v52 = vcombine.high %v433_v47, %v441_v48  ;;  %v2591_v58 = vcombine.low %v433_v47, %v441_v48  ;;  %v421_v7 = vld [vmem:[#allocation8 + $0x38] sm:$0xff]  ;;  %v2593_v9 = vcombine.low %v434_v61, %v442_v62  ;;  %v436_v13 = vld [vmem:[#allocation8 + $0xb0] sm:$0xff]  ;;  %v3053_v47 = vld [vmem:[#allocation11 + $0x70] sm:$0xff]   ;;  %p3363_p13 = pneg %p3362_p4 }
  0xd5   : > { %737 = vmatpush1.bf16.msra.mxu1 %v2587_v22  ;;  %775 = vmatprep.subr.bf16.mxu0 %v2574_v27  ;;  %v429_v8 = vld [vmem:[#allocation8 + $0x78] sm:$0xff]  ;;  %v444_v14 = vld [vmem:[#allocation8 + $0xf0] sm:$0xff]  ;;  %v3054_v48 = vld [vmem:[#allocation11 + $0xf0] sm:$0xff]   ;;  %p3369_p3 = por %p3368_p1, %p3367_p2 }
  0xd6   : > { %816 = vmatprep.subr.bf16.mxu1 %v2576_v31  ;;  %v2584_v12 = vcombine.high %v421_v7, %v429_v8  ;;  %v437_v15 = vld [vmem:[#allocation8 + $0xb8] sm:$0xff]  ;;  %v2583_v18 = vcombine.low %v421_v7, %v429_v8  ;;  %v2598_v19 = vcombine.high %v436_v13, %v444_v14  ;;  %v2597_v21 = vcombine.low %v436_v13, %v444_v14  ;;  %v3029_v24 = vld [vmem:[#allocation11 + $0x40] sm:$0xff]   ;;  %v3059_v53 = vld [vmem:[#allocation11 + $0x38] sm:$0xff]  }
  0xd7   : > { %v445_v16 = vld [vmem:[#allocation8 + $0xf8] sm:$0xff]  ;;  %v3030_v25 = vld [vmem:[#allocation11 + $0xc0] sm:$0xff]   ;;  %v3060_v54 = vld [vmem:[#allocation11 + $0xb8] sm:$0xff]   ;;  %p3370_p0 = pnand %p3369_p3, %p3363_p13 }
  0xd8   : > { %v2600_v20 = vcombine.high %v437_v15, %v445_v16  ;;  %v2599_v22 = vcombine.low %v437_v15, %v445_v16  ;;  %v3031_v26 = vld [vmem:[#allocation11] sm:$0xff]   ;;  %v3033_v28 = vld [vmem:[#allocation11 + $0x48] sm:$0xff]  }
  0xd9   : > { %v3032_v27 = vld [vmem:[#allocation11 + $0x80] sm:$0xff]   ;;  %v3036_v31 = vld [vmem:[#allocation11 + $0x88] sm:$0xff]  }
  0xda   : > { %v3051_v45 = vld [vmem:[#allocation11 + $0x28] sm:$0xff]  }
  0xdb   : > { %v3052_v46 = vld [vmem:[#allocation11 + $0xa8] sm:$0xff]  }
 0x15a   : > { %v380_v2 = vpop.xlane.xlu0 %379 }
 0x15b   : > { %v382_v3 = vmul.f32 0.03125, %v380_v2  ;;  %v2579_v2 = vcombine.low %v419_v55, %v427_v56  ;;  %v3061_v55 = vld [vmem:[#allocation11 + $0x140] sm:$0xff]  }
 0x15c   : > { %v3062_v56 = vld [vmem:[#allocation11 + $0x1c0] sm:$0xff]  }
 0x15d   : > { %v383_v4 = vsub.f32 %v374_v0, %v382_v3  ;;  %v443_v0 = vld [vmem:[#allocation8 + $0xe8] sm:$0xff]  ;;  %v2594_v3 = vcombine.high %v434_v61, %v442_v62 }
 0x15e   : > { %v2595_v10 = vcombine.low %v435_v63, %v443_v0 }
 0x15f   : > { %v384_v5 = vmul.f32 %v383_v4, %v383_v4 }
 0x161   : > { %v385_v6 = vsel %vm377_vm0, %v384_v5, 0.0  ;;  %v420_v5 = vld [vmem:[#allocation8 + $0x30] sm:$0xff] }
 0x162   : > { %386 = vadd.xlane.f32.xlu0 %v385_v6  ;;  %v428_v6 = vld [vmem:[#allocation8 + $0x70] sm:$0xff] }
 0x163   : > { %v2582_v11 = vcombine.high %v420_v5, %v428_v6  ;;  %v2581_v17 = vcombine.low %v420_v5, %v428_v6 }
 0x1ef   : > { %v387_v32 = vpop.xlane.xlu0 %386 }
 0x1f0   : > { %v388_v33 = vmul.f32 0.032258064, %v387_v32  ;;  %v3038_v32 = vld [vmem:[#allocation11 + $0xd0] sm:$0xff]  }
 0x1f2   : > { %3157 = vrsqrt.f32 %v388_v33  ;;  %vm391_vm1 = vcmp.eq.f32.partialorder %v388_v33, inf  ;;  %v394_v36 = vand.u32 2147483648, %v388_v33  ;;  %vm393_vm2 = vcmp.eq.f32.partialorder %v388_v33, 0.0 }
 0x1fc   : > { %v3158_v34 = vpop.eup %3157 }
 0x1fd   : > { %v390_v35 = vmul.f32 %v3158_v34, %v388_v33  ;;  %v3040_v34 = vld [vmem:[#allocation11 + $0x90] sm:$0xff]  }
 0x1ff   : > { %v392_v37 = vsel %vm391_vm1, %v388_v33, %v390_v35  ;;  %v3039_v33 = vld [vmem:[#allocation11 + $0x10] sm:$0xff]   ;;  %v3041_v35 = vld [vmem:[#allocation11 + $0x58] sm:$0xff]  }
 0x200   : > { %v395_v38 = vsel %vm393_vm2, %v394_v36, %v392_v37  ;;  %v3042_v36 = vld [vmem:[#allocation11 + $0xd8] sm:$0xff]  }
 0x201   : > { %v396_v39 = vadd.f32 1e-06, %v395_v38  ;;  %v3043_v37 = vld [vmem:[#allocation11 + $0x18] sm:$0xff]  }
 0x202   : > { %v3044_v38 = vld [vmem:[#allocation11 + $0x98] sm:$0xff]  }
 0x203   : > { %3159 = vrcp.f32 %v396_v39  ;;  %v3045_v39 = vld [vmem:[#allocation11 + $0x60] sm:$0xff]  }
 0x20d   : > { %v3160_v41 = vpop.eup %3159 }
 0x20e   : > { %v404_v42 = vmul.f32 %v3160_v41, %v2567_v40  ;;  %v3046_v40 = vld [vmem:[#allocation11 + $0xe0] sm:$0xff]  }
 0x20f   : > { %v3047_v41 = vld [vmem:[#allocation11 + $0x20] sm:$0xff]  }
 0x210   : > { %v405_v44 = vmul.f32 %v404_v42, %v383_v4  ;;  %v2596_v4 = vcombine.high %v435_v63, %v443_v0  ;;  %v3048_v42 = vld [vmem:[#allocation11 + $0xa0] sm:$0xff]   ;;  %v3811_v0 = vld [vmem:[#allocation10] sm:$0xff] }
 0x212   : > { %v412_v49 = vadd.f32 %v2568_v43, %v405_v44  ;;  %v3049_v43 = vld [vmem:[#allocation11 + $0x68] sm:$0xff]  }
 0x213   : > { %v3050_v44 = vld [vmem:[#allocation11 + $0xe8] sm:$0xff]  }
 0x214   : > { %v3775_v50 = vpack.c.bf16 %v412_v49, %v412_v49  ;;  %v3055_v49 = vld [vmem:[#allocation11 + $0x30] sm:$0xff]  }
 0x216   : > { %2601 = vmatmul.mubr.msk.bf16.vlgmr.msra.gmra.mrb[0].mxu0 %vm377_vm0, %v3775_v50  ;;  %2602 = vmatmul.mubr.msk.bf16.vlgmr.msra.gmra.mrb[0].mxu1 %vm377_vm0, %v3775_v50 }
 0x217   : > { %776 = vmatpush1.bf16.msra.mxu0 %v2573_v29  ;;  %817 = vmatpush1.bf16.msra.mxu1 %v2575_v30  ;;  %v3034_v29 = vld [vmem:[#allocation11 + $0xc8] sm:$0xff]  }
 0x218   : > { %777 = vmatprep.subr.bf16.mxu0 %v2590_v51  ;;  %818 = vmatprep.subr.bf16.mxu1 %v2592_v52  ;;  %v3035_v30 = vld [vmem:[#allocation11 + $0x8] sm:$0xff]   ;;  %v3057_v51 = vld [vmem:[#allocation11 + $0x78] sm:$0xff]  }
 0x219   : > { %807 = vmatprep.mubr.bf16.mxu0 %v3450_v23  ;;  %848 = vmatprep.mubr.bf16.mxu1 %v3450_v23  ;;  %v3058_v52 = vld [vmem:[#allocation11 + $0xf8] sm:$0xff]  }
 0x21b   : > { %778 = vmatpush1.bf16.msra.mxu0 %v2589_v57  ;;  %819 = vmatpush1.bf16.msra.mxu1 %v2591_v58  ;;  %v450_v57 = vlaneseq }
 0x21c   : > { %857 = vmatprep.subr.bf16.mxu0 %v2578_v59  ;;  %898 = vmatprep.subr.bf16.mxu1 %v2580_v60  ;;  %v3802_v60 = vld [vmem:[#allocation10 + $0x8] sm:$0xff] }
 0x21d   : > { %v3799_v58 = vshrl.u32 %v450_v57, 7  ;;  %v3073_v57 = vld [vmem:[#allocation11 + $0x158] sm:$0xff]  }
 0x21e   : > { %2603 = vmatmul.mubr.msk.bf16.vlgmr.msra.gmra.mrb[4].mxu0 %vm377_vm0, %v3775_v50  ;;  %2604 = vmatmul.mubr.msk.bf16.vlgmr.msra.gmra.mrb[4].mxu1 %vm377_vm0, %v3775_v50 }
 0x21f   : > { %858 = vmatpush1.bf16.msra.mxu0 %v2577_v1  ;;  %899 = vmatpush1.bf16.msra.mxu1 %v2579_v2  ;;  %v476_v59 = vsub.s32 6, %v3799_v58  ;;  %v452_v62 = vsub.s32 0, %v3799_v58  ;;  %v460_v63 = vsub.s32 2, %v3799_v58  ;;  %v456_v1 = vsub.s32 1, %v3799_v58 }
 0x220   : > { %859 = vmatprep.subr.bf16.mxu0 %v2594_v3  ;;  %900 = vmatprep.subr.bf16.mxu1 %v2596_v4  ;;  %v464_v2 = vsub.s32 3, %v3799_v58 }
 0x221   : > { %889 = vmatprep.mubr.bf16.mxu0 %v3450_v23  ;;  %930 = vmatprep.mubr.bf16.mxu1 %v3450_v23  ;;  %v3807_v61 = vrot.slane %v3802_v60, %v476_v59  ;;  %v453_v3 = vrot.slane %v3811_v0, %v452_v62  ;;  %v461_v4 = vrot.slane %v3811_v0, %v460_v63 }
 0x222   : > { %v457_v5 = vrot.slane %v3811_v0, %v456_v1  ;;  %v465_v6 = vrot.slane %v3811_v0, %v464_v2 }
 0x223   : > { %860 = vmatpush1.bf16.msra.mxu0 %v2593_v9  ;;  %901 = vmatpush1.bf16.msra.mxu1 %v2595_v10 }
 0x224   : > { %939 = vmatprep.subr.bf16.mxu0 %v2582_v11  ;;  %980 = vmatprep.subr.bf16.mxu1 %v2584_v12 }
 0x226   : > { %2605 = vmatmul.mubr.msk.bf16.vlgmr.msra.gmra.mrb[8].mxu0 %vm377_vm0, %v3775_v50  ;;  %2606 = vmatmul.mubr.msk.bf16.vlgmr.msra.gmra.mrb[8].mxu1 %vm377_vm0, %v3775_v50 }
 0x227   : > { %940 = vmatpush1.bf16.msra.mxu0 %v2581_v17  ;;  %981 = vmatpush1.bf16.msra.mxu1 %v2583_v18  ;;  %v472_v17 = vsub.s32 5, %v3799_v58  ;;  %v480_v18 = vsub.s32 7, %v3799_v58 }
 0x228   : > { %941 = vmatprep.subr.bf16.mxu0 %v2598_v19  ;;  %982 = vmatprep.subr.bf16.mxu1 %v2600_v20 }
 0x229   : > { %971 = vmatprep.mubr.bf16.mxu0 %v3450_v23  ;;  %1012 = vmatprep.mubr.bf16.mxu1 %v3450_v23  ;;  %v3037_v23 = vld [vmem:[#allocation11 + $0x50] sm:$0xff]  }
 0x22b   : > { %942 = vmatpush1.bf16.msra.mxu0 %v2597_v21  ;;  %983 = vmatpush1.bf16.msra.mxu1 %v2599_v22 }
 0x22c   : > { %2742 = vmatprep.subr.bf16.mxu0 %v3029_v24  ;;  %2764 = vmatprep.subr.bf16.mxu1 %v3030_v25 }
 0x22e   : > { %2607 = vmatmul.mubr.msk.bf16.vlgmr.msra.gmra.mrb[12].mxu0 %vm377_vm0, %v3775_v50  ;;  %2608 = vmatmul.mubr.msk.bf16.vlgmr.msra.gmra.mrb[12].mxu1 %vm377_vm0, %v3775_v50  ;;  %v3056_v50 = vld [vmem:[#allocation11 + $0xb0] sm:$0xff]  }
 0x22f   : > { %2743 = vmatpush3.bf16.msra.mxu0 %v3031_v26  ;;  %2765 = vmatpush3.bf16.msra.mxu1 %v3032_v27 }
 0x230   : > { %2744 = vmatprep.subr.bf16.mxu0 %v3033_v28  ;;  %2766 = vmatprep.subr.bf16.mxu1 %v3034_v29  ;;  %v473_v28 = vrot.slane %v3811_v0, %v472_v17  ;;  %v481_v29 = vrot.slane %v3811_v0, %v480_v18 }
 0x233   : > { %2745 = vmatpush3.bf16.msra.mxu0 %v3035_v30  ;;  %2767 = vmatpush3.bf16.msra.mxu1 %v3036_v31  ;;  %v3063_v30 = vld [vmem:[#allocation11 + $0x100] sm:$0xff]  }
 0x234   : > { %2746 = vmatprep.subr.bf16.mxu0 %v3037_v23  ;;  %2768 = vmatprep.subr.bf16.mxu1 %v3038_v32  ;;  %v3064_v31 = vld [vmem:[#allocation11 + $0x180] sm:$0xff]  }
 0x237   : > { %2747 = vmatpush3.bf16.msra.mxu0 %v3039_v33  ;;  %2769 = vmatpush3.bf16.msra.mxu1 %v3040_v34  ;;  %v3065_v33 = vld [vmem:[#allocation11 + $0x148] sm:$0xff]  }
 0x238   : > { %2748 = vmatprep.subr.bf16.mxu0 %v3041_v35  ;;  %2770 = vmatprep.subr.bf16.mxu1 %v3042_v36  ;;  %v3066_v34 = vld [vmem:[#allocation11 + $0x1c8] sm:$0xff]  }
 0x23b   : > { %2749 = vmatpush3.bf16.msra.mxu0 %v3043_v37  ;;  %2771 = vmatpush3.bf16.msra.mxu1 %v3044_v38 }
 0x23c   : > { %2750 = vmatprep.subr.bf16.mxu0 %v3045_v39  ;;  %2772 = vmatprep.subr.bf16.mxu1 %v3046_v40 }
 0x23f   : > { %2751 = vmatpush3.bf16.msra.mxu0 %v3047_v41  ;;  %2773 = vmatpush3.bf16.msra.mxu1 %v3048_v42 }
 0x240   : > { %2752 = vmatprep.subr.bf16.mxu0 %v3049_v43  ;;  %2774 = vmatprep.subr.bf16.mxu1 %v3050_v44  ;;  %v3067_v43 = vld [vmem:[#allocation11 + $0x108] sm:$0xff]  }
 0x241   : > { %v3068_v44 = vld [vmem:[#allocation11 + $0x188] sm:$0xff]  }
 0x243   : > { %2753 = vmatpush3.bf16.msra.mxu0 %v3051_v45  ;;  %2775 = vmatpush3.bf16.msra.mxu1 %v3052_v46 }
 0x244   : > { %2754 = vmatprep.subr.bf16.mxu0 %v3053_v47  ;;  %2776 = vmatprep.subr.bf16.mxu1 %v3054_v48  ;;  %v3069_v47 = vld [vmem:[#allocation11 + $0x150] sm:$0xff]  }
 0x245   : > { %v3070_v48 = vld [vmem:[#allocation11 + $0x1d0] sm:$0xff]  }
 0x247   : > { %2755 = vmatpush3.bf16.msra.mxu0 %v3055_v49  ;;  %2777 = vmatpush3.bf16.msra.mxu1 %v3056_v50 }
 0x248   : > { %2756 = vmatprep.subr.bf16.mxu0 %v3057_v51  ;;  %2778 = vmatprep.subr.bf16.mxu1 %v3058_v52  ;;  %v485_v51 = vrot.slane %v3802_v60, %v452_v62  ;;  %v493_v52 = vrot.slane %v3802_v60, %v460_v63 }
 0x24b   : > { %2757 = vmatpush3.bf16.msra.mxu0 %v3059_v53  ;;  %2779 = vmatpush3.bf16.msra.mxu1 %v3060_v54 }
 0x24c   : > { %2786 = vmatprep.subr.bf16.mxu0 %v3061_v55  ;;  %2808 = vmatprep.subr.bf16.mxu1 %v3062_v56  ;;  %v3071_v55 = vld [vmem:[#allocation11 + $0x110] sm:$0xff]  }
 0x24d   : > { %v3072_v56 = vld [vmem:[#allocation11 + $0x190] sm:$0xff]  }
 0x2e9   : > { %v727_v7 = vpop.f32.mrb[0].mxu0  ;;  %v768_v8 = vpop.f32.mrb[0].mxu1 }
 0x2ea   : > { %v728_v9 = vadd.f32 %v727_v7, %v453_v3  ;;  %v769_v10 = vadd.f32 %v768_v8, %v461_v4  ;;  %v729_v11 = vpop.f32.mrb[1].mxu0  ;;  %v770_v12 = vpop.f32.mrb[1].mxu1  ;;  %v3074_v3 = vld [vmem:[#allocation11 + $0x1d8] sm:$0xff]  }
 0x2eb   : > { %v730_v13 = vadd.f32 %v729_v11, %v457_v5  ;;  %v771_v14 = vadd.f32 %v770_v12, %v465_v6  ;;  %v731_v15 = vpop.f32.mrb[2].mxu0  ;;  %v772_v16 = vpop.f32.mrb[2].mxu1  ;;  %v3076_v11 = vld [vmem:[#allocation11 + $0x198] sm:$0xff]   ;;  %v468_v12 = vsub.s32 4, %v3799_v58 }
 0x2ec   : > { %v1021_v19 = vmax.f32 %v728_v9, 0.0  ;;  %v1023_v20 = vmax.f32 %v769_v10, 0.0  ;;  %v732_v21 = vpop.f32.mrb[3].mxu0  ;;  %v773_v22 = vpop.f32.mrb[3].mxu1  ;;  %v3075_v10 = vld [vmem:[#allocation11 + $0x118] sm:$0xff]   ;;  %v3077_v15 = vld [vmem:[#allocation11 + $0x160] sm:$0xff]  }
 0x2ed   : > { %v1022_v24 = vmax.f32 %v730_v13, 0.0  ;;  %v1024_v25 = vmax.f32 %v771_v14, 0.0  ;;  %v3078_v16 = vld [vmem:[#allocation11 + $0x1e0] sm:$0xff]   ;;  %v3081_v22 = vld [vmem:[#allocation11 + $0x168] sm:$0xff]   ;;  %v3124_v58 = vld [vmem:[#allocation11 + $0x2b8] sm:$0xff]  }
 0x2ee   : > { %v1037_v23 = vpack.c.bf16 %v1021_v19, %v1021_v19  ;;  %v1039_v32 = vpack.c.bf16 %v1023_v20, %v1023_v20  ;;  %v501_v19 = vrot.slane %v3802_v60, %v468_v12  ;;  %v3079_v20 = vld [vmem:[#allocation11 + $0x120] sm:$0xff]  }
 0x2ef   : > { %v1038_v26 = vpack.c.bf16 %v1022_v24, %v1022_v24  ;;  %v1040_v27 = vpack.c.bf16 %v1024_v25, %v1024_v25  ;;  %v3080_v21 = vld [vmem:[#allocation11 + $0x1a0] sm:$0xff]   ;;  %v3082_v24 = vld [vmem:[#allocation11 + $0x1e8] sm:$0xff]  }
 0x2f1   : > { %v3831_v35 = vpop.f32.mrb[4].mxu0  ;;  %v3833_v36 = vpop.f32.mrb[4].mxu1  ;;  %2116 = vmatprep.mubr.bf16.mxu0 %v1038_v26  ;;  %2156 = vmatprep.mubr.bf16.mxu1 %v1040_v27 }
 0x2f2   : > { %v811_v37 = vpop.f32.mrb[5].mxu0  ;;  %v852_v38 = vpop.f32.mrb[5].mxu1  ;;  %2117 = vmatmul.mubr.bf16.vlgmr.msra.gmra.mrb[16].mxu0 %v1037_v23  ;;  %2157 = vmatmul.mubr.bf16.vlgmr.msra.gmra.mrb[16].mxu1 %v1039_v32  ;;  %v3083_v32 = vld [vmem:[#allocation11 + $0x128] sm:$0xff]  }
 0x2f3   : > { %v812_v39 = vadd.f32 %v811_v37, %v473_v28  ;;  %v853_v40 = vadd.f32 %v852_v38, %v481_v29  ;;  %2787 = vmatpush3.bf16.msra.mxu0 %v3063_v30  ;;  %2809 = vmatpush3.bf16.msra.mxu1 %v3064_v31  ;;  %v813_v41 = vpop.f32.mrb[6].mxu0  ;;  %v854_v42 = vpop.f32.mrb[6].mxu1  ;;  %v477_v37 = vrot.slane %v3811_v0, %v476_v59 }
 0x2f4   : > { %v814_v45 = vpop.f32.mrb[7].mxu0  ;;  %v855_v46 = vpop.f32.mrb[7].mxu1  ;;  %2788 = vmatprep.subr.bf16.mxu0 %v3065_v33  ;;  %2810 = vmatprep.subr.bf16.mxu1 %v3066_v34  ;;  %v3084_v33 = vld [vmem:[#allocation11 + $0x1a8] sm:$0xff]   ;;  %v469_v34 = vrot.slane %v3811_v0, %v468_v12  ;;  %v489_v41 = vrot.slane %v3802_v60, %v456_v1  ;;  %v497_v42 = vrot.slane %v3802_v60, %v464_v2  ;;  %v3091_v1 = vld [vmem:[#allocation11 + $0x138] sm:$0xff]  }
 0x2f5   : > { %v1026_v49 = vmax.f32 %v812_v39, 0.0  ;;  %v1028_v50 = vmax.f32 %v853_v40, 0.0  ;;  %v3086_v40 = vld [vmem:[#allocation11 + $0x1f0] sm:$0xff]   ;;  %v851_v0 = vadd.f32 %v3833_v36, %v477_v37  ;;  %v3089_v45 = vld [vmem:[#allocation11 + $0x178] sm:$0xff]   ;;  %v3095_v36 = vld [vmem:[#allocation11 + $0x200] sm:$0xff]  }
 0x2f6   : > { %v810_v59 = vadd.f32 %v3831_v35, %v469_v34  ;;  %v3090_v46 = vld [vmem:[#allocation11 + $0x1f8] sm:$0xff]   ;;  %v3119_v34 = vld [vmem:[#allocation11 + $0x230] sm:$0xff]  }
 0x2f7   : > { %v1042_v53 = vpack.c.bf16 %v1026_v49, %v1026_v49  ;;  %v1044_v54 = vpack.c.bf16 %v1028_v50, %v1028_v50  ;;  %2789 = vmatpush3.bf16.msra.mxu0 %v3067_v43  ;;  %2811 = vmatpush3.bf16.msra.mxu1 %v3068_v44  ;;  %v3087_v43 = vld [vmem:[#allocation11 + $0x130] sm:$0xff]   ;;  %v3092_v49 = vld [vmem:[#allocation11 + $0x1b8] sm:$0xff]   ;;  %v1027_v2 = vmax.f32 %v851_v0, 0.0 }
 0x2f8   : > { %2790 = vmatprep.subr.bf16.mxu0 %v3069_v47  ;;  %2812 = vmatprep.subr.bf16.mxu1 %v3070_v48  ;;  %v3088_v44 = vld [vmem:[#allocation11 + $0x1b0] sm:$0xff]   ;;  %v1025_v50 = vmax.f32 %v810_v59, 0.0  ;;  %v3105_v12 = vld [vmem:[#allocation11 + $0x258] sm:$0xff]   ;;  %v3127_v59 = vld [vmem:[#allocation11 + $0x300] sm:$0xff]  }
 0x2f9   : > { %v891_v4 = vpop.f32.mrb[8].mxu0  ;;  %v932_v5 = vpop.f32.mrb[8].mxu1  ;;  %2196 = vmatprep.mubr.bf16.mxu0 %v1042_v53  ;;  %2236 = vmatprep.mubr.bf16.mxu1 %v1044_v54  ;;  %v3120_v37 = vld [vmem:[#allocation11 + $0x2b0] sm:$0xff]  }
 0x2fa   : > { %v3837_v6 = vadd.f32 %v891_v4, %v485_v51  ;;  %v3839_v7 = vadd.f32 %v932_v5, %v493_v52  ;;  %v893_v62 = vpop.f32.mrb[9].mxu0  ;;  %v934_v63 = vpop.f32.mrb[9].mxu1  ;;  %v3093_v51 = vld [vmem:[#allocation11 + $0x240] sm:$0xff]   ;;  %v1041_v54 = vpack.c.bf16 %v1025_v50, %v1025_v50  ;;  %v3098_v4 = vld [vmem:[#allocation11 + $0x2c8] sm:$0xff]   ;;  %v3135_v50 = vld [vmem:[#allocation11 + $0x310] sm:$0xff]  }
 0x2fb   : > { %2791 = vmatpush3.bf16.msra.mxu0 %v3071_v55  ;;  %2813 = vmatpush3.bf16.msra.mxu1 %v3072_v56  ;;  %v895_v8 = vpop.f32.mrb[10].mxu0  ;;  %v936_v9 = vpop.f32.mrb[10].mxu1  ;;  %v894_v47 = vadd.f32 %v893_v62, %v489_v41  ;;  %v935_v48 = vadd.f32 %v934_v63, %v497_v42  ;;  %v3094_v52 = vld [vmem:[#allocation11 + $0x2c0] sm:$0xff]   ;;  %v1043_v55 = vpack.c.bf16 %v1027_v2, %v1027_v2  ;;  %v3099_v62 = vld [vmem:[#allocation11 + $0x208] sm:$0xff]   ;;  %v3123_v41 = vld [vmem:[#allocation11 + $0x238] sm:$0xff]  }
 0x2fc   : > { %v896_v13 = vpop.f32.mrb[11].mxu0  ;;  %v937_v14 = vpop.f32.mrb[11].mxu1  ;;  %2792 = vmatprep.subr.bf16.mxu0 %v3073_v57  ;;  %2814 = vmatprep.subr.bf16.mxu1 %v3074_v3  ;;  %v3096_v56 = vld [vmem:[#allocation11 + $0x280] sm:$0xff]   ;;  %v3097_v3 = vld [vmem:[#allocation11 + $0x248] sm:$0xff]   ;;  %v3101_v8 = vld [vmem:[#allocation11 + $0x250] sm:$0xff]  }
 0x2fd   : > { %v1030_v53 = vmax.f32 %v894_v47, 0.0  ;;  %v1032_v35 = vmax.f32 %v935_v48, 0.0  ;;  %v3100_v63 = vld [vmem:[#allocation11 + $0x288] sm:$0xff]   ;;  %v3102_v9 = vld [vmem:[#allocation11 + $0x2d0] sm:$0xff]   ;;  %v3106_v13 = vld [vmem:[#allocation11 + $0x2d8] sm:$0xff]  }
 0x2fe   : > { %v3107_v14 = vld [vmem:[#allocation11 + $0x218] sm:$0xff]   ;;  %v3126_v42 = vld [vmem:[#allocation11 + $0x3c0] sm:$0xff]   ;;  %v3132_v48 = vld [vmem:[#allocation11 + $0x388] sm:$0xff]  }
 0x2ff   : > { %2793 = vmatpush3.bf16.msra.mxu0 %v3075_v10  ;;  %2815 = vmatpush3.bf16.msra.mxu1 %v3076_v11  ;;  %v1046_v57 = vpack.c.bf16 %v1030_v53, %v1030_v53  ;;  %v1048_v5 = vpack.c.bf16 %v1032_v35, %v1032_v35  ;;  %v3103_v10 = vld [vmem:[#allocation11 + $0x210] sm:$0xff]   ;;  %v3139_v53 = vld [vmem:[#allocation11 + $0x318] sm:$0xff]  }
 0x300   : > { %2794 = vmatprep.subr.bf16.mxu0 %v3077_v15  ;;  %2816 = vmatprep.subr.bf16.mxu1 %v3078_v16  ;;  %v3104_v11 = vld [vmem:[#allocation11 + $0x290] sm:$0xff]   ;;  %v3108_v15 = vld [vmem:[#allocation11 + $0x298] sm:$0xff]   ;;  %v3109_v16 = vld [vmem:[#allocation11 + $0x260] sm:$0xff]  }
 0x301   : > { %v973_v25 = vpop.f32.mrb[12].mxu0  ;;  %v1014_v26 = vpop.f32.mrb[12].mxu1  ;;  %v3136_v2 = vld [vmem:[#allocation11 + $0x390] sm:$0xff]   ;;  %v3140_v35 = vld [vmem:[#allocation11 + $0x398] sm:$0xff]  }
 0x302   : > { %v3843_v27 = vadd.f32 %v973_v25, %v501_v19  ;;  %v3846_v28 = vadd.f32 %v1014_v26, %v3807_v61  ;;  %v3848_v29 = vpop.f32.mrb[13].mxu0  ;;  %v3850_v30 = vpop.f32.mrb[13].mxu1  ;;  %v3085_v61 = vld [vmem:[#allocation11 + $0x170] sm:$0xff]   ;;  %v3110_v19 = vld [vmem:[#allocation11 + $0x2e0] sm:$0xff]   ;;  %v3115_v25 = vld [vmem:[#allocation11 + $0x228] sm:$0xff]  }
 0x303   : > { %2795 = vmatpush3.bf16.msra.mxu0 %v3079_v20  ;;  %2817 = vmatpush3.bf16.msra.mxu1 %v3080_v21  ;;  %v977_v31 = vpop.f32.mrb[14].mxu0  ;;  %v1018_v23 = vpop.f32.mrb[14].mxu1  ;;  %v3111_v20 = vld [vmem:[#allocation11 + $0x220] sm:$0xff]   ;;  %v3116_v26 = vld [vmem:[#allocation11 + $0x2a8] sm:$0xff]  }
 0x304   : > { %v978_v38 = vpop.f32.mrb[15].mxu0  ;;  %v1019_v39 = vpop.f32.mrb[15].mxu1  ;;  %2796 = vmatprep.subr.bf16.mxu0 %v3081_v22  ;;  %2818 = vmatprep.subr.bf16.mxu1 %v3082_v24  ;;  %v3112_v21 = vld [vmem:[#allocation11 + $0x2a0] sm:$0xff]   ;;  %v3113_v22 = vld [vmem:[#allocation11 + $0x268] sm:$0xff]   ;;  %v3117_v31 = vld [vmem:[#allocation11 + $0x270] sm:$0xff]  }
 0x305   : > { %v3114_v24 = vld [vmem:[#allocation11 + $0x2e8] sm:$0xff]   ;;  %v3118_v23 = vld [vmem:[#allocation11 + $0x2f0] sm:$0xff]   ;;  %v3121_v38 = vld [vmem:[#allocation11 + $0x278] sm:$0xff]  }
 0x306   : > { %v3122_v39 = vld [vmem:[#allocation11 + $0x2f8] sm:$0xff]  }
 0x307   : > { %2797 = vmatpush3.bf16.msra.mxu0 %v3083_v32  ;;  %2819 = vmatpush3.bf16.msra.mxu1 %v3084_v33  ;;  %v505_v32 = vrot.slane %v3802_v60, %v472_v17  ;;  %v513_v33 = vrot.slane %v3802_v60, %v480_v18  ;;  %v1029_v17 = vmax.f32 %v3837_v6, 0.0  ;;  %v3125_v60 = vld [vmem:[#allocation11 + $0x340] sm:$0xff]   ;;  %v1031_v18 = vmax.f32 %v3839_v7, 0.0  ;;  %v3131_v7 = vld [vmem:[#allocation11 + $0x308] sm:$0xff]  }
 0x308   : > { %2798 = vmatprep.subr.bf16.mxu0 %v3085_v61  ;;  %2820 = vmatprep.subr.bf16.mxu1 %v3086_v40 }
 0x309   : > { %v976_v61 = vadd.f32 %v3848_v29, %v505_v32  ;;  %v1017_v40 = vadd.f32 %v3850_v30, %v513_v33  ;;  %v1045_v0 = vpack.c.bf16 %v1029_v17, %v1029_v17  ;;  %v3128_v29 = vld [vmem:[#allocation11 + $0x380] sm:$0xff]   ;;  %v1047_v30 = vpack.c.bf16 %v1031_v18, %v1031_v18 }
 0x30b   : > { %2799 = vmatpush3.bf16.msra.mxu0 %v3087_v43  ;;  %2821 = vmatpush3.bf16.msra.mxu1 %v3088_v44  ;;  %v1034_v43 = vmax.f32 %v976_v61, 0.0  ;;  %v1036_v44 = vmax.f32 %v1017_v40, 0.0 }
 0x30c   : > { %2800 = vmatprep.subr.bf16.mxu0 %v3089_v45  ;;  %2822 = vmatprep.subr.bf16.mxu1 %v3090_v46  ;;  %v3129_v45 = vld [vmem:[#allocation11 + $0x348] sm:$0xff]  }
 0x30d   : > { %v1050_v6 = vpack.c.bf16 %v1034_v43, %v1034_v43  ;;  %v3130_v46 = vld [vmem:[#allocation11 + $0x3c8] sm:$0xff]   ;;  %v1052_v47 = vpack.c.bf16 %v1036_v44, %v1036_v44 }
 0x30f   : > { %2801 = vmatpush3.bf16.msra.mxu0 %v3091_v1  ;;  %2823 = vmatpush3.bf16.msra.mxu1 %v3092_v49  ;;  %v3133_v1 = vld [vmem:[#allocation11 + $0x350] sm:$0xff]  }
 0x310   : > { %2830 = vmatprep.subr.bf16.mxu0 %v3093_v51  ;;  %2852 = vmatprep.subr.bf16.mxu1 %v3094_v52  ;;  %v3134_v49 = vld [vmem:[#allocation11 + $0x3d0] sm:$0xff]   ;;  %v3137_v51 = vld [vmem:[#allocation11 + $0x358] sm:$0xff]  }
 0x311   : > { %v3138_v52 = vld [vmem:[#allocation11 + $0x3d8] sm:$0xff]  }
 0x312   : > { %2197 = vmatmul.mubr.bf16.vlgmr.msra.gmra.mrb[20].mxu0 %v1041_v54  ;;  %2237 = vmatmul.mubr.bf16.vlgmr.msra.gmra.mrb[20].mxu1 %v1043_v55  ;;  %v3142_v54 = vld [vmem:[#allocation11 + $0x3e0] sm:$0xff]  }
 0x313   : > { %2831 = vmatpush3.bf16.msra.mxu0 %v3095_v36  ;;  %2276 = vmatprep.mubr.bf16.mxu0 %v1046_v57  ;;  %v3141_v36 = vld [vmem:[#allocation11 + $0x360] sm:$0xff]   ;;  %v3145_v57 = vld [vmem:[#allocation11 + $0x368] sm:$0xff]  }
 0x314   : > { %2853 = vmatpush3.bf16.msra.mxu1 %v3096_v56  ;;  %2316 = vmatprep.mubr.bf16.mxu1 %v1048_v5  ;;  %v3143_v55 = vld [vmem:[#allocation11 + $0x320] sm:$0xff]   ;;  %v3148_v5 = vld [vmem:[#allocation11 + $0x3a8] sm:$0xff]  }
 0x315   : > { %2832 = vmatprep.subr.bf16.mxu0 %v3097_v3  ;;  %2854 = vmatprep.subr.bf16.mxu1 %v3098_v4  ;;  %v3144_v56 = vld [vmem:[#allocation11 + $0x3a0] sm:$0xff]   ;;  %v3146_v3 = vld [vmem:[#allocation11 + $0x3e8] sm:$0xff]  }
 0x316   : > { %v3147_v4 = vld [vmem:[#allocation11 + $0x328] sm:$0xff]  }
 0x317   : > { %2833 = vmatpush3.bf16.msra.mxu0 %v3099_v62  ;;  %v3149_v62 = vld [vmem:[#allocation11 + $0x370] sm:$0xff]  }
 0x318   : > { %2855 = vmatpush3.bf16.msra.mxu1 %v3100_v63  ;;  %2834 = vmatprep.subr.bf16.mxu0 %v3101_v8  ;;  %v3150_v63 = vld [vmem:[#allocation11 + $0x3f0] sm:$0xff]  }
 0x319   : > { %2856 = vmatprep.subr.bf16.mxu1 %v3102_v9  ;;  %v3151_v8 = vld [vmem:[#allocation11 + $0x330] sm:$0xff]  }
 0x31a   : > { %v3152_v9 = vld [vmem:[#allocation11 + $0x3b0] sm:$0xff]  }
 0x31b   : > { %2835 = vmatpush3.bf16.msra.mxu0 %v3103_v10  ;;  %v3153_v10 = vld [vmem:[#allocation11 + $0x378] sm:$0xff]  }
 0x31c   : > { %2857 = vmatpush3.bf16.msra.mxu1 %v3104_v11  ;;  %2836 = vmatprep.subr.bf16.mxu0 %v3105_v12  ;;  %v3154_v11 = vld [vmem:[#allocation11 + $0x3f8] sm:$0xff]  }
 0x31d   : > { %2858 = vmatprep.subr.bf16.mxu1 %v3106_v13  ;;  %v3155_v12 = vld [vmem:[#allocation11 + $0x338] sm:$0xff]   ;;  %v1033_v13 = vmax.f32 %v3843_v27, 0.0 }
 0x31f   : > { %2837 = vmatpush3.bf16.msra.mxu0 %v3107_v14  ;;  %v3156_v14 = vld [vmem:[#allocation11 + $0x3b8] sm:$0xff]  }
 0x320   : > { %2859 = vmatpush3.bf16.msra.mxu1 %v3108_v15  ;;  %2838 = vmatprep.subr.bf16.mxu0 %v3109_v16  ;;  %v1035_v15 = vmax.f32 %v3846_v28, 0.0  ;;  %v1049_v16 = vpack.c.bf16 %v1033_v13, %v1033_v13 }
 0x321   : > { %2860 = vmatprep.subr.bf16.mxu1 %v3110_v19 }
 0x322   : > { %v1051_v19 = vpack.c.bf16 %v1035_v15, %v1035_v15 }
 0x323   : > { %2839 = vmatpush3.bf16.msra.mxu0 %v3111_v20 }
 0x324   : > { %2861 = vmatpush3.bf16.msra.mxu1 %v3112_v21  ;;  %2840 = vmatprep.subr.bf16.mxu0 %v3113_v22  ;;  %v2609_v22 = vld [vmem:[#allocation13] ss:$0 sm:$0xff] }
 0x325   : > { %2862 = vmatprep.subr.bf16.mxu1 %v3114_v24 }
 0x327   : > { %2841 = vmatpush3.bf16.msra.mxu0 %v3115_v25 }
 0x328   : > { %2863 = vmatpush3.bf16.msra.mxu1 %v3116_v26  ;;  %2842 = vmatprep.subr.bf16.mxu0 %v3117_v31 }
 0x329   : > { %2864 = vmatprep.subr.bf16.mxu1 %v3118_v23 }
 0x32b   : > { %2843 = vmatpush3.bf16.msra.mxu0 %v3119_v34 }
 0x32c   : > { %2865 = vmatpush3.bf16.msra.mxu1 %v3120_v37  ;;  %2844 = vmatprep.subr.bf16.mxu0 %v3121_v38 }
 0x32d   : > { %2866 = vmatprep.subr.bf16.mxu1 %v3122_v39 }
 0x32f   : > { %2845 = vmatpush3.bf16.msra.mxu0 %v3123_v41 }
 0x330   : > { %2867 = vmatpush3.bf16.msra.mxu1 %v3124_v58  ;;  %2874 = vmatprep.subr.bf16.mxu0 %v3125_v60 }
 0x331   : > { %2896 = vmatprep.subr.bf16.mxu1 %v3126_v42 }
 0x332   : > { %2277 = vmatmul.mubr.bf16.vlgmr.msra.gmra.mrb[24].mxu0 %v1045_v0 }
 0x333   : > { %2317 = vmatmul.mubr.bf16.vlgmr.msra.gmra.mrb[24].mxu1 %v1047_v30  ;;  %2875 = vmatpush3.bf16.msra.mxu0 %v3127_v59 }
 0x334   : > { %2356 = vmatprep.mubr.bf16.mxu0 %v1050_v6  ;;  %2897 = vmatpush3.bf16.msra.mxu1 %v3128_v29 }
 0x335   : > { %2396 = vmatprep.mubr.bf16.mxu1 %v1052_v47  ;;  %2876 = vmatprep.subr.bf16.mxu0 %v3129_v45 }
 0x336   : > { %2898 = vmatprep.subr.bf16.mxu1 %v3130_v46 }
 0x337   : > { %2877 = vmatpush3.bf16.msra.mxu0 %v3131_v7 }
 0x338   : > { %2899 = vmatpush3.bf16.msra.mxu1 %v3132_v48  ;;  %2878 = vmatprep.subr.bf16.mxu0 %v3133_v1 }
 0x339   : > { %2900 = vmatprep.subr.bf16.mxu1 %v3134_v49 }
 0x33b   : > { %2879 = vmatpush3.bf16.msra.mxu0 %v3135_v50 }
 0x33c   : > { %2901 = vmatpush3.bf16.msra.mxu1 %v3136_v2  ;;  %2880 = vmatprep.subr.bf16.mxu0 %v3137_v51 }
 0x33d   : > { %2902 = vmatprep.subr.bf16.mxu1 %v3138_v52 }
 0x33f   : > { %2881 = vmatpush3.bf16.msra.mxu0 %v3139_v53 }
 0x340   : > { %2903 = vmatpush3.bf16.msra.mxu1 %v3140_v35  ;;  %2882 = vmatprep.subr.bf16.mxu0 %v3141_v36 }
 0x341   : > { %2904 = vmatprep.subr.bf16.mxu1 %v3142_v54 }
 0x343   : > { %2883 = vmatpush3.bf16.msra.mxu0 %v3143_v55 }
 0x344   : > { %2905 = vmatpush3.bf16.msra.mxu1 %v3144_v56  ;;  %2884 = vmatprep.subr.bf16.mxu0 %v3145_v57 }
 0x345   : > { %2906 = vmatprep.subr.bf16.mxu1 %v3146_v3  ;;  %v3161_v3 = vld [vmem:[%s3752_s16] sm:$0xff] }
 0x347   : > { %2885 = vmatpush3.bf16.msra.mxu0 %v3147_v4 }
 0x348   : > { %2907 = vmatpush3.bf16.msra.mxu1 %v3148_v5  ;;  %2886 = vmatprep.subr.bf16.mxu0 %v3149_v62 }
 0x349   : > { %2908 = vmatprep.subr.bf16.mxu1 %v3150_v63 }
 0x34b   : > { %2887 = vmatpush3.bf16.msra.mxu0 %v3151_v8 }
 0x34c   : > { %2909 = vmatpush3.bf16.msra.mxu1 %v3152_v9  ;;  %2888 = vmatprep.subr.bf16.mxu0 %v3153_v10 }
 0x34d   : > { %2910 = vmatprep.subr.bf16.mxu1 %v3154_v11 }
 0x34f   : > { %2889 = vmatpush3.bf16.msra.mxu0 %v3155_v12 }
 0x350   : > { %2911 = vmatpush3.bf16.msra.mxu1 %v3156_v14 }
 0x352   : > { %2357 = vmatmul.mubr.bf16.vlgmr.msra.gmra.mrb[28].mxu0 %v1049_v16 }
 0x353   : > { %2397 = vmatmul.mubr.bf16.vlgmr.msra.gmra.mrb[28].mxu1 %v1051_v19 }
 0x3c5   : > { %v2758_v20 = vpop.f32.mrb[16].mxu0  ;;  %v2780_v21 = vpop.f32.mrb[16].mxu1 }
 0x3c6   : > { %v2759_v24 = vpop.f32.mrb[17].mxu0  ;;  %v2781_v25 = vpop.f32.mrb[17].mxu1 }
 0x3c7   : > { %v2760_v26 = vadd.f32 %v2759_v24, %v2758_v20  ;;  %v2782_v31 = vadd.f32 %v2781_v25, %v2780_v21  ;;  %v2761_v27 = vpop.f32.mrb[18].mxu0  ;;  %v2783_v23 = vpop.f32.mrb[18].mxu1 }
 0x3c8   : > { %v2762_v32 = vpop.f32.mrb[19].mxu0  ;;  %v2784_v33 = vpop.f32.mrb[19].mxu1 }
 0x3c9   : > { %v2119_v34 = vadd.f32 %v2760_v26, %v2609_v22 }
 0x3cb   : > { %v2159_v28 = vadd.f32 %v2782_v31, %v2119_v34 }
 0x3e5   : > { %v2802_v37 = vpop.f32.mrb[20].mxu0  ;;  %v2824_v38 = vpop.f32.mrb[20].mxu1 }
 0x3e6   : > { %v2803_v39 = vpop.f32.mrb[21].mxu0  ;;  %v2825_v61 = vpop.f32.mrb[21].mxu1 }
 0x3e7   : > { %v2804_v40 = vadd.f32 %v2803_v39, %v2802_v37  ;;  %v2826_v41 = vadd.f32 %v2825_v61, %v2824_v38  ;;  %v2805_v17 = vpop.f32.mrb[22].mxu0  ;;  %v2827_v58 = vpop.f32.mrb[22].mxu1 }
 0x3e8   : > { %v2806_v60 = vpop.f32.mrb[23].mxu0  ;;  %v2828_v18 = vpop.f32.mrb[23].mxu1 }
 0x3e9   : > { %v2199_v42 = vadd.f32 %v2804_v40, %v2159_v28 }
 0x3eb   : > { %v2239_v43 = vadd.f32 %v2826_v41, %v2199_v42 }
 0x405   : > { %v2846_v44 = vpop.f32.mrb[24].mxu0 }
 0x406   : > { %v2868_v59 = vpop.f32.mrb[24].mxu1  ;;  %v2847_v0 = vpop.f32.mrb[25].mxu0 }
 0x407   : > { %v2848_v29 = vadd.f32 %v2847_v0, %v2846_v44  ;;  %v2869_v30 = vpop.f32.mrb[25].mxu1  ;;  %v2849_v45 = vpop.f32.mrb[26].mxu0 }
 0x408   : > { %v2870_v6 = vadd.f32 %v2869_v30, %v2868_v59  ;;  %v2871_v46 = vpop.f32.mrb[26].mxu1  ;;  %v2850_v47 = vpop.f32.mrb[27].mxu0 }
 0x409   : > { %v2279_v7 = vadd.f32 %v2848_v29, %v2239_v43  ;;  %v2872_v48 = vpop.f32.mrb[27].mxu1 }
 0x40b   : > { %v2319_v1 = vadd.f32 %v2870_v6, %v2279_v7 }
 0x425   : > { %v2890_v49 = vpop.f32.mrb[28].mxu0 }
 0x426   : > { %v2912_v50 = vpop.f32.mrb[28].mxu1  ;;  %v2891_v2 = vpop.f32.mrb[29].mxu0 }
 0x427   : > { %v2892_v51 = vadd.f32 %v2891_v2, %v2890_v49  ;;  %v2913_v52 = vpop.f32.mrb[29].mxu1  ;;  %v2893_v53 = vpop.f32.mrb[30].mxu0 }
 0x428   : > { %v2914_v35 = vadd.f32 %v2913_v52, %v2912_v50  ;;  %v2915_v36 = vpop.f32.mrb[30].mxu1  ;;  %v2894_v54 = vpop.f32.mrb[31].mxu0 }
 0x429   : > { %v2359_v55 = vadd.f32 %v2892_v51, %v2319_v1  ;;  %v2916_v56 = vpop.f32.mrb[31].mxu1 }
 0x42b   : > { %v2399_v57 = vadd.f32 %v2914_v35, %v2359_v55 }
 0x42d   : > { %v2404_v4 = vadd.f32 %v3161_v3, %v2399_v57 }
 0x42f   : > { %2405 = vst.msk [vmem:[%s372_s29] sm:$0xff] %vm377_vm0, %v2404_v4 }
 0x430   : > { %3373 = shalt.err (!%p3370_p0)
}
 0x431   : > { %s3374_s10 = scalar_lea.hbm %s3883_s19, 128  ;;  %s3378_s16 = scalar_lea.hbm %s3935_s7, 256 }
 0x432   : > { %p3375_p6 = scmp.ne.s32.totalorder %s3883_s19, %s3374_s10  ;;  %p3379_p8 = scmp.lt.u32.totalorder %s3883_s19, %s3935_s7 }
 0x433   : > { %p3380_p5 = scmp.lt.u32.totalorder %s3378_s16, %s3374_s10  ;;  %p3382_p7 = scmp.lt.u32.totalorder %s3374_s10, %s3883_s19 }
 0x434   : > { %p3376_p11 = pnand %p3375_p6, %p3954_p10 }
 0x435   : > { %p3381_p9 = por %p3380_p5, %p3379_p8 }
 0x436   : > { %p3377_p12 = pneg %p3376_p11 }
 0x437   : > { %p3383_p4 = por %p3382_p7, %p3381_p9 }
 0x439   : > { %p3384_p13 = pnand %p3383_p4, %p3377_p12 }
 0x43b   : > { %3387 = shalt.err (!%p3384_p13)
}
 0x43c   : > { %2944 = dma.vmem_to_hbm [thread:$0]  (%p3954_p10), %s3885_s12, 128, %s3883_s19, %s2407_s21  }
 0x43d PF: > { %s2432_s18 = sand.u32 1, %s3426_s24   ;;  %p3955_p2 = scmp.ne.s32.totalorder %s3945_s23, 0 }
 0x43e   : > { %p3956_p1 = scmp.ge.s32.totalorder %s3438_s27, 2  ;;  %s2433_s28 = scalar_lea.sflag [#allocation4], %s2432_s18 }
 0x440   : > { %p2970_p3 = pnand %p3956_p1, %p3955_p2 }
 0x442   : > { %3421 = dma.done.wait (!%p2970_p3), %s2433_s28, 128  }
 0x443   : > { %3423 = vsyncadd (!%p2970_p3), %s2433_s28, 4294967168  ;;  %p23_p0 = scmp.ge.s32.totalorder %s3676_s11, 4   ;;  %s3957_s24 = smov %s3430_s25 }
 0x444   : > { %s3958_s25 = smov %s3434_s26  ;;  %s3959_s26 = smov %s3688_s22 }
 0x445   : > { %s3960_s27 = smov %s3676_s11  ;;  %25 = sbr.rel (!%p23_p0) target bundleno = 8 (0x8), region = 117 }
 0x44c   :  { %2438 = vsyncpa [#allocation3], 1 }
 0x44d   :  { %2440 = vsyncpa [#allocation3 + $0x1], 1 }
 0x44e   :  { %2441 = vsyncpa [#allocation6], 1 }
 0x44f   :  { %2442 = vsyncpa [#allocation9], 1 }
 0x450   :  { %2443 = vsyncpa [#allocation12], 1 }
 0x451   :  { %2444 = vsyncpa [#allocation4], 1 }
 0x452   :  { %2446 = vsyncpa [#allocation4 + $0x1], 1 }

</bundles_post_ra>
